<compile_context>
chip_gen: v7x
topology: tpu7x:2x2x1
jax: 0.10.0
libtpu: 0.0.40
codegen_flags: <defaults>
</compile_context>

<pallas_src>
import functools

import jax
import jax.numpy as jnp
from jax.experimental import pallas as pl
from jax.experimental.pallas import tpu as pltpu

# Set to jnp.bfloat16 on v6e / v7x for ~2x MXU throughput and half the HBM
# traffic on matmul operands (accumulation stays f32).  Kept at f32 here so the
# 1e-4 correctness check against the pure-f32 reference holds.
COMPUTE_DTYPE = jnp.float32
VMEM_LIMIT = 32 * 1024 * 1024   # safe on v5e/v6e (128 MiB phys) and v7x (64 MiB phys)


# ---------------------------------------------------------------------------
# Pallas kernels
# ---------------------------------------------------------------------------
def _mlp2_kernel(x_ref, w1_ref, b1_ref, w2_ref, b2_ref, o_ref, *, act1, act2):
    """Fused 2-layer pointwise MLP: y = f2(f1(x @ W1 + b1) @ W2 + b2).

    The [tm, hidden] intermediate stays in VMEM/vregs (no HBM round trip).
    """
    h = jnp.dot(x_ref[...], w1_ref[...], preferred_element_type=jnp.float32)
    h = h + b1_ref[...]
    if act1:
        h = jax.nn.gelu(h, approximate=True)
    y = jnp.dot(h.astype(w2_ref.dtype), w2_ref[...],
                preferred_element_type=jnp.float32)
    y = y + b2_ref[...]
    if act2:
        y = jax.nn.gelu(y, approximate=True)
    o_ref[...] = y.astype(o_ref.dtype)


def _linear_res_act_kernel(x_ref, w_ref, b_ref, r_ref, o_ref):
    """Fused Fourier-layer combine: y = GELU(x @ W + b + residual)."""
    y = jnp.dot(x_ref[...], w_ref[...], preferred_element_type=jnp.float32)
    y = y + b_ref[...] + r_ref[...]
    o_ref[...] = jax.nn.gelu(y, approximate=True).astype(o_ref.dtype)


def _spectral_kernel(x_ref, w_ref, o_ref, *, nb, cout):
    """Complex per-mode channel mix, MT modes per grid step.

    x_ref: [MT, 2B, Cin]   rows [0:B]  = Re(x_ft), rows [B:2B]   = Im(x_ft)
    w_ref: [MT, Cin, 2Co]  cols [0:Co] = Re(W),    cols [Co:2Co] = Im(W)
    o_ref: [MT, B,  2Co]   cols [0:Co] = Re(out),  cols [Co:2Co] = Im(out)

    One batched MXU matmul per block replaces the 4 per-mode matmuls:
        P  = [xr; xi] @ [wr | wi]
        Re = xr@wr - xi@wi = P[:, :B, :Co] - P[:, B:, Co:]
        Im = xr@wi + xi@wr = P[:, :B, Co:] + P[:, B:, :Co]
    """
    p = jnp.einsum("mbc,mco->mbo", x_ref[...], w_ref[...],
                   preferred_element_type=jnp.float32)
    real = p[:, :nb, :cout] - p[:, nb:, cout:]
    imag = p[:, :nb, cout:] + p[:, nb:, :cout]
    o_ref[...] = jnp.concatenate([real, imag], axis=-1).astype(o_ref.dtype)


# ---------------------------------------------------------------------------
# Tiling helpers
# ---------------------------------------------------------------------------
def _choose_row_tile(n, preferred=256):
    """Largest row tile <= preferred, keeping >= 2 grid steps (v7x has 2 TCs)."""
    tm = min(preferred, max(8, ((n + 7) // 8) * 8))
    while tm > 8 and pl.cdiv(n, tm) < 2:
        tm //= 2
    return max(tm, 8)


def _choose_mode_tile(m, preferred=16):
    mt = min(preferred, m)
    while mt > 1 and m % mt != 0:
        mt -= 1
    return mt


def _pad_rows(a, n_pad):
    n = a.shape[0]
    if n_pad == n:
        return a
    return jnp.pad(a, [(0, n_pad - n)] + [(0, 0)] * (a.ndim - 1))


# ---------------------------------------------------------------------------
# Pallas wrappers
# ---------------------------------------------------------------------------
def pointwise_mlp2(x2d, w1, b1, w2, b2, *, act1=True, act2=False, tm=None):
    n, cin = x2d.shape
    ch = w1.shape[1]
    cout = w2.shape[1]
    if tm is None:
        tm = _choose_row_tile(n)
    n_pad = pl.cdiv(n, tm) * tm

    xp = _pad_rows(x2d.astype(COMPUTE_DTYPE), n_pad)
    w1c = w1.astype(COMPUTE_DTYPE)
    w2c = w2.astype(COMPUTE_DTYPE)

    cost = pl.CostEstimate(
        flops=2 * n_pad * (cin * ch + ch * cout),
        transcendentals=n_pad * (ch * int(act1) + cout * int(act2)),
        bytes_accessed=4 * (n_pad * cin + cin * ch + ch + ch * cout + cout
                            + n_pad * cout),
    )

    out = pl.pallas_call(
        functools.partial(_mlp2_kernel, act1=act1, act2=act2),
        out_shape=jax.ShapeDtypeStruct((n_pad, cout), jnp.float32),
        grid_spec=pltpu.PrefetchScalarGridSpec(
            num_scalar_prefetch=0,
            grid=(n_pad // tm,),
            in_specs=[
                pl.BlockSpec((tm, cin), lambda i: (i, 0)),
                pl.BlockSpec((cin, ch), lambda i: (0, 0)),
                pl.BlockSpec((1, ch), lambda i: (0, 0)),
                pl.BlockSpec((ch, cout), lambda i: (0, 0)),
                pl.BlockSpec((1, cout), lambda i: (0, 0)),
            ],
            out_specs=pl.BlockSpec((tm, cout), lambda i: (i, 0)),
        ),
        compiler_params=pltpu.CompilerParams(
            dimension_semantics=("parallel",),
            vmem_limit_bytes=VMEM_LIMIT),
        cost_estimate=cost,
    )(xp, w1c, b1, w2c, b2)
    return out[:n] if n_pad != n else out


def pointwise_linear_res_act(x2d, w, b, res2d, *, tm=None):
    n, cin = x2d.shape
    cout = w.shape[1]
    if tm is None:
        tm = _choose_row_tile(n)
    n_pad = pl.cdiv(n, tm) * tm

    xp = _pad_rows(x2d.astype(COMPUTE_DTYPE), n_pad)
    rp = _pad_rows(res2d, n_pad)
    wc = w.astype(COMPUTE_DTYPE)

    cost = pl.CostEstimate(
        flops=2 * n_pad * cin * cout,
        transcendentals=n_pad * cout,
        bytes_accessed=4 * (n_pad * cin + cin * cout + cout + 2 * n_pad * cout),
    )

    out = pl.pallas_call(
        _linear_res_act_kernel,
        out_shape=jax.ShapeDtypeStruct((n_pad, cout), jnp.float32),
        grid_spec=pltpu.PrefetchScalarGridSpec(
            num_scalar_prefetch=0,
            grid=(n_pad // tm,),
            in_specs=[
                pl.BlockSpec((tm, cin), lambda i: (i, 0)),
                pl.BlockSpec((cin, cout), lambda i: (0, 0)),
                pl.BlockSpec((1, cout), lambda i: (0, 0)),
                pl.BlockSpec((tm, cout), lambda i: (i, 0)),
            ],
            out_specs=pl.BlockSpec((tm, cout), lambda i: (i, 0)),
        ),
        compiler_params=pltpu.CompilerParams(
            dimension_semantics=("parallel",),
            vmem_limit_bytes=VMEM_LIMIT),
        cost_estimate=cost,
    )(xp, wc, b, rp)
    return out[:n] if n_pad != n else out


def spectral_mix(x_stacked, w_stacked):
    """x_stacked: [M, 2B, Cin]; w_stacked: [M, Cin, 2*Cout] -> [M, B, 2*Cout]."""
    m, twob, cin = x_stacked.shape
    nb = twob // 2
    cout2 = w_stacked.shape[2]
    cout = cout2 // 2
    mt = _choose_mode_tile(m)

    xs = x_stacked.astype(COMPUTE_DTYPE)
    ws = w_stacked.astype(COMPUTE_DTYPE)

    cost = pl.CostEstimate(
        flops=2 * m * twob * cin * cout2,
        transcendentals=0,
        bytes_accessed=4 * (m * twob * cin + m * cin * cout2 + m * nb * cout2),
    )

    return pl.pallas_call(
        functools.partial(_spectral_kernel, nb=nb, cout=cout),
        out_shape=jax.ShapeDtypeStruct((m, nb, cout2), jnp.float32),
        grid_spec=pltpu.PrefetchScalarGridSpec(
            num_scalar_prefetch=0,
            grid=(m // mt,),
            in_specs=[
                pl.BlockSpec((mt, twob, cin), lambda i: (i, 0, 0)),
                pl.BlockSpec((mt, cin, cout2), lambda i: (i, 0, 0)),
            ],
            out_specs=pl.BlockSpec((mt, nb, cout2), lambda i: (i, 0, 0)),
        ),
        compiler_params=pltpu.CompilerParams(
            dimension_semantics=("parallel",),
            vmem_limit_bytes=VMEM_LIMIT),
        cost_estimate=cost,
    )(xs, ws)


# ---------------------------------------------------------------------------
# FNO forward (glue in JAX, hot paths in Pallas)
# ---------------------------------------------------------------------------
def fno_forward(x, params, m1, m2):
    B, Cin, H, W = x.shape
    N = B * H * W
    assert 2 * m1 <= H and m2 <= W // 2 + 1
    Wf = W // 2 + 1
    half = m1 * m2

    # single NCHW -> NHWC transpose at entry; channels-last everywhere after
    h = x.transpose(0, 2, 3, 1).reshape(N, Cin)

    # ----- lifting (fused 2-layer pointwise MLP) -----
    h = pointwise_mlp2(h, params["lift_w1"], params["lift_b1"],
                       params["lift_w2"], params["lift_b2"],
                       act1=True, act2=False)
    width = h.shape[1]

    # ----- Fourier kernel block -----
    for layer in params["fourier"]:
        hn = h.reshape(B, H, W, width)                         # NHWC, no transpose
        x_ft = jnp.fft.rfft2(hn, axes=(1, 2))                  # [B, H, Wf, C]

        top = x_ft[:, :m1, :m2, :]                             # [B, m1, m2, C]
        bot = x_ft[:, H - m1:, :m2, :]

        def to_mbc(z):                                         # -> [m1*m2, B, C]
            return z.reshape(B, half, width).transpose(1, 0, 2)

        xm = jnp.concatenate([to_mbc(top), to_mbc(bot)], axis=0)       # [M, B, C]
        x_stacked = jnp.concatenate(
            [jnp.real(xm), jnp.imag(xm)], axis=1).astype(jnp.float32)  # [M, 2B, C]

        out = spectral_mix(x_stacked, layer["w_spec"])         # [M, B, 2*Co] f32
        cout = out.shape[-1] // 2
        out_c = (out[..., :cout] + 1j * out[..., cout:]).astype(jnp.complex64)

        def to_modes(z):                                       # [half,B,Co]->[B,m1,m2,Co]
            return z.transpose(1, 0, 2).reshape(B, m1, m2, cout)

        top_o = jnp.pad(to_modes(out_c[:half]),
                        ((0, 0), (0, 0), (0, Wf - m2), (0, 0)))
        bot_o = jnp.pad(to_modes(out_c[half:]),
                        ((0, 0), (0, 0), (0, Wf - m2), (0, 0)))
        mid = jnp.zeros((B, H - 2 * m1, Wf, cout), jnp.complex64)
        out_ft = jnp.concatenate([top_o, mid, bot_o], axis=1)  # [B, H, Wf, Co]

        spec = jnp.fft.irfft2(out_ft, s=(H, W), axes=(1, 2))   # [B, H, W, Co]
        spec2d = spec.reshape(N, cout).astype(jnp.float32)

        # fused: GELU( h @ W + b + spectral )
        h = pointwise_linear_res_act(h, layer["w"], layer["b"], spec2d)

    # ----- projection (fused 2-layer pointwise MLP) -----
    h = pointwise_mlp2(h, params["proj_w1"], params["proj_b1"],
                       params["proj_w2"], params["proj_b2"],
                       act1=True, act2=False)

    out_ch = h.shape[1]
    return h.reshape(B, H, W, out_ch).transpose(0, 3, 1, 2)    # back to NCHW


# ---------------------------------------------------------------------------
# Pure-JAX reference (same parameterization) for correctness check
# ---------------------------------------------------------------------------
def fno_reference(x, params, m1, m2):
    B, Cin, H, W = x.shape

    def lin(h, w, b, act):
        y = h @ w + b
        return jax.nn.gelu(y, approximate=True) if act else y

    h = x.transpose(0, 2, 3, 1).reshape(-1, Cin)
    h = lin(h, params["lift_w1"], params["lift_b1"], True)
    h = lin(h, params["lift_w2"], params["lift_b2"], False)
    width = h.shape[1]

    for layer in params["fourier"]:
        hn = h.reshape(B, H, W, width).transpose(0, 3, 1, 2)
        x_ft = jnp.fft.rfft2(hn, axes=(-2, -1))
        wc = layer["wr"] + 1j * layer["wi"]                    # [M, Ci, Co]
        half = m1 * m2
        w1 = wc[:half].reshape(m1, m2, width, width)
        w2 = wc[half:].reshape(m1, m2, width, width)
        out_ft = jnp.zeros((B, width, H, W // 2 + 1), dtype=jnp.complex64)
        out_ft = out_ft.at[:, :, :m1, :m2].set(
            jnp.einsum("bixy,xyio->boxy", x_ft[:, :, :m1, :m2], w1))
        out_ft = out_ft.at[:, :, -m1:, :m2].set(
            jnp.einsum("bixy,xyio->boxy", x_ft[:, :, -m1:, :m2], w2))
        spec = jnp.fft.irfft2(out_ft, s=(H, W), axes=(-2, -1))
        spec2d = spec.transpose(0, 2, 3, 1).reshape(-1, width)
        h = jax.nn.gelu(h @ layer["w"] + layer["b"] + spec2d, approximate=True)

    h = lin(h, params["proj_w1"], params["proj_b1"], True)
    h = lin(h, params["proj_w2"], params["proj_b2"], False)
    return h.reshape(B, H, W, -1).transpose(0, 3, 1, 2)


# ---------------------------------------------------------------------------
# Deterministic parameter init
# ---------------------------------------------------------------------------
def init_params(key, in_ch, width, out_ch, lift_hidden, proj_hidden,
                n_layers, m1, m2):
    def dense(k, fi, fo):
        s = 1.0 / jnp.sqrt(jnp.float32(fi))
        w = jax.random.uniform(k, (fi, fo), jnp.float32, -s, s)
        return w, jnp.zeros((1, fo), jnp.float32)

    keys = iter(jax.random.split(key, 8 + 4 * n_layers))
    p = {}
    p["lift_w1"], p["lift_b1"] = dense(next(keys), in_ch, lift_hidden)
    p["lift_w2"], p["lift_b2"] = dense(next(keys), lift_hidden, width)
    p["proj_w1"], p["proj_b1"] = dense(next(keys), width, proj_hidden)
    p["proj_w2"], p["proj_b2"] = dense(next(keys), proj_hidden, out_ch)

    spec_scale = 1.0 / (width * width)
    M = 2 * m1 * m2
    layers = []
    for _ in range(n_layers):
        layer = {}
        layer["wr"] = spec_scale * jax.random.uniform(
            next(keys), (M, width, width), jnp.float32)
        layer["wi"] = spec_scale * jax.random.uniform(
            next(keys), (M, width, width), jnp.float32)
        # pre-stacked [Wr | Wi] along output channels for the spectral kernel
        layer["w_spec"] = jnp.concatenate([layer["wr"], layer["wi"]], axis=-1)
        layer["w"], layer["b"] = dense(next(keys), width, width)
        _ = next(keys)
        layers.append(layer)
    p["fourier"] = layers
    return p


# ---------------------------------------------------------------------------
if __name__ == "__main__":
    key = jax.random.PRNGKey(0)
    k_x, k_p = jax.random.split(key)

    B, Cin, H, W = 2, 3, 16, 16
    width, out_ch = 32, 1
    lift_hidden, proj_hidden = 32, 64
    n_layers, m1, m2 = 2, 8, 5

    x = jax.random.normal(k_x, (B, Cin, H, W), jnp.float32)
    params = init_params(k_p, Cin, width, out_ch, lift_hidden, proj_hidden,
                         n_layers, m1, m2)

    fwd = jax.jit(fno_forward, static_argnums=(2, 3))
    out = jax.block_until_ready(fwd(x, params, m1, m2))
    assert out.shape == (B, out_ch, H, W), out.shape

    ref = jax.block_until_ready(fno_reference(x, params, m1, m2))
    assert jnp.allclose(out, ref, atol=1e-4, rtol=1e-4), \
        float(jnp.max(jnp.abs(out - ref)))

    print("KERNEL_OK")
</pallas_src>

<mosaic_0001>
module attributes {stable_mosaic.version = 11 : i64} {
  func.func @_mlp2_kernel(%arg0: i32, %arg1: memref<256x3xf32, #tpu.memory_space<vmem>>, %arg2: memref<3x32xf32, #tpu.memory_space<vmem>>, %arg3: memref<1x32xf32, #tpu.memory_space<vmem>>, %arg4: memref<32x32xf32, #tpu.memory_space<vmem>>, %arg5: memref<1x32xf32, #tpu.memory_space<vmem>>, %arg6: memref<256x32xf32, #tpu.memory_space<vmem>>) attributes {dimension_semantics = [#tpu.dimension_semantics<parallel>], iteration_bounds = array<i64: 2>, scalar_prefetch = 0 : i64, scratch_operands = 0 : i64, tpu.core_type = #tpu.core_type<tc>, window_params = [{transform_indices = @transform_0, window_bounds = array<i64: 256, 3>}, {pipeline_mode = #tpu.pipeline_mode<synchronous>, transform_indices = @transform_1, window_bounds = array<i64: 3, 32>}, {pipeline_mode = #tpu.pipeline_mode<synchronous>, transform_indices = @transform_2, window_bounds = array<i64: 1, 32>}, {pipeline_mode = #tpu.pipeline_mode<synchronous>, transform_indices = @transform_3, window_bounds = array<i64: 32, 32>}, {pipeline_mode = #tpu.pipeline_mode<synchronous>, transform_indices = @transform_4, window_bounds = array<i64: 1, 32>}, {transform_indices = @transform_5, window_bounds = array<i64: 256, 32>}]} {
    %c0 = arith.constant 0 : index
    %c0_0 = arith.constant 0 : index
    %0 = vector.load %arg1[%c0, %c0_0] : memref<256x3xf32, #tpu.memory_space<vmem>>, vector<256x3xf32>
    %c0_1 = arith.constant 0 : index
    %c0_2 = arith.constant 0 : index
    %1 = vector.load %arg2[%c0_1, %c0_2] : memref<3x32xf32, #tpu.memory_space<vmem>>, vector<3x32xf32>
    %cst = arith.constant dense<0.000000e+00> : vector<256x32xf32>
    %2 = tpu.matmul %0, %1, %cst {dimension_numbers = #tpu.dot_dimension_numbers<[1], [0], [0], [1], [0, 0, 1, 1], [], []>} : vector<256x3xf32>, vector<3x32xf32>, vector<256x32xf32> -> vector<256x32xf32>
    %c0_3 = arith.constant 0 : index
    %c0_4 = arith.constant 0 : index
    %3 = vector.load %arg3[%c0_3, %c0_4] : memref<1x32xf32, #tpu.memory_space<vmem>>, vector<1x32xf32>
    %4 = vector.broadcast %3 : vector<1x32xf32> to vector<256x32xf32>
    %5 = arith.addf %2, %4 : vector<256x32xf32>
    %6 = arith.mulf %5, %5 : vector<256x32xf32>
    %7 = arith.mulf %5, %6 : vector<256x32xf32>
    %cst_5 = arith.constant 4.471500e-02 : f32
    %8 = vector.broadcast %cst_5 : f32 to vector<256x32xf32>
    %9 = arith.mulf %8, %7 : vector<256x32xf32>
    %10 = arith.addf %5, %9 : vector<256x32xf32>
    %cst_6 = arith.constant 0.797884583 : f32
    %11 = vector.broadcast %cst_6 : f32 to vector<256x32xf32>
    %12 = arith.mulf %11, %10 : vector<256x32xf32>
    %13 = math.tanh %12 : vector<256x32xf32>
    %cst_7 = arith.constant 1.000000e+00 : f32
    %14 = vector.broadcast %cst_7 : f32 to vector<256x32xf32>
    %15 = arith.addf %14, %13 : vector<256x32xf32>
    %cst_8 = arith.constant 5.000000e-01 : f32
    %16 = vector.broadcast %cst_8 : f32 to vector<256x32xf32>
    %17 = arith.mulf %16, %15 : vector<256x32xf32>
    %18 = arith.mulf %5, %17 : vector<256x32xf32>
    %c0_9 = arith.constant 0 : index
    %c0_10 = arith.constant 0 : index
    %19 = vector.load %arg4[%c0_9, %c0_10] : memref<32x32xf32, #tpu.memory_space<vmem>>, vector<32x32xf32>
    %cst_11 = arith.constant dense<0.000000e+00> : vector<256x32xf32>
    %20 = tpu.matmul %18, %19, %cst_11 {dimension_numbers = #tpu.dot_dimension_numbers<[1], [0], [0], [1], [0, 0, 1, 1], [], []>} : vector<256x32xf32>, vector<32x32xf32>, vector<256x32xf32> -> vector<256x32xf32>
    %c0_12 = arith.constant 0 : index
    %c0_13 = arith.constant 0 : index
    %21 = vector.load %arg5[%c0_12, %c0_13] : memref<1x32xf32, #tpu.memory_space<vmem>>, vector<1x32xf32>
    %22 = vector.broadcast %21 : vector<1x32xf32> to vector<256x32xf32>
    %23 = arith.addf %20, %22 : vector<256x32xf32>
    %c0_14 = arith.constant 0 : index
    %c0_15 = arith.constant 0 : index
    %24 = vector.load %arg6[%c0_14, %c0_15] : memref<256x32xf32, #tpu.memory_space<vmem>>, vector<256x32xf32>
    tpu.vector_store %arg6[%c0_14, %c0_15], %23 {strides = array<i32>} : memref<256x32xf32, #tpu.memory_space<vmem>>, vector<256x32xf32>,
    return
  }
  func.func @transform_0(%arg0: i32) -> (i32, i32) {
    %c0_i32 = arith.constant 0 : i32
    %c0_i32_0 = arith.constant 0 : i32
    return %arg0, %c0_i32 : i32, i32
  }
  func.func @transform_1(%arg0: i32) -> (i32, i32) {
    %c0_i32 = arith.constant 0 : i32
    %c0_i32_0 = arith.constant 0 : i32
    %c0_i32_1 = arith.constant 0 : i32
    return %c0_i32, %c0_i32_0 : i32, i32
  }
  func.func @transform_2(%arg0: i32) -> (i32, i32) {
    %c0_i32 = arith.constant 0 : i32
    %c0_i32_0 = arith.constant 0 : i32
    %c0_i32_1 = arith.constant 0 : i32
    return %c0_i32, %c0_i32_0 : i32, i32
  }
  func.func @transform_3(%arg0: i32) -> (i32, i32) {
    %c0_i32 = arith.constant 0 : i32
    %c0_i32_0 = arith.constant 0 : i32
    %c0_i32_1 = arith.constant 0 : i32
    return %c0_i32, %c0_i32_0 : i32, i32
  }
  func.func @transform_4(%arg0: i32) -> (i32, i32) {
    %c0_i32 = arith.constant 0 : i32
    %c0_i32_0 = arith.constant 0 : i32
    %c0_i32_1 = arith.constant 0 : i32
    return %c0_i32, %c0_i32_0 : i32, i32
  }
  func.func @transform_5(%arg0: i32) -> (i32, i32) {
    %c0_i32 = arith.constant 0 : i32
    %c0_i32_0 = arith.constant 0 : i32
    return %arg0, %c0_i32 : i32, i32
  }
}

module attributes {stable_mosaic.version = 11 : i64} {
  func.func @_spectral_kernel(%arg0: i32, %arg1: memref<16x4x32xf32, #tpu.memory_space<vmem>>, %arg2: memref<16x32x64xf32, #tpu.memory_space<vmem>>, %arg3: memref<16x2x64xf32, #tpu.memory_space<vmem>>) attributes {dimension_semantics = [#tpu.dimension_semantics<parallel>], iteration_bounds = array<i64: 5>, scalar_prefetch = 0 : i64, scratch_operands = 0 : i64, tpu.core_type = #tpu.core_type<tc>, window_params = [{transform_indices = @transform_0, window_bounds = array<i64: 16, 4, 32>}, {transform_indices = @transform_1, window_bounds = array<i64: 16, 32, 64>}, {transform_indices = @transform_2, window_bounds = array<i64: 16, 2, 64>}]} {
    %c0 = arith.constant 0 : index
    %c0_0 = arith.constant 0 : index
    %c0_1 = arith.constant 0 : index
    %0 = vector.load %arg1[%c0, %c0_0, %c0_1] : memref<16x4x32xf32, #tpu.memory_space<vmem>>, vector<16x4x32xf32>
    %c0_2 = arith.constant 0 : index
    %c0_3 = arith.constant 0 : index
    %c0_4 = arith.constant 0 : index
    %1 = vector.load %arg2[%c0_2, %c0_3, %c0_4] : memref<16x32x64xf32, #tpu.memory_space<vmem>>, vector<16x32x64xf32>
    "tpu.trace_start"() <{level = 10 : i32, message = "mbc,mco->mbo"}> : () -> ()
    %cst = arith.constant dense<0.000000e+00> : vector<16x4x64xf32>
    %2 = tpu.matmul %0, %1, %cst {dimension_numbers = #tpu.dot_dimension_numbers<[2], [1], [1], [2], [0, 0, 0, 1, 1, 2], [0], [0]>} : vector<16x4x32xf32>, vector<16x32x64xf32>, vector<16x4x64xf32> -> vector<16x4x64xf32>
    "tpu.trace_stop"() : () -> ()
    %3 = vector.extract_strided_slice %2 {offsets = [0, 0, 0], sizes = [16, 2, 32], strides = [1, 1, 1]} : vector<16x4x64xf32> to vector<16x2x32xf32>
    %4 = vector.extract_strided_slice %2 {offsets = [0, 2, 32], sizes = [16, 2, 32], strides = [1, 1, 1]} : vector<16x4x64xf32> to vector<16x2x32xf32>
    %5 = arith.subf %3, %4 : vector<16x2x32xf32>
    %6 = vector.extract_strided_slice %2 {offsets = [0, 0, 32], sizes = [16, 2, 32], strides = [1, 1, 1]} : vector<16x4x64xf32> to vector<16x2x32xf32>
    %7 = vector.extract_strided_slice %2 {offsets = [0, 2, 0], sizes = [16, 2, 32], strides = [1, 1, 1]} : vector<16x4x64xf32> to vector<16x2x32xf32>
    %8 = arith.addf %6, %7 : vector<16x2x32xf32>
    %9 = tpu.concatenate %5, %8 in 2 : vector<16x2x32xf32>, vector<16x2x32xf32> -> vector<16x2x64xf32>
    %c0_5 = arith.constant 0 : index
    %c0_6 = arith.constant 0 : index
    %c0_7 = arith.constant 0 : index
    %10 = vector.load %arg3[%c0_5, %c0_6, %c0_7] : memref<16x2x64xf32, #tpu.memory_space<vmem>>, vector<16x2x64xf32>
    tpu.vector_store %arg3[%c0_5, %c0_6, %c0_7], %9 {strides = array<i32>} : memref<16x2x64xf32, #tpu.memory_space<vmem>>, vector<16x2x64xf32>,
    return
  }
  func.func @transform_0(%arg0: i32) -> (i32, i32, i32) {
    %c0_i32 = arith.constant 0 : i32
    %c0_i32_0 = arith.constant 0 : i32
    %c0_i32_1 = arith.constant 0 : i32
    return %arg0, %c0_i32, %c0_i32_0 : i32, i32, i32
  }
  func.func @transform_1(%arg0: i32) -> (i32, i32, i32) {
    %c0_i32 = arith.constant 0 : i32
    %c0_i32_0 = arith.constant 0 : i32
    %c0_i32_1 = arith.constant 0 : i32
    return %arg0, %c0_i32, %c0_i32_0 : i32, i32, i32
  }
  func.func @transform_2(%arg0: i32) -> (i32, i32, i32) {
    %c0_i32 = arith.constant 0 : i32
    %c0_i32_0 = arith.constant 0 : i32
    %c0_i32_1 = arith.constant 0 : i32
    return %arg0, %c0_i32, %c0_i32_0 : i32, i32, i32
  }
}

module attributes {stable_mosaic.version = 11 : i64} {
  func.func @_mlp2_kernel(%arg0: i32, %arg1: memref<256x32xf32, #tpu.memory_space<vmem>>, %arg2: memref<32x64xf32, #tpu.memory_space<vmem>>, %arg3: memref<1x64xf32, #tpu.memory_space<vmem>>, %arg4: memref<64x1xf32, #tpu.memory_space<vmem>>, %arg5: memref<1x1xf32, #tpu.memory_space<vmem>>, %arg6: memref<256x1xf32, #tpu.memory_space<vmem>>) attributes {dimension_semantics = [#tpu.dimension_semantics<parallel>], iteration_bounds = array<i64: 2>, scalar_prefetch = 0 : i64, scratch_operands = 0 : i64, tpu.core_type = #tpu.core_type<tc>, window_params = [{transform_indices = @transform_0, window_bounds = array<i64: 256, 32>}, {pipeline_mode = #tpu.pipeline_mode<synchronous>, transform_indices = @transform_1, window_bounds = array<i64: 32, 64>}, {pipeline_mode = #tpu.pipeline_mode<synchronous>, transform_indices = @transform_2, window_bounds = array<i64: 1, 64>}, {pipeline_mode = #tpu.pipeline_mode<synchronous>, transform_indices = @transform_3, window_bounds = array<i64: 64, 1>}, {pipeline_mode = #tpu.pipeline_mode<synchronous>, transform_indices = @transform_4, window_bounds = array<i64: 1, 1>}, {transform_indices = @transform_5, window_bounds = array<i64: 256, 1>}]} {
    %c0 = arith.constant 0 : index
    %c0_0 = arith.constant 0 : index
    %0 = vector.load %arg1[%c0, %c0_0] : memref<256x32xf32, #tpu.memory_space<vmem>>, vector<256x32xf32>
    %c0_1 = arith.constant 0 : index
    %c0_2 = arith.constant 0 : index
    %1 = vector.load %arg2[%c0_1, %c0_2] : memref<32x64xf32, #tpu.memory_space<vmem>>, vector<32x64xf32>
    %cst = arith.constant dense<0.000000e+00> : vector<256x64xf32>
    %2 = tpu.matmul %0, %1, %cst {dimension_numbers = #tpu.dot_dimension_numbers<[1], [0], [0], [1], [0, 0, 1, 1], [], []>} : vector<256x32xf32>, vector<32x64xf32>, vector<256x64xf32> -> vector<256x64xf32>
    %c0_3 = arith.constant 0 : index
    %c0_4 = arith.constant 0 : index
    %3 = vector.load %arg3[%c0_3, %c0_4] : memref<1x64xf32, #tpu.memory_space<vmem>>, vector<1x64xf32>
    %4 = vector.broadcast %3 : vector<1x64xf32> to vector<256x64xf32>
    %5 = arith.addf %2, %4 : vector<256x64xf32>
    %6 = arith.mulf %5, %5 : vector<256x64xf32>
    %7 = arith.mulf %5, %6 : vector<256x64xf32>
    %cst_5 = arith.constant 4.471500e-02 : f32
    %8 = vector.broadcast %cst_5 : f32 to vector<256x64xf32>
    %9 = arith.mulf %8, %7 : vector<256x64xf32>
    %10 = arith.addf %5, %9 : vector<256x64xf32>
    %cst_6 = arith.constant 0.797884583 : f32
    %11 = vector.broadcast %cst_6 : f32 to vector<256x64xf32>
    %12 = arith.mulf %11, %10 : vector<256x64xf32>
    %13 = math.tanh %12 : vector<256x64xf32>
    %cst_7 = arith.constant 1.000000e+00 : f32
    %14 = vector.broadcast %cst_7 : f32 to vector<256x64xf32>
    %15 = arith.addf %14, %13 : vector<256x64xf32>
    %cst_8 = arith.constant 5.000000e-01 : f32
    %16 = vector.broadcast %cst_8 : f32 to vector<256x64xf32>
    %17 = arith.mulf %16, %15 : vector<256x64xf32>
    %18 = arith.mulf %5, %17 : vector<256x64xf32>
    %c0_9 = arith.constant 0 : index
    %c0_10 = arith.constant 0 : index
    %19 = vector.load %arg4[%c0_9, %c0_10] : memref<64x1xf32, #tpu.memory_space<vmem>>, vector<64x1xf32>
    %cst_11 = arith.constant dense<0.000000e+00> : vector<256x1xf32>
    %20 = tpu.matmul %18, %19, %cst_11 {dimension_numbers = #tpu.dot_dimension_numbers<[1], [0], [0], [1], [0, 0, 1, 1], [], []>} : vector<256x64xf32>, vector<64x1xf32>, vector<256x1xf32> -> vector<256x1xf32>
    %c0_12 = arith.constant 0 : index
    %c0_13 = arith.constant 0 : index
    %21 = vector.load %arg5[%c0_12, %c0_13] : memref<1x1xf32, #tpu.memory_space<vmem>>, vector<1x1xf32>
    %22 = vector.broadcast %21 : vector<1x1xf32> to vector<256x1xf32>
    %23 = arith.addf %20, %22 : vector<256x1xf32>
    %c0_14 = arith.constant 0 : index
    %c0_15 = arith.constant 0 : index
    %24 = vector.load %arg6[%c0_14, %c0_15] : memref<256x1xf32, #tpu.memory_space<vmem>>, vector<256x1xf32>
    tpu.vector_store %arg6[%c0_14, %c0_15], %23 {strides = array<i32>} : memref<256x1xf32, #tpu.memory_space<vmem>>, vector<256x1xf32>,
    return
  }
  func.func @transform_0(%arg0: i32) -> (i32, i32) {
    %c0_i32 = arith.constant 0 : i32
    %c0_i32_0 = arith.constant 0 : i32
    return %arg0, %c0_i32 : i32, i32
  }
  func.func @transform_1(%arg0: i32) -> (i32, i32) {
    %c0_i32 = arith.constant 0 : i32
    %c0_i32_0 = arith.constant 0 : i32
    %c0_i32_1 = arith.constant 0 : i32
    return %c0_i32, %c0_i32_0 : i32, i32
  }
  func.func @transform_2(%arg0: i32) -> (i32, i32) {
    %c0_i32 = arith.constant 0 : i32
    %c0_i32_0 = arith.constant 0 : i32
    %c0_i32_1 = arith.constant 0 : i32
    return %c0_i32, %c0_i32_0 : i32, i32
  }
  func.func @transform_3(%arg0: i32) -> (i32, i32) {
    %c0_i32 = arith.constant 0 : i32
    %c0_i32_0 = arith.constant 0 : i32
    %c0_i32_1 = arith.constant 0 : i32
    return %c0_i32, %c0_i32_0 : i32, i32
  }
  func.func @transform_4(%arg0: i32) -> (i32, i32) {
    %c0_i32 = arith.constant 0 : i32
    %c0_i32_0 = arith.constant 0 : i32
    %c0_i32_1 = arith.constant 0 : i32
    return %c0_i32, %c0_i32_0 : i32, i32
  }
  func.func @transform_5(%arg0: i32) -> (i32, i32) {
    %c0_i32 = arith.constant 0 : i32
    %c0_i32_0 = arith.constant 0 : i32
    return %arg0, %c0_i32 : i32, i32
  }
}

module attributes {stable_mosaic.version = 11 : i64} {
  func.func @_linear_res_act_kernel(%arg0: i32, %arg1: memref<256x32xf32, #tpu.memory_space<vmem>>, %arg2: memref<32x32xf32, #tpu.memory_space<vmem>>, %arg3: memref<1x32xf32, #tpu.memory_space<vmem>>, %arg4: memref<256x32xf32, #tpu.memory_space<vmem>>, %arg5: memref<256x32xf32, #tpu.memory_space<vmem>>) attributes {dimension_semantics = [#tpu.dimension_semantics<parallel>], iteration_bounds = array<i64: 2>, scalar_prefetch = 0 : i64, scratch_operands = 0 : i64, tpu.core_type = #tpu.core_type<tc>, window_params = [{transform_indices = @transform_0, window_bounds = array<i64: 256, 32>}, {pipeline_mode = #tpu.pipeline_mode<synchronous>, transform_indices = @transform_1, window_bounds = array<i64: 32, 32>}, {pipeline_mode = #tpu.pipeline_mode<synchronous>, transform_indices = @transform_2, window_bounds = array<i64: 1, 32>}, {transform_indices = @transform_3, window_bounds = array<i64: 256, 32>}, {transform_indices = @transform_4, window_bounds = array<i64: 256, 32>}]} {
    %c0 = arith.constant 0 : index
    %c0_0 = arith.constant 0 : index
    %0 = vector.load %arg1[%c0, %c0_0] : memref<256x32xf32, #tpu.memory_space<vmem>>, vector<256x32xf32>
    %c0_1 = arith.constant 0 : index
    %c0_2 = arith.constant 0 : index
    %1 = vector.load %arg2[%c0_1, %c0_2] : memref<32x32xf32, #tpu.memory_space<vmem>>, vector<32x32xf32>
    %cst = arith.constant dense<0.000000e+00> : vector<256x32xf32>
    %2 = tpu.matmul %0, %1, %cst {dimension_numbers = #tpu.dot_dimension_numbers<[1], [0], [0], [1], [0, 0, 1, 1], [], []>} : vector<256x32xf32>, vector<32x32xf32>, vector<256x32xf32> -> vector<256x32xf32>
    %c0_3 = arith.constant 0 : index
    %c0_4 = arith.constant 0 : index
    %3 = vector.load %arg3[%c0_3, %c0_4] : memref<1x32xf32, #tpu.memory_space<vmem>>, vector<1x32xf32>
    %4 = vector.broadcast %3 : vector<1x32xf32> to vector<256x32xf32>
    %5 = arith.addf %2, %4 : vector<256x32xf32>
    %c0_5 = arith.constant 0 : index
    %c0_6 = arith.constant 0 : index
    %6 = vector.load %arg4[%c0_5, %c0_6] : memref<256x32xf32, #tpu.memory_space<vmem>>, vector<256x32xf32>
    %7 = arith.addf %5, %6 : vector<256x32xf32>
    %8 = arith.mulf %7, %7 : vector<256x32xf32>
    %9 = arith.mulf %7, %8 : vector<256x32xf32>
    %cst_7 = arith.constant 4.471500e-02 : f32
    %10 = vector.broadcast %cst_7 : f32 to vector<256x32xf32>
    %11 = arith.mulf %10, %9 : vector<256x32xf32>
    %12 = arith.addf %7, %11 : vector<256x32xf32>
    %cst_8 = arith.constant 0.797884583 : f32
    %13 = vector.broadcast %cst_8 : f32 to vector<256x32xf32>
    %14 = arith.mulf %13, %12 : vector<256x32xf32>
    %15 = math.tanh %14 : vector<256x32xf32>
    %cst_9 = arith.constant 1.000000e+00 : f32
    %16 = vector.broadcast %cst_9 : f32 to vector<256x32xf32>
    %17 = arith.addf %16, %15 : vector<256x32xf32>
    %cst_10 = arith.constant 5.000000e-01 : f32
    %18 = vector.broadcast %cst_10 : f32 to vector<256x32xf32>
    %19 = arith.mulf %18, %17 : vector<256x32xf32>
    %20 = arith.mulf %7, %19 : vector<256x32xf32>
    %c0_11 = arith.constant 0 : index
    %c0_12 = arith.constant 0 : index
    %21 = vector.load %arg5[%c0_11, %c0_12] : memref<256x32xf32, #tpu.memory_space<vmem>>, vector<256x32xf32>
    tpu.vector_store %arg5[%c0_11, %c0_12], %20 {strides = array<i32>} : memref<256x32xf32, #tpu.memory_space<vmem>>, vector<256x32xf32>,
    return
  }
  func.func @transform_0(%arg0: i32) -> (i32, i32) {
    %c0_i32 = arith.constant 0 : i32
    %c0_i32_0 = arith.constant 0 : i32
    return %arg0, %c0_i32 : i32, i32
  }
  func.func @transform_1(%arg0: i32) -> (i32, i32) {
    %c0_i32 = arith.constant 0 : i32
    %c0_i32_0 = arith.constant 0 : i32
    %c0_i32_1 = arith.constant 0 : i32
    return %c0_i32, %c0_i32_0 : i32, i32
  }
  func.func @transform_2(%arg0: i32) -> (i32, i32) {
    %c0_i32 = arith.constant 0 : i32
    %c0_i32_0 = arith.constant 0 : i32
    %c0_i32_1 = arith.constant 0 : i32
    return %c0_i32, %c0_i32_0 : i32, i32
  }
  func.func @transform_3(%arg0: i32) -> (i32, i32) {
    %c0_i32 = arith.constant 0 : i32
    %c0_i32_0 = arith.constant 0 : i32
    return %arg0, %c0_i32 : i32, i32
  }
  func.func @transform_4(%arg0: i32) -> (i32, i32) {
    %c0_i32 = arith.constant 0 : i32
    %c0_i32_0 = arith.constant 0 : i32
    return %arg0, %c0_i32 : i32, i32
  }
}

</mosaic_0001>

<bundles_post_ra>
// kernel: fno_forward.6
= control target key start
LH: loop header
LB: loop body
LE: loop exit
PB: predicated region body
PF: predicated region fallthrough
CT: control target
= control target key end

     0   :  { %10 = vsyncpa [#allocation3], 0  ;;  %s2596_s0 = inlined_call_operand.vmem [shape: f32[512,3], index: 0, kind: input, shape index: {}]   ;;  %s2597_s1 = inlined_call_operand.hbm [shape: f32[3,32], index: 1, kind: input, shape index: {}]   ;;  %s2598_s2 = inlined_call_operand.hbm [shape: f32[1,32], index: 2, kind: input, shape index: {}]   ;;  %s2599_s3 = inlined_call_operand.hbm [shape: f32[32,32], index: 3, kind: input, shape index: {}]   ;;  %s2600_s4 = inlined_call_operand.hbm [shape: f32[1,32], index: 4, kind: input, shape index: {}]   ;;  %s2601_s5 = inlined_call_operand.vmem [shape: f32[512,32], index: 5, kind: output, shape index: {}]  }
   0x1   :  { %11 = vsyncpa [#allocation5], 0 }
   0x2   :  { %12 = vsyncpa [#allocation8], 0  ;;  %s1949_s18 = smov 0  }
   0x3 LB: > { %s1913_s19 = smov [#allocation4]   ;;  %s1397_s21 = sadd.s32 4294967295, %s1911_s18   ;;  %s1911_s18 = sphi %s1949_s18, %s18_s18  }
   0x4   : > { %s183_s20 = sshll.u32 %s1913_s19, 4  ;;  %p1399_p0 = scmp.ge.s32.totalorder %s1911_s18, 1  ;;  %s1963_s20 = int_to_ptr.vmem [resolvable:$true] %s183_s20 }
   0x5   : > { %p159_p1 = scmp.lt.s32.totalorder %s1911_s18, 3  ;;  %p1959_p2 = scmp.eq.s32.totalorder %s1397_s21, 0 }
   0x6   : > { %s1914_s24 = smov [#allocation2]   ;;  %s1915_s26 = smov [#allocation6]  }
   0x7   : > { %s2605_s22 = scalar_select %p1959_p2, 1, 0 }
   0x8   : > { %p1965_p3 = pnand %p1399_p0, %p159_p1  ;;  %s172_s25 = sshll.u32 %s1914_s24, 4  ;;  %s1971_s25 = int_to_ptr.vmem [resolvable:$true] %s172_s25 }
   0x9   : > { %s193_s27 = sshll.u32 %s1915_s26, 4  ;;  %s1916_s29 = smov [#allocation7]   ;;  %s1979_s27 = int_to_ptr.vmem [resolvable:$true] %s193_s27 }
   0xa   : > { %s2606_s23 = scalar_select %p1965_p3, 1, 0 }
   0xb   : > { %p1682_p4 = pneg %p1965_p3  ;;  %s1981_s30 = sshll.u32 %s1916_s29, 4  ;;  %s208_s30 = int_to_ptr.vmem [resolvable:$true] %s1981_s30 }
   0xc   : > { %s1781_s8 = scalar_lea.hbm %s2598_s2, 16 }
   0xd   : > { %p1975_p5 = pnand %p1959_p2, %p1682_p4  ;;  %p1782_p6 = scmp.ne.s32.totalorder %s2598_s2, %s1781_s8 }
   0xe   : > { %p1788_p10 = scmp.lt.u32.totalorder %s1781_s8, %s2598_s2 }
   0xf   : > { %p1991_p7 = pneg %p1975_p5 }
  0x11   : > { %p1784_p8 = pnand %p1991_p7, %p1782_p6 }
  0x13   : > { %p1785_p9 = pneg %p1784_p8 }
  0x15   : > { %p1790_p11 = pnand %p1788_p10, %p1785_p9 }
  0x17   : > { %1793 = shalt.err (!%p1790_p11)
}
  0x18   : > { %s1794_s14 = scalar_lea.vmem %s1963_s20, 16  ;;  %s1801_s15 = scalar_lea.vmem %s1963_s20, 32 }
  0x19   : > { %p1795_p12 = scmp.ne.s32.totalorder %s1963_s20, %s1794_s14  ;;  %p1802_p1 = scmp.lt.s32.totalorder %s1963_s20, %s1963_s20 }
  0x1a   : > { %p1803_p4 = scmp.lt.s32.totalorder %s1801_s15, %s1794_s14 }
  0x1b   : > { %p1797_p13 = pnand %p1795_p12, %p1991_p7 }
  0x1c   : > { %p1804_p6 = por %p1803_p4, %p1802_p1 }
  0x1d   : > { %p1798_p0 = pneg %p1797_p13 }
  0x1f   : > { %p1805_p8 = pnand %p1804_p6, %p1798_p0 }
  0x21   : > { %1808 = shalt.err (!%p1805_p8)
}
  0x22   : > { %1688 = dma.hbm_to_vmem [thread:$0]  (!%p1975_p5), %s2598_s2, 16, %s1963_s20, [#allocation5]  }
  0x23   : > { %s1809_s26 = scalar_lea.hbm %s2597_s1, 64 }
  0x24   : > { %p1810_p9 = scmp.ne.s32.totalorder %s2597_s1, %s1809_s26  ;;  %p1816_p12 = scmp.lt.u32.totalorder %s1809_s26, %s2597_s1 }
  0x26   : > { %p1812_p10 = pnand %p1810_p9, %p1991_p7 }
  0x28   : > { %p1813_p11 = pneg %p1812_p10 }
  0x2a   : > { %p1818_p13 = pnand %p1816_p12, %p1813_p11 }
  0x2c   : > { %1821 = shalt.err (!%p1818_p13)
}
  0x2d   : > { %s1822_s20 = scalar_lea.vmem %s1971_s25, 64  ;;  %p1830_p6 = scmp.lt.s32.totalorder %s1971_s25, %s1971_s25 }
  0x2e   : > { %p1823_p0 = scmp.ne.s32.totalorder %s1971_s25, %s1822_s20  ;;  %p1831_p8 = scmp.lt.s32.totalorder %s1822_s20, %s1822_s20 }
  0x30   : > { %p1825_p1 = pnand %p1823_p0, %p1991_p7  ;;  %p1832_p9 = por %p1831_p8, %p1830_p6 }
  0x32   : > { %p1826_p4 = pneg %p1825_p1 }
  0x34   : > { %p1833_p10 = pnand %p1832_p9, %p1826_p4 }
  0x36   : > { %1836 = shalt.err (!%p1833_p10)
}
  0x37   : > { %1685 = dma.hbm_to_vmem [thread:$0]  (!%p1975_p5), %s2597_s1, 64, %s1971_s25, [#allocation3]  }
  0x38   : > { %s1837_s14 = scalar_lea.hbm %s2599_s3, 512 }
  0x39   : > { %p1838_p11 = scmp.ne.s32.totalorder %s2599_s3, %s1837_s14  ;;  %p1844_p0 = scmp.lt.u32.totalorder %s1837_s14, %s2599_s3 }
  0x3b   : > { %p1840_p12 = pnand %p1838_p11, %p1991_p7 }
  0x3d   : > { %p1841_p13 = pneg %p1840_p12 }
  0x3f   : > { %p1846_p1 = pnand %p1844_p0, %p1841_p13 }
  0x41   : > { %1849 = shalt.err (!%p1846_p1)
}
  0x42   : > { %s1850_s25 = scalar_lea.vmem %s1979_s27, 512  ;;  %p1858_p9 = scmp.lt.s32.totalorder %s1979_s27, %s1979_s27 }
  0x43   : > { %p1851_p4 = scmp.ne.s32.totalorder %s1979_s27, %s1850_s25  ;;  %p1859_p10 = scmp.lt.s32.totalorder %s1850_s25, %s1850_s25 }
  0x45   : > { %p1853_p6 = pnand %p1851_p4, %p1991_p7  ;;  %p1860_p11 = por %p1859_p10, %p1858_p9 }
  0x47   : > { %p1854_p8 = pneg %p1853_p6 }
  0x49   : > { %p1861_p12 = pnand %p1860_p11, %p1854_p8 }
  0x4b   : > { %1864 = shalt.err (!%p1861_p12)
}
  0x4c   : > { %s1917_s24 = smov 128   ;;  %s1918_s26 = smov 8  }
  0x4d   : > { %1691 = dma.hbm_to_vmem [thread:$0]  (!%p1975_p5), %s2599_s3, 512, %s1979_s27, [#allocation5], %s1917_s24, %s1917_s24, %s1918_s26  }
  0x4e   : > { %s1865_s20 = scalar_lea.hbm %s2600_s4, 16 }
  0x4f   : > { %p1866_p13 = scmp.ne.s32.totalorder %s2600_s4, %s1865_s20  ;;  %p1872_p4 = scmp.lt.u32.totalorder %s1865_s20, %s2600_s4 }
  0x51   : > { %p1868_p0 = pnand %p1866_p13, %p1991_p7 }
  0x53   : > { %p1869_p1 = pneg %p1868_p0 }
  0x55   : > { %p1874_p6 = pnand %p1872_p4, %p1869_p1 }
  0x57   : > { %1877 = shalt.err (!%p1874_p6)
}
  0x58   : > { %s1878_s14 = scalar_lea.vmem %s208_s30, 16  ;;  %s1885_s27 = scalar_lea.vmem %s208_s30, 32 }
  0x59   : > { %p1879_p8 = scmp.ne.s32.totalorder %s208_s30, %s1878_s14  ;;  %p1886_p11 = scmp.lt.s32.totalorder %s208_s30, %s208_s30 }
  0x5a   : > { %p1887_p12 = scmp.lt.s32.totalorder %s1885_s27, %s1878_s14 }
  0x5b   : > { %p1881_p9 = pnand %p1879_p8, %p1991_p7 }
  0x5c   : > { %p1888_p2 = por %p1887_p12, %p1886_p11 }
  0x5d   : > { %p1882_p10 = pneg %p1881_p9 }
  0x5f   : > { %p1889_p3 = pnand %p1888_p2, %p1882_p10 }
  0x61   : > { %1892 = shalt.err (!%p1889_p3)
}
  0x62   : > { %1694 = dma.hbm_to_vmem [thread:$0]  (!%p1975_p5), %s2600_s4, 16, %s208_s30, [#allocation8]  }
  0x63   : > { %p2609_p13 = scmp.ne.s32.totalorder %s2606_s23, 0 }
  0x64   : > { %p2610_p0 = scmp.ne.s32.totalorder (!%p2609_p13), %s2605_s22, 0 }
  0x65   : > { %229 = sbr.rel (%p2609_p13) target bundleno = 655 (0x28f), region = 40 }
  0x6c   : > { %1898 = dma.done.wait (%p2610_p0), [#allocation3], 64  }
  0x6d   : > { %1900 = vsyncadd (%p2610_p0), [#allocation3], 4294967232 }
  0x6e   : > { %1902 = dma.done.wait (%p2610_p0), [#allocation5], 528  }
  0x6f   : > { %1904 = vsyncadd (%p2610_p0), [#allocation5], 4294966768 }
  0x70   : > { %1906 = dma.done.wait (%p2610_p0), [#allocation8], 16  }
  0x71   : > { %1908 = vsyncadd (%p2610_p0), [#allocation8], 4294967280  ;;  %s1410_s23 = sshll.u32 %s1397_s21, 5  ;;  %vm418_vm0 = vcmask 1042432   ;;  %vm321_vm1 = vcmask 23552   ;;  %v935_v33 = vld [vmem:[#allocation6] sm:$0xff] }
  0x72   : > { %p270_p2 = scmp.lt.s32.totalorder %s1410_s23, 63  ;;  %v313_v0 = vld [vmem:[#allocation2] sm:$0x7]  ;;  %v936_v34 = vld [vmem:[#allocation6 + $0x8] sm:$0xff]  ;;  %v937_v36 = vld [vmem:[#allocation6 + $0x10] sm:$0xff]  ;;  %vm946_vm2 = vcmask 261120  }
  0x73   : > { %1552 = vmatprep.subr.msk.mxu0 %vm418_vm0, %v313_v0  ;;  %v1658_v35 = vpack.c.bf16 %v936_v34, %v935_v33  ;;  %v938_v37 = vld [vmem:[#allocation6 + $0x18] sm:$0xff] }
  0x74   : > { %s2612_s23 = smov (!%p270_p2, %s1410_s23), 63  ;;  %1553 = vmatpush3.msk.msra.mxu0 %vm418_vm0, %v313_v0  ;;  %v1662_v38 = vpack.c.bf16 %v938_v37, %v937_v36  ;;  %v2168_v39 = vld [vmem:[#allocation4] ss:$0 sm:$0xff] }
  0x75   : > { %s1411_s28 = sshll.u32 %s2612_s23, 3  ;;  %1659 = vmatprep.subr.bf16.mxu1 %v1658_v35 }
  0x76   : > { %s2102_s17 = scalar_lea.vmem %s2596_s0, %s1411_s28  ;;  %1661 = vmatpush3.bf16.msra.mxu1 %v1658_v35  ;;  %s2495_s19 = scalar_lea.vmem %s2601_s5, %s1411_s28 }
  0x77   : > { %v281_v1 = vld [vmem:[%s2102_s17] sm:$0xff]  ;;  %v282_v2 = vld [vmem:[%s2102_s17 + $0x8] sm:$0xff]  ;;  %v283_v3 = vld [vmem:[%s2102_s17 + $0x10] sm:$0xff]  ;;  %1663 = vmatprep.subr.bf16.mxu1 %v1662_v38 }
  0x78   : > { %1554 = vmatprep.mubr.msk.f32.mxu0 %vm321_vm1, %v281_v1  ;;  %v284_v4 = vld [vmem:[%s2102_s17 + $0x18] sm:$0xff]  ;;  %v285_v5 = vld [vmem:[%s2102_s17 + $0x20] sm:$0xff]  ;;  %v286_v6 = vld [vmem:[%s2102_s17 + $0x28] sm:$0xff] }
  0x79   : > { %1555 = vmatmul.mubr.msk.f32.vlgmr.msra.gmra.mrb[0].mxu0 %vm321_vm1, %v282_v2  ;;  %v287_v7 = vld [vmem:[%s2102_s17 + $0x30] sm:$0xff]  ;;  %v288_v8 = vld [vmem:[%s2102_s17 + $0x38] sm:$0xff]  ;;  %v289_v9 = vld [vmem:[%s2102_s17 + $0x40] sm:$0xff] }
  0x7a   : > { %1557 = vmatprep.mubr.msk.f32.mxu0 %vm321_vm1, %v283_v3  ;;  %v290_v10 = vld [vmem:[%s2102_s17 + $0x48] sm:$0xff]  ;;  %v291_v11 = vld [vmem:[%s2102_s17 + $0x50] sm:$0xff]  ;;  %v292_v12 = vld [vmem:[%s2102_s17 + $0x58] sm:$0xff]  ;;  %1665 = vmatpush3.bf16.msra.mxu1 %v1662_v38 }
  0x7b   : > { %v293_v13 = vld [vmem:[%s2102_s17 + $0x60] sm:$0xff]  ;;  %v294_v14 = vld [vmem:[%s2102_s17 + $0x68] sm:$0xff]  ;;  %v295_v15 = vld [vmem:[%s2102_s17 + $0x70] sm:$0xff] }
  0x7c   : > { %v296_v16 = vld [vmem:[%s2102_s17 + $0x78] sm:$0xff]  ;;  %v297_v17 = vld [vmem:[%s2102_s17 + $0x80] sm:$0xff]  ;;  %v298_v18 = vld [vmem:[%s2102_s17 + $0x88] sm:$0xff] }
  0x7d   : > { %1558 = vmatmul.mubr.msk.f32.gmra.mrb[2].mxu0 %vm321_vm1, %v284_v4  ;;  %v299_v19 = vld [vmem:[%s2102_s17 + $0x90] sm:$0xff]  ;;  %v300_v20 = vld [vmem:[%s2102_s17 + $0x98] sm:$0xff]  ;;  %v301_v21 = vld [vmem:[%s2102_s17 + $0xa0] sm:$0xff] }
  0x7e   : > { %1560 = vmatprep.mubr.msk.f32.mxu0 %vm321_vm1, %v285_v5  ;;  %v302_v22 = vld [vmem:[%s2102_s17 + $0xa8] sm:$0xff]  ;;  %v303_v23 = vld [vmem:[%s2102_s17 + $0xb0] sm:$0xff]  ;;  %v304_v24 = vld [vmem:[%s2102_s17 + $0xb8] sm:$0xff] }
  0x7f   : > { %v305_v25 = vld [vmem:[%s2102_s17 + $0xc0] sm:$0xff]  ;;  %v306_v26 = vld [vmem:[%s2102_s17 + $0xc8] sm:$0xff]  ;;  %v307_v27 = vld [vmem:[%s2102_s17 + $0xd0] sm:$0xff] }
  0x80   : > { %v308_v28 = vld [vmem:[%s2102_s17 + $0xd8] sm:$0xff]  ;;  %v309_v29 = vld [vmem:[%s2102_s17 + $0xe0] sm:$0xff]  ;;  %v310_v30 = vld [vmem:[%s2102_s17 + $0xe8] sm:$0xff] }
  0x81   : > { %1561 = vmatmul.mubr.msk.f32.gmra.mrb[4].mxu0 %vm321_vm1, %v286_v6  ;;  %v311_v31 = vld [vmem:[%s2102_s17 + $0xf0] sm:$0xff]  ;;  %v312_v32 = vld [vmem:[%s2102_s17 + $0xf8] sm:$0xff] }
  0x82   : > { %1563 = vmatprep.mubr.msk.f32.mxu0 %vm321_vm1, %v287_v7 }
  0x85   : > { %1564 = vmatmul.mubr.msk.f32.gmra.mrb[6].mxu0 %vm321_vm1, %v288_v8 }
  0x86   : > { %1566 = vmatprep.mubr.msk.f32.mxu0 %vm321_vm1, %v289_v9 }
  0x89   : > { %1567 = vmatmul.mubr.msk.f32.gmra.mrb[8].mxu0 %vm321_vm1, %v290_v10 }
  0x8a   : > { %1569 = vmatprep.mubr.msk.f32.mxu0 %vm321_vm1, %v291_v11 }
  0x8d   : > { %1570 = vmatmul.mubr.msk.f32.gmra.mrb[10].mxu0 %vm321_vm1, %v292_v12 }
  0x8e   : > { %1572 = vmatprep.mubr.msk.f32.mxu0 %vm321_vm1, %v293_v13 }
  0x91   : > { %1573 = vmatmul.mubr.msk.f32.gmra.mrb[12].mxu0 %vm321_vm1, %v294_v14 }
  0x92   : > { %1575 = vmatprep.mubr.msk.f32.mxu0 %vm321_vm1, %v295_v15 }
  0x95   : > { %1576 = vmatmul.mubr.msk.f32.gmra.mrb[14].mxu0 %vm321_vm1, %v296_v16 }
  0x96   : > { %1578 = vmatprep.mubr.msk.f32.mxu0 %vm321_vm1, %v297_v17 }
  0x99   : > { %1579 = vmatmul.mubr.msk.f32.gmra.mrb[16].mxu0 %vm321_vm1, %v298_v18 }
  0x9a   : > { %1581 = vmatprep.mubr.msk.f32.mxu0 %vm321_vm1, %v299_v19 }
  0x9d   : > { %1582 = vmatmul.mubr.msk.f32.gmra.mrb[18].mxu0 %vm321_vm1, %v300_v20 }
  0x9e   : > { %1584 = vmatprep.mubr.msk.f32.mxu0 %vm321_vm1, %v301_v21 }
  0xa1   : > { %1585 = vmatmul.mubr.msk.f32.gmra.mrb[20].mxu0 %vm321_vm1, %v302_v22 }
  0xa2   : > { %1587 = vmatprep.mubr.msk.f32.mxu0 %vm321_vm1, %v303_v23 }
  0xa5   : > { %1588 = vmatmul.mubr.msk.f32.gmra.mrb[22].mxu0 %vm321_vm1, %v304_v24 }
  0xa6   : > { %1590 = vmatprep.mubr.msk.f32.mxu0 %vm321_vm1, %v305_v25 }
  0xa9   : > { %1591 = vmatmul.mubr.msk.f32.gmra.mrb[24].mxu0 %vm321_vm1, %v306_v26 }
  0xaa   : > { %1593 = vmatprep.mubr.msk.f32.mxu0 %vm321_vm1, %v307_v27 }
  0xad   : > { %1594 = vmatmul.mubr.msk.f32.gmra.mrb[26].mxu0 %vm321_vm1, %v308_v28 }
  0xae   : > { %1596 = vmatprep.mubr.msk.f32.mxu0 %vm321_vm1, %v309_v29 }
  0xb1   : > { %1597 = vmatmul.mubr.msk.f32.gmra.mrb[28].mxu0 %vm321_vm1, %v310_v30 }
  0xb2   : > { %1599 = vmatprep.mubr.msk.f32.mxu0 %vm321_vm1, %v311_v31 }
  0xb5   : > { %1600 = vmatmul.mubr.msk.f32.gmra.mrb[30].mxu0 %vm321_vm1, %v312_v32 }
 0x14c   : > { %v1556_v40 = vpop.f32.mrb[0].mxu0 }
 0x14d   : > { %v2171_v41 = vadd.f32 %v1556_v40, %v2168_v39  ;;  %v488_v42 = vpop.f32.mrb[1].mxu0 }
 0x14e   : > { %v2174_v43 = vadd.f32 %v2168_v39, %v488_v42 }
 0x14f   : > { %v648_v44 = vmul.f32 %v2171_v41, %v2171_v41 }
 0x150   : > { %v647_v45 = vmul.f32 %v2174_v43, %v2174_v43  ;;  %v1559_v46 = vpop.f32.mrb[2].mxu0 }
 0x151   : > { %v680_v47 = vmul.f32 %v648_v44, %v2171_v41  ;;  %v2182_v48 = vadd.f32 %v1559_v46, %v2168_v39  ;;  %v498_v49 = vpop.f32.mrb[3].mxu0 }
 0x152   : > { %v679_v50 = vmul.f32 %v647_v45, %v2174_v43  ;;  %v2186_v51 = vadd.f32 %v2168_v39, %v498_v49 }
 0x153   : > { %v712_v52 = vmul.f32 0.044715, %v680_v47  ;;  %v650_v53 = vmul.f32 %v2182_v48, %v2182_v48 }
 0x154   : > { %v711_v54 = vmul.f32 0.044715, %v679_v50  ;;  %v649_v55 = vmul.f32 %v2186_v51, %v2186_v51  ;;  %v1562_v56 = vpop.f32.mrb[4].mxu0 }
 0x155   : > { %v744_v57 = vadd.f32 %v712_v52, %v2171_v41  ;;  %v682_v58 = vmul.f32 %v650_v53, %v2182_v48  ;;  %v2195_v59 = vadd.f32 %v1562_v56, %v2168_v39  ;;  %v508_v60 = vpop.f32.mrb[5].mxu0 }
 0x156   : > { %v681_v61 = vmul.f32 %v649_v55, %v2186_v51  ;;  %v2199_v62 = vadd.f32 %v2168_v39, %v508_v60  ;;  %v743_v63 = vadd.f32 %v711_v54, %v2174_v43 }
 0x157   : > { %v776_v0 = vmul.f32 0.7978846, %v744_v57  ;;  %v714_v1 = vmul.f32 0.044715, %v682_v58  ;;  %v652_v2 = vmul.f32 %v2195_v59, %v2195_v59 }
 0x158   : > { %v713_v3 = vmul.f32 0.044715, %v681_v61  ;;  %v651_v4 = vmul.f32 %v2199_v62, %v2199_v62  ;;  %v1565_v5 = vpop.f32.mrb[6].mxu0  ;;  %v775_v6 = vmul.f32 0.7978846, %v743_v63 }
 0x159   : > { %1717 = vtanh.f32 %v776_v0  ;;  %v746_v7 = vadd.f32 %v714_v1, %v2182_v48  ;;  %v684_v8 = vmul.f32 %v652_v2, %v2195_v59  ;;  %v2209_v9 = vadd.f32 %v1565_v5, %v2168_v39  ;;  %v518_v10 = vpop.f32.mrb[7].mxu0 }
 0x15a   : > { %v745_v11 = vadd.f32 %v713_v3, %v2186_v51  ;;  %v683_v12 = vmul.f32 %v651_v4, %v2199_v62  ;;  %v2214_v13 = vadd.f32 %v2168_v39, %v518_v10  ;;  %1719 = vtanh.f32 %v775_v6 }
 0x15b   : > { %v716_v14 = vmul.f32 0.044715, %v684_v8  ;;  %v654_v15 = vmul.f32 %v2209_v9, %v2209_v9  ;;  %v778_v19 = vmul.f32 0.7978846, %v746_v7 }
 0x15c   : > { %v715_v16 = vmul.f32 0.044715, %v683_v12  ;;  %v653_v17 = vmul.f32 %v2214_v13, %v2214_v13  ;;  %v1568_v18 = vpop.f32.mrb[8].mxu0  ;;  %v777_v24 = vmul.f32 0.7978846, %v745_v11 }
 0x15d   : > { %v748_v20 = vadd.f32 %v716_v14, %v2195_v59  ;;  %v686_v21 = vmul.f32 %v654_v15, %v2209_v9  ;;  %v2223_v22 = vadd.f32 %v1568_v18, %v2168_v39  ;;  %v528_v23 = vpop.f32.mrb[9].mxu0  ;;  %1721 = vtanh.f32 %v778_v19 }
 0x15e   : > { %v747_v25 = vadd.f32 %v715_v16, %v2199_v62  ;;  %v685_v26 = vmul.f32 %v653_v17, %v2214_v13  ;;  %v2228_v27 = vadd.f32 %v2168_v39, %v528_v23  ;;  %1723 = vtanh.f32 %v777_v24 }
 0x15f   : > { %v780_v28 = vmul.f32 0.7978846, %v748_v20  ;;  %v718_v29 = vmul.f32 0.044715, %v686_v21  ;;  %v656_v30 = vmul.f32 %v2223_v22, %v2223_v22 }
 0x160   : > { %v779_v31 = vmul.f32 0.7978846, %v747_v25  ;;  %v717_v32 = vmul.f32 0.044715, %v685_v26  ;;  %v655_v33 = vmul.f32 %v2228_v27, %v2228_v27  ;;  %v1571_v34 = vpop.f32.mrb[10].mxu0 }
 0x161   : > { %v750_v35 = vadd.f32 %v718_v29, %v2209_v9  ;;  %v688_v36 = vmul.f32 %v656_v30, %v2223_v22  ;;  %v2237_v37 = vadd.f32 %v1571_v34, %v2168_v39  ;;  %v538_v38 = vpop.f32.mrb[11].mxu0  ;;  %1725 = vtanh.f32 %v780_v28 }
 0x162   : > { %v749_v40 = vadd.f32 %v717_v32, %v2214_v13  ;;  %v687_v42 = vmul.f32 %v655_v33, %v2228_v27  ;;  %v2242_v44 = vadd.f32 %v2168_v39, %v538_v38  ;;  %1727 = vtanh.f32 %v779_v31 }
 0x163   : > { %v1718_v45 = vpop.eup %1717  ;;  %v782_v46 = vmul.f32 0.7978846, %v750_v35  ;;  %v720_v47 = vmul.f32 0.044715, %v688_v36  ;;  %v658_v49 = vmul.f32 %v2237_v37, %v2237_v37 }
 0x164   : > { %v1720_v50 = vpop.eup %1719  ;;  %v781_v52 = vmul.f32 0.7978846, %v749_v40  ;;  %v719_v53 = vmul.f32 0.044715, %v687_v42  ;;  %v657_v54 = vmul.f32 %v2242_v44, %v2242_v44  ;;  %v1574_v55 = vpop.f32.mrb[12].mxu0  ;;  %v840_v61 = vadd.f32 1.0, %v1718_v45 }
 0x165   : > { %v752_v56 = vadd.f32 %v720_v47, %v2223_v22  ;;  %v690_v57 = vmul.f32 %v658_v49, %v2237_v37  ;;  %v2251_v58 = vadd.f32 %v1574_v55, %v2168_v39  ;;  %v548_v60 = vpop.f32.mrb[13].mxu0  ;;  %1729 = vtanh.f32 %v782_v46 }
 0x166   : > { %v751_v63 = vadd.f32 %v719_v53, %v2228_v27  ;;  %v689_v0 = vmul.f32 %v657_v54, %v2242_v44  ;;  %v2256_v1 = vadd.f32 %v2168_v39, %v548_v60  ;;  %v839_v5 = vadd.f32 1.0, %v1720_v50 }
 0x167   : > { %v784_v2 = vmul.f32 0.7978846, %v752_v56  ;;  %v722_v3 = vmul.f32 0.044715, %v690_v57  ;;  %v660_v4 = vmul.f32 %v2251_v58, %v2251_v58  ;;  %1731 = vtanh.f32 %v781_v52  ;;  %v1722_v20 = vpop.eup %1721 }
 0x168   : > { %v783_v6 = vmul.f32 0.7978846, %v751_v63  ;;  %v721_v7 = vmul.f32 0.044715, %v689_v0  ;;  %v659_v8 = vmul.f32 %v2256_v1, %v2256_v1  ;;  %v1577_v10 = vpop.f32.mrb[14].mxu0  ;;  %v872_v16 = vmul.f32 0.5, %v840_v61  ;;  %v1724_v26 = vpop.eup %1723 }
 0x169   : > { %v754_v11 = vadd.f32 %v722_v3, %v2237_v37  ;;  %v692_v12 = vmul.f32 %v660_v4, %v2251_v58  ;;  %v2265_v14 = vadd.f32 %v1577_v10, %v2168_v39  ;;  %v558_v15 = vpop.f32.mrb[15].mxu0  ;;  %1733 = vtanh.f32 %v784_v2 }
 0x16a   : > { %v753_v17 = vadd.f32 %v721_v7, %v2242_v44  ;;  %v691_v18 = vmul.f32 %v659_v8, %v2256_v1  ;;  %v2270_v19 = vadd.f32 %v2168_v39, %v558_v15  ;;  %v871_v25 = vmul.f32 0.5, %v839_v5 }
 0x16b   : > { %v786_v21 = vmul.f32 0.7978846, %v754_v11  ;;  %v724_v23 = vmul.f32 0.044715, %v692_v12  ;;  %v662_v24 = vmul.f32 %v2265_v14, %v2265_v14  ;;  %1735 = vtanh.f32 %v783_v6  ;;  %v1726_v32 = vpop.eup %1725 }
 0x16c   : > { %v785_v28 = vmul.f32 0.7978846, %v753_v17  ;;  %v723_v29 = vmul.f32 0.044715, %v691_v18  ;;  %v661_v30 = vmul.f32 %v2270_v19, %v2270_v19  ;;  %v1580_v31 = vpop.f32.mrb[16].mxu0  ;;  %v903_v35 = vmul.f32 %v871_v25, %v2174_v43  ;;  %v1728_v40 = vpop.eup %1727 }
 0x16d   : > { %v756_v33 = vadd.f32 %v724_v23, %v2251_v58  ;;  %v694_v34 = vmul.f32 %v662_v24, %v2265_v14  ;;  %v904_v36 = vmul.f32 %v872_v16, %v2171_v41  ;;  %v568_v38 = vpop.f32.mrb[17].mxu0  ;;  %1737 = vtanh.f32 %v786_v21 }
 0x16e   : > { %v755_v42 = vadd.f32 %v723_v29, %v2256_v1  ;;  %v693_v45 = vmul.f32 %v661_v30, %v2270_v19  ;;  %v2283_v46 = vadd.f32 %v1580_v31, %v2168_v39  ;;  %1610 = vmatprep.mubr.msk.f32.mxu1 %vm946_vm2, %v903_v35  ;;  %v2287_v50 = vadd.f32 %v2168_v39, %v568_v38 }
 0x16f   : > { %v788_v47 = vmul.f32 0.7978846, %v756_v33  ;;  %v726_v49 = vmul.f32 0.044715, %v694_v34  ;;  %v841_v43 = vadd.f32 1.0, %v1724_v26  ;;  %v2289_v52 = vpop.eup %1729  ;;  %1611 = vmatmul.mubr.msk.f32.vlgmr.msra.gmra.mrb[0].mxu1 %vm946_vm2, %v904_v36  ;;  %v842_v56 = vadd.f32 1.0, %v1722_v20 }
 0x170   : > { %v787_v41 = vmul.f32 0.7978846, %v755_v42  ;;  %v725_v53 = vmul.f32 0.044715, %v693_v45  ;;  %v664_v54 = vmul.f32 %v2283_v46, %v2283_v46  ;;  %v1583_v55 = vpop.f32.mrb[18].mxu0  ;;  %1739 = vtanh.f32 %v785_v28 }
 0x171   : > { %v758_v57 = vadd.f32 %v726_v49, %v2265_v14  ;;  %v663_v60 = vmul.f32 %v2287_v50, %v2287_v50  ;;  %v873_v61 = vmul.f32 0.5, %v841_v43  ;;  %v578_v63 = vpop.f32.mrb[19].mxu0  ;;  %v1732_v0 = vpop.eup %1731  ;;  %1741 = vtanh.f32 %v788_v47 }
 0x172   : > { %v757_v2 = vadd.f32 %v725_v53, %v2270_v19  ;;  %v696_v3 = vmul.f32 %v664_v54, %v2283_v46  ;;  %v2300_v4 = vadd.f32 %v1583_v55, %v2168_v39  ;;  %v874_v8 = vmul.f32 0.5, %v842_v56 }
 0x173   : > { %v790_v5 = vmul.f32 0.7978846, %v758_v57  ;;  %v695_v6 = vmul.f32 %v663_v60, %v2287_v50  ;;  %v905_v7 = vmul.f32 %v873_v61, %v2186_v51  ;;  %v2304_v10 = vpop.eup %1733  ;;  %1743 = vtanh.f32 %v787_v41 }
 0x174   : > { %v728_v11 = vmul.f32 0.044715, %v696_v3  ;;  %v666_v12 = vmul.f32 %v2300_v4, %v2300_v4  ;;  %v2309_v15 = vadd.f32 %v2168_v39, %v578_v63  ;;  %v1586_v16 = vpop.f32.mrb[20].mxu0  ;;  %v789_v17 = vmul.f32 0.7978846, %v757_v2 }
 0x175   : > { %v727_v18 = vmul.f32 0.044715, %v695_v6  ;;  %1613 = vmatprep.mubr.msk.f32.mxu1 %vm946_vm2, %v905_v7  ;;  %v906_v20 = vmul.f32 %v874_v8, %v2182_v48  ;;  %v843_v21 = vadd.f32 1.0, %v1728_v40  ;;  %v588_v51 = vpop.f32.mrb[21].mxu0  ;;  %v1736_v23 = vpop.eup %1735  ;;  %1745 = vtanh.f32 %v790_v5 }
 0x176   : > { %v760_v24 = vadd.f32 %v728_v11, %v2283_v46  ;;  %v698_v25 = vmul.f32 %v666_v12, %v2300_v4  ;;  %v665_v26 = vmul.f32 %v2309_v15, %v2309_v15  ;;  %v2320_v30 = vadd.f32 %v1586_v16, %v2168_v39 }
 0x177   : > { %v759_v28 = vadd.f32 %v727_v18, %v2287_v50  ;;  %1614 = vmatmul.mubr.msk.f32.gmra.mrb[2].mxu1 %vm946_vm2, %v906_v20  ;;  %v875_v29 = vmul.f32 0.5, %v843_v21  ;;  %v844_v48 = vadd.f32 1.0, %v1726_v32  ;;  %v2322_v31 = vpop.eup %1737  ;;  %v2326_v36 = vadd.f32 %v2168_v39, %v588_v51 }
 0x178   : > { %v792_v33 = vmul.f32 0.7978846, %v760_v24  ;;  %v730_v34 = vmul.f32 0.044715, %v698_v25  ;;  %v697_v35 = vmul.f32 %v665_v26, %v2309_v15  ;;  %v1589_v38 = vpop.f32.mrb[22].mxu0  ;;  %1747 = vtanh.f32 %v789_v17 }
 0x179   : > { %v907_v40 = vmul.f32 %v875_v29, %v2199_v62  ;;  %v668_v42 = vmul.f32 %v2320_v30, %v2320_v30  ;;  %v876_v45 = vmul.f32 0.5, %v844_v48  ;;  %v598_v47 = vpop.f32.mrb[23].mxu0  ;;  %v791_v49 = vmul.f32 0.7978846, %v759_v28 }
 0x17a   : > { %v762_v32 = vadd.f32 %v730_v34, %v2300_v4  ;;  %v729_v43 = vmul.f32 0.044715, %v697_v35  ;;  %v667_v41 = vmul.f32 %v2326_v36, %v2326_v36  ;;  %v1740_v53 = vpop.eup %1739  ;;  %1749 = vtanh.f32 %v792_v33 }
 0x17b   : > { %1616 = vmatprep.mubr.msk.f32.mxu1 %vm946_vm2, %v907_v40  ;;  %v700_v54 = vmul.f32 %v668_v42, %v2320_v30  ;;  %v908_v62 = vmul.f32 %v876_v45, %v2195_v59  ;;  %v845_v55 = vadd.f32 1.0, %v1732_v0  ;;  %v2337_v56 = vpop.eup %1741  ;;  %v2342_v63 = vadd.f32 %v1589_v38, %v2168_v39 }
 0x17c   : > { %v794_v57 = vmul.f32 0.7978846, %v762_v32  ;;  %v761_v60 = vadd.f32 %v729_v43, %v2309_v15  ;;  %v699_v61 = vmul.f32 %v667_v41, %v2326_v36  ;;  %v1592_v2 = vpop.f32.mrb[24].mxu0  ;;  %v846_v6 = vadd.f32 1.0, %v2289_v52 }
 0x17d   : > { %v732_v3 = vmul.f32 0.044715, %v700_v54  ;;  %1617 = vmatmul.mubr.msk.f32.gmra.mrb[4].mxu1 %vm946_vm2, %v908_v62  ;;  %v877_v5 = vmul.f32 0.5, %v845_v55  ;;  %v2347_v59 = vadd.f32 %v2168_v39, %v598_v47  ;;  %v608_v0 = vpop.f32.mrb[25].mxu0  ;;  %v2349_v7 = vpop.eup %1743  ;;  %1751 = vtanh.f32 %v791_v49 }
 0x17e   : > { %v793_v8 = vmul.f32 0.7978846, %v761_v60  ;;  %v731_v11 = vmul.f32 0.044715, %v699_v61  ;;  %v670_v12 = vmul.f32 %v2342_v63, %v2342_v63  ;;  %v878_v18 = vmul.f32 0.5, %v846_v6 }
 0x17f   : > { %v764_v16 = vadd.f32 %v732_v3, %v2320_v30  ;;  %v909_v17 = vmul.f32 %v877_v5, %v2214_v13  ;;  %v669_v52 = vmul.f32 %v2347_v59, %v2347_v59  ;;  %v2357_v20 = vpop.eup %1745  ;;  %1753 = vtanh.f32 %v794_v57 }
 0x180   : > { %v763_v21 = vadd.f32 %v731_v11, %v2326_v36  ;;  %v702_v51 = vmul.f32 %v670_v12, %v2342_v63  ;;  %v847_v24 = vadd.f32 1.0, %v1736_v23  ;;  %v1595_v25 = vpop.f32.mrb[26].mxu0  ;;  %v910_v28 = vmul.f32 %v878_v18, %v2209_v9 }
 0x181   : > { %v796_v26 = vmul.f32 0.7978846, %v764_v16  ;;  %1619 = vmatprep.mubr.msk.f32.mxu1 %vm946_vm2, %v909_v17  ;;  %v701_v13 = vmul.f32 %v669_v52, %v2347_v59  ;;  %v2365_v29 = vadd.f32 %v1592_v2, %v2168_v39  ;;  %v618_v48 = vpop.f32.mrb[27].mxu0  ;;  %1755 = vtanh.f32 %v793_v8 }
 0x182   : > { %v734_v33 = vmul.f32 0.044715, %v702_v51  ;;  %v879_v34 = vmul.f32 0.5, %v847_v24  ;;  %v848_v35 = vadd.f32 1.0, %v2304_v10  ;;  %v2368_v38 = vpop.eup %1747  ;;  %v795_v23 = vmul.f32 0.7978846, %v763_v21  ;;  %1620 = vmatmul.mubr.msk.f32.gmra.mrb[6].mxu1 %vm946_vm2, %v910_v28 }
 0x183   : > { %v733_v40 = vmul.f32 0.044715, %v701_v13  ;;  %v672_v9 = vmul.f32 %v2365_v29, %v2365_v29  ;;  %v2374_v42 = vadd.f32 %v2168_v39, %v608_v0  ;;  %1757 = vtanh.f32 %v796_v26 }
 0x184   : > { %v766_v45 = vadd.f32 %v734_v33, %v2342_v63  ;;  %v911_v47 = vmul.f32 %v879_v34, %v2228_v27  ;;  %v880_v49 = vmul.f32 0.5, %v848_v35  ;;  %v1598_v32 = vpop.f32.mrb[28].mxu0  ;;  %v2378_v10 = vpop.eup %1749  ;;  %v849_v62 = vadd.f32 1.0, %v1740_v53 }
 0x185   : > { %v765_v43 = vadd.f32 %v733_v40, %v2347_v59  ;;  %v704_v41 = vmul.f32 %v672_v9, %v2365_v29  ;;  %v671_v54 = vmul.f32 %v2374_v42, %v2374_v42  ;;  %v628_v55 = vpop.f32.mrb[29].mxu0  ;;  %v2387_v27 = vadd.f32 %v1595_v25, %v2168_v39 }
 0x186   : > { %v798_v57 = vmul.f32 0.7978846, %v766_v45  ;;  %1622 = vmatprep.mubr.msk.f32.mxu1 %vm946_vm2, %v911_v47  ;;  %v912_v60 = vmul.f32 %v880_v49, %v2223_v22  ;;  %v850_v61 = vadd.f32 1.0, %v2322_v31  ;;  %v881_v6 = vmul.f32 0.5, %v849_v62 }
 0x187   : > { %v797_v2 = vmul.f32 0.7978846, %v765_v43  ;;  %v736_v3 = vmul.f32 0.044715, %v704_v41  ;;  %v703_v5 = vmul.f32 %v671_v54, %v2374_v42  ;;  %v2391_v0 = vpop.eup %1751  ;;  %1759 = vtanh.f32 %v795_v23 }
 0x188   : > { %1623 = vmatmul.mubr.msk.f32.gmra.mrb[8].mxu1 %vm946_vm2, %v912_v60  ;;  %v674_v53 = vmul.f32 %v2387_v27, %v2387_v27  ;;  %v882_v8 = vmul.f32 0.5, %v850_v61  ;;  %v2397_v22 = vadd.f32 %v2168_v39, %v618_v48  ;;  %v1601_v11 = vpop.f32.mrb[30].mxu0  ;;  %1761 = vtanh.f32 %v798_v57 }
 0x189   : > { %v768_v31 = vadd.f32 %v736_v3, %v2365_v29  ;;  %v735_v12 = vmul.f32 0.044715, %v703_v5  ;;  %v913_v16 = vmul.f32 %v881_v6, %v2242_v44  ;;  %v638_v17 = vpop.f32.mrb[31].mxu0  ;;  %v2401_v18 = vpop.eup %1753  ;;  %v851_v24 = vadd.f32 1.0, %v2349_v7 }
 0x18a   : > { %v706_v52 = vmul.f32 %v674_v53, %v2387_v27  ;;  %v914_v21 = vmul.f32 %v882_v8, %v2237_v37  ;;  %v673_v51 = vmul.f32 %v2397_v22, %v2397_v22  ;;  %1763 = vtanh.f32 %v797_v2 }
 0x18b   : > { %v767_v25 = vadd.f32 %v735_v12, %v2374_v42  ;;  %1625 = vmatprep.mubr.msk.f32.mxu1 %vm946_vm2, %v913_v16  ;;  %v2411_v26 = vadd.f32 %v1598_v32, %v2168_v39  ;;  %v852_v44 = vadd.f32 1.0, %v2337_v56  ;;  %v1756_v28 = vpop.eup %1755  ;;  %v883_v48 = vmul.f32 0.5, %v851_v24 }
 0x18c   : > { %v738_v13 = vmul.f32 0.044715, %v706_v52  ;;  %1626 = vmatmul.mubr.msk.f32.gmra.mrb[10].mxu1 %vm946_vm2, %v914_v21  ;;  %v705_v37 = vmul.f32 %v673_v51, %v2397_v22  ;;  %v2417_v33 = vadd.f32 %v2168_v39, %v628_v55  ;;  %v800_v7 = vmul.f32 0.7978846, %v768_v31 }
 0x18d   : > { %v799_v34 = vmul.f32 0.7978846, %v767_v25  ;;  %v676_v35 = vmul.f32 %v2411_v26, %v2411_v26  ;;  %v884_v23 = vmul.f32 0.5, %v852_v44  ;;  %v1758_v40 = vpop.eup %1757  ;;  %v915_v45 = vmul.f32 %v883_v48, %v2256_v1 }
 0x18e   : > { %v770_v9 = vadd.f32 %v738_v13, %v2387_v27  ;;  %v737_v56 = vmul.f32 0.044715, %v705_v37  ;;  %v675_v47 = vmul.f32 %v2417_v33, %v2417_v33  ;;  %v853_v43 = vadd.f32 1.0, %v2368_v38 }
 0x18f   : > { %1765 = vtanh.f32 %v799_v34  ;;  %v708_v49 = vmul.f32 %v676_v35, %v2411_v26  ;;  %v916_v32 = vmul.f32 %v884_v23, %v2251_v58  ;;  %1628 = vmatprep.mubr.msk.f32.mxu1 %vm946_vm2, %v915_v45  ;;  %v2432_v55 = vadd.f32 %v1601_v11, %v2168_v39 }
 0x190   : > { %v802_v41 = vmul.f32 0.7978846, %v770_v9  ;;  %v769_v54 = vadd.f32 %v737_v56, %v2397_v22  ;;  %v707_v62 = vmul.f32 %v675_v47, %v2417_v33  ;;  %v885_v57 = vmul.f32 0.5, %v853_v43 }
 0x191   : > { %v740_v1 = vmul.f32 0.044715, %v708_v49  ;;  %1629 = vmatmul.mubr.msk.f32.gmra.mrb[12].mxu1 %vm946_vm2, %v916_v32  ;;  %v854_v60 = vadd.f32 1.0, %v2357_v20  ;;  %v2437_v58 = vadd.f32 %v2168_v39, %v638_v17  ;;  %v1760_v38 = vpop.eup %1759  ;;  %1767 = vtanh.f32 %v800_v7 }
 0x192   : > { %v801_v61 = vmul.f32 0.7978846, %v769_v54  ;;  %v739_v2 = vmul.f32 0.044715, %v707_v62  ;;  %v678_v3 = vmul.f32 %v2432_v55, %v2432_v55  ;;  %v1762_v5 = vpop.eup %1761  ;;  %v917_v53 = vmul.f32 %v885_v57, %v2270_v19 }
 0x193   : > { %v772_v6 = vadd.f32 %v740_v1, %v2411_v26  ;;  %v886_v8 = vmul.f32 0.5, %v854_v60  ;;  %v677_v11 = vmul.f32 %v2437_v58, %v2437_v58  ;;  %v855_v31 = vadd.f32 1.0, %v2391_v0 }
 0x194   : > { %1769 = vtanh.f32 %v801_v61  ;;  %v771_v39 = vadd.f32 %v739_v2, %v2417_v33  ;;  %v710_v20 = vmul.f32 %v678_v3, %v2432_v55  ;;  %v1764_v12 = vpop.eup %1763  ;;  %1631 = vmatprep.mubr.msk.f32.mxu1 %vm946_vm2, %v917_v53  ;;  %v856_v19 = vadd.f32 1.0, %v2378_v10 }
 0x195   : > { %1771 = vtanh.f32 %v802_v41  ;;  %v918_v16 = vmul.f32 %v886_v8, %v2265_v14  ;;  %v709_v17 = vmul.f32 %v677_v11, %v2437_v58  ;;  %v887_v51 = vmul.f32 0.5, %v855_v31 }
 0x196   : > { %v803_v52 = vmul.f32 0.7978846, %v771_v39  ;;  %v742_v21 = vmul.f32 0.044715, %v710_v20  ;;  %v857_v24 = vadd.f32 1.0, %v1756_v28  ;;  %v888_v13 = vmul.f32 0.5, %v856_v19 }
 0x197   : > { %v804_v25 = vmul.f32 0.7978846, %v772_v6  ;;  %1632 = vmatmul.mubr.msk.f32.gmra.mrb[14].mxu1 %vm946_vm2, %v918_v16  ;;  %v741_v44 = vmul.f32 0.044715, %v709_v17  ;;  %v858_v0 = vadd.f32 1.0, %v2401_v18  ;;  %v919_v14 = vmul.f32 %v887_v51, %v2287_v50 }
 0x198   : > { %1773 = vtanh.f32 %v803_v52  ;;  %v774_v37 = vadd.f32 %v742_v21, %v2432_v55  ;;  %v889_v48 = vmul.f32 0.5, %v857_v24  ;;  %v920_v34 = vmul.f32 %v888_v13, %v2283_v46 }
 0x199   : > { %v1766_v7 = vpop.eup %1765  ;;  %v773_v10 = vadd.f32 %v741_v44, %v2437_v58  ;;  %v890_v35 = vmul.f32 0.5, %v858_v0  ;;  %v859_v28 = vadd.f32 1.0, %v1760_v38  ;;  %1634 = vmatprep.mubr.msk.f32.mxu1 %vm946_vm2, %v919_v14  ;;  %v860_v9 = vadd.f32 1.0, %v1758_v40 }
 0x19a   : > { %v921_v23 = vmul.f32 %v889_v48, %v2309_v15  ;;  %v861_v56 = vadd.f32 1.0, %v1764_v12  ;;  %1775 = vtanh.f32 %v804_v25  ;;  %v806_v47 = vmul.f32 0.7978846, %v774_v37 }
 0x19b   : > { %v805_v18 = vmul.f32 0.7978846, %v773_v10  ;;  %1635 = vmatmul.mubr.msk.f32.gmra.mrb[16].mxu1 %vm946_vm2, %v920_v34  ;;  %v891_v45 = vmul.f32 0.5, %v859_v28  ;;  %v1768_v50 = vpop.eup %1767  ;;  %v922_v49 = vmul.f32 %v890_v35, %v2300_v4  ;;  %v863_v32 = vadd.f32 1.0, %v1766_v7 }
 0x19c   : > { %1637 = vmatprep.mubr.msk.f32.mxu1 %vm946_vm2, %v921_v23  ;;  %v893_v46 = vmul.f32 0.5, %v861_v56  ;;  %v892_v41 = vmul.f32 0.5, %v860_v9  ;;  %v862_v15 = vadd.f32 1.0, %v1762_v5  ;;  %v864_v38 = vadd.f32 1.0, %v1768_v50 }
 0x19d   : > { %1777 = vtanh.f32 %v805_v18  ;;  %v923_v43 = vmul.f32 %v891_v45, %v2326_v36  ;;  %v895_v1 = vmul.f32 0.5, %v863_v32 }
 0x19e   : > { %v1770_v40 = vpop.eup %1769  ;;  %1779 = vtanh.f32 %v806_v47  ;;  %v925_v62 = vmul.f32 %v893_v46, %v2347_v59  ;;  %v924_v4 = vmul.f32 %v892_v41, %v2320_v30  ;;  %v894_v60 = vmul.f32 0.5, %v862_v15 }
 0x19f   : > { %v1772_v54 = vpop.eup %1771  ;;  %1638 = vmatmul.mubr.msk.f32.gmra.mrb[18].mxu1 %vm946_vm2, %v922_v49  ;;  %v865_v57 = vadd.f32 1.0, %v1770_v40  ;;  %v927_v36 = vmul.f32 %v895_v1, %v2374_v42  ;;  %v896_v53 = vmul.f32 0.5, %v864_v38 }
 0x1a0   : > { %1640 = vmatprep.mubr.msk.f32.mxu1 %vm946_vm2, %v923_v43  ;;  %v926_v6 = vmul.f32 %v894_v60, %v2342_v63  ;;  %v866_v59 = vadd.f32 1.0, %v1772_v54 }
 0x1a1   : > { %v897_v2 = vmul.f32 0.5, %v865_v57  ;;  %v928_v20 = vmul.f32 %v896_v53, %v2365_v29 }
 0x1a2   : > { %v1774_v61 = vpop.eup %1773  ;;  %v898_v31 = vmul.f32 0.5, %v866_v59 }
 0x1a3   : > { %1641 = vmatmul.mubr.msk.f32.gmra.mrb[20].mxu1 %vm946_vm2, %v924_v4  ;;  %v867_v3 = vadd.f32 1.0, %v1774_v61  ;;  %v929_v30 = vmul.f32 %v897_v2, %v2397_v22 }
 0x1a4   : > { %1643 = vmatprep.mubr.msk.f32.mxu1 %vm946_vm2, %v925_v62  ;;  %v1776_v5 = vpop.eup %1775  ;;  %v930_v17 = vmul.f32 %v898_v31, %v2387_v27  ;;  %v2488_v27 = vld [vmem:[#allocation7] ss:$0 sm:$0xff] }
 0x1a5   : > { %v899_v11 = vmul.f32 0.5, %v867_v3  ;;  %v868_v42 = vadd.f32 1.0, %v1776_v5 }
 0x1a7   : > { %v1778_v8 = vpop.eup %1777  ;;  %1644 = vmatmul.mubr.msk.f32.gmra.mrb[22].mxu1 %vm946_vm2, %v926_v6  ;;  %v931_v63 = vmul.f32 %v899_v11, %v2417_v33  ;;  %v900_v19 = vmul.f32 0.5, %v868_v42 }
 0x1a8   : > { %1646 = vmatprep.mubr.msk.f32.mxu1 %vm946_vm2, %v927_v36  ;;  %v869_v39 = vadd.f32 1.0, %v1778_v8  ;;  %v1780_v12 = vpop.eup %1779 }
 0x1a9   : > { %v870_v52 = vadd.f32 1.0, %v1780_v12  ;;  %v932_v22 = vmul.f32 %v900_v19, %v2411_v26 }
 0x1aa   : > { %v901_v16 = vmul.f32 0.5, %v869_v39 }
 0x1ab   : > { %1647 = vmatmul.mubr.msk.f32.gmra.mrb[24].mxu1 %vm946_vm2, %v928_v20  ;;  %v902_v21 = vmul.f32 0.5, %v870_v52 }
 0x1ac   : > { %1649 = vmatprep.mubr.msk.f32.mxu1 %vm946_vm2, %v929_v30  ;;  %v933_v29 = vmul.f32 %v901_v16, %v2437_v58 }
 0x1ad   : > { %v934_v33 = vmul.f32 %v902_v21, %v2432_v55 }
 0x1af   : > { %1650 = vmatmul.mubr.msk.f32.gmra.mrb[26].mxu1 %vm946_vm2, %v930_v17 }
 0x1b0   : > { %1652 = vmatprep.mubr.msk.f32.mxu1 %vm946_vm2, %v931_v63 }
 0x1b3   : > { %1653 = vmatmul.mubr.msk.f32.gmra.mrb[28].mxu1 %vm946_vm2, %v932_v22 }
 0x1b4   : > { %1655 = vmatprep.mubr.msk.f32.mxu1 %vm946_vm2, %v933_v29 }
 0x1b7   : > { %1656 = vmatmul.mubr.msk.f32.gmra.mrb[30].mxu1 %vm946_vm2, %v934_v33 }
 0x242   : > { %v1612_v26 = vpop.f32.mrb[0].mxu1 }
 0x243   : > { %v1115_v58 = vadd.f32 %v1612_v26, %v2488_v27  ;;  %v1109_v55 = vpop.f32.mrb[1].mxu1 }
 0x244   : > { %v1110_v51 = vadd.f32 %v2488_v27, %v1109_v55 }
 0x245   : > { %1269 = vst.msk [vmem:[%s2495_s19 + $0x8] sm:$0xff] %vm946_vm2, %v1115_v58 }
 0x246   : > { %1268 = vst.msk [vmem:[%s2495_s19] sm:$0xff] %vm946_vm2, %v1110_v51 }
 0x24a   : > { %v1615_v24 = vpop.f32.mrb[2].mxu1 }
 0x24b   : > { %v1125_v25 = vadd.f32 %v1615_v24, %v2488_v27  ;;  %v1119_v44 = vpop.f32.mrb[3].mxu1 }
 0x24c   : > { %v1120_v13 = vadd.f32 %v2488_v27, %v1119_v44 }
 0x24d   : > { %1271 = vst.msk [vmem:[%s2495_s19 + $0x18] sm:$0xff] %vm946_vm2, %v1125_v25 }
 0x24e   : > { %1270 = vst.msk [vmem:[%s2495_s19 + $0x10] sm:$0xff] %vm946_vm2, %v1120_v13 }
 0x250   : > { %v1618_v0 = vpop.f32.mrb[4].mxu1 }
 0x251   : > { %v1135_v37 = vadd.f32 %v1618_v0, %v2488_v27  ;;  %v1129_v14 = vpop.f32.mrb[5].mxu1 }
 0x252   : > { %v1130_v48 = vadd.f32 %v2488_v27, %v1129_v14 }
 0x253   : > { %1273 = vst.msk [vmem:[%s2495_s19 + $0x28] sm:$0xff] %vm946_vm2, %v1135_v37 }
 0x254   : > { %1272 = vst.msk [vmem:[%s2495_s19 + $0x20] sm:$0xff] %vm946_vm2, %v1130_v48 }
 0x255   : > { %v1621_v7 = vpop.f32.mrb[6].mxu1 }
 0x256   : > { %v1145_v10 = vadd.f32 %v1621_v7, %v2488_v27  ;;  %v1139_v34 = vpop.f32.mrb[7].mxu1 }
 0x257   : > { %v1140_v35 = vadd.f32 %v2488_v27, %v1139_v34 }
 0x258   : > { %1275 = vst.msk [vmem:[%s2495_s19 + $0x38] sm:$0xff] %vm946_vm2, %v1145_v10 }
 0x259   : > { %1274 = vst.msk [vmem:[%s2495_s19 + $0x30] sm:$0xff] %vm946_vm2, %v1140_v35 }
 0x25b   : > { %v1624_v28 = vpop.f32.mrb[8].mxu1 }
 0x25c   : > { %v1155_v23 = vadd.f32 %v1624_v28, %v2488_v27  ;;  %v1149_v9 = vpop.f32.mrb[9].mxu1 }
 0x25d   : > { %v1150_v56 = vadd.f32 %v2488_v27, %v1149_v9 }
 0x25e   : > { %1277 = vst.msk [vmem:[%s2495_s19 + $0x48] sm:$0xff] %vm946_vm2, %v1155_v23 }
 0x25f   : > { %1276 = vst.msk [vmem:[%s2495_s19 + $0x40] sm:$0xff] %vm946_vm2, %v1150_v56  ;;  %v1627_v18 = vpop.f32.mrb[10].mxu1 }
 0x260   : > { %v1165_v45 = vadd.f32 %v1627_v18, %v2488_v27  ;;  %v1159_v50 = vpop.f32.mrb[11].mxu1 }
 0x261   : > { %v1160_v47 = vadd.f32 %v2488_v27, %v1159_v50 }
 0x262   : > { %1279 = vst.msk [vmem:[%s2495_s19 + $0x58] sm:$0xff] %vm946_vm2, %v1165_v45 }
 0x263   : > { %1278 = vst.msk [vmem:[%s2495_s19 + $0x50] sm:$0xff] %vm946_vm2, %v1160_v47 }
 0x264   : > { %v1630_v49 = vpop.f32.mrb[12].mxu1 }
 0x265   : > { %v1175_v46 = vadd.f32 %v1630_v49, %v2488_v27  ;;  %v1169_v32 = vpop.f32.mrb[13].mxu1 }
 0x266   : > { %v1170_v43 = vadd.f32 %v2488_v27, %v1169_v32 }
 0x267   : > { %1281 = vst.msk [vmem:[%s2495_s19 + $0x68] sm:$0xff] %vm946_vm2, %v1175_v46 }
 0x268   : > { %1280 = vst.msk [vmem:[%s2495_s19 + $0x60] sm:$0xff] %vm946_vm2, %v1170_v43 }
 0x26a   : > { %v1633_v41 = vpop.f32.mrb[14].mxu1 }
 0x26b   : > { %v1185_v15 = vadd.f32 %v1633_v41, %v2488_v27  ;;  %v1179_v40 = vpop.f32.mrb[15].mxu1 }
 0x26c   : > { %v1180_v54 = vadd.f32 %v2488_v27, %v1179_v40 }
 0x26d   : > { %1283 = vst.msk [vmem:[%s2495_s19 + $0x78] sm:$0xff] %vm946_vm2, %v1185_v15 }
 0x26e   : > { %1282 = vst.msk [vmem:[%s2495_s19 + $0x70] sm:$0xff] %vm946_vm2, %v1180_v54  ;;  %v1636_v62 = vpop.f32.mrb[16].mxu1 }
 0x26f   : > { %v1195_v1 = vadd.f32 %v1636_v62, %v2488_v27  ;;  %v1189_v57 = vpop.f32.mrb[17].mxu1 }
 0x270   : > { %v1190_v4 = vadd.f32 %v2488_v27, %v1189_v57 }
 0x271   : > { %1285 = vst.msk [vmem:[%s2495_s19 + $0x88] sm:$0xff] %vm946_vm2, %v1195_v1 }
 0x272   : > { %1284 = vst.msk [vmem:[%s2495_s19 + $0x80] sm:$0xff] %vm946_vm2, %v1190_v4  ;;  %v1639_v60 = vpop.f32.mrb[18].mxu1 }
 0x273   : > { %v1205_v38 = vadd.f32 %v1639_v60, %v2488_v27  ;;  %v1199_v61 = vpop.f32.mrb[19].mxu1 }
 0x274   : > { %v1200_v36 = vadd.f32 %v2488_v27, %v1199_v61 }
 0x275   : > { %1287 = vst.msk [vmem:[%s2495_s19 + $0x98] sm:$0xff] %vm946_vm2, %v1205_v38 }
 0x276   : > { %1286 = vst.msk [vmem:[%s2495_s19 + $0x90] sm:$0xff] %vm946_vm2, %v1200_v36  ;;  %v1642_v2 = vpop.f32.mrb[20].mxu1 }
 0x277   : > { %v1215_v3 = vadd.f32 %v1642_v2, %v2488_v27  ;;  %v1209_v5 = vpop.f32.mrb[21].mxu1 }
 0x278   : > { %v1210_v6 = vadd.f32 %v2488_v27, %v1209_v5 }
 0x279   : > { %1289 = vst.msk [vmem:[%s2495_s19 + $0xa8] sm:$0xff] %vm946_vm2, %v1215_v3 }
 0x27a   : > { %1288 = vst.msk [vmem:[%s2495_s19 + $0xa0] sm:$0xff] %vm946_vm2, %v1210_v6  ;;  %v1645_v53 = vpop.f32.mrb[22].mxu1 }
 0x27b   : > { %v1225_v59 = vadd.f32 %v1645_v53, %v2488_v27  ;;  %v1219_v8 = vpop.f32.mrb[23].mxu1 }
 0x27c   : > { %v1220_v30 = vadd.f32 %v2488_v27, %v1219_v8 }
 0x27d   : > { %1291 = vst.msk [vmem:[%s2495_s19 + $0xb8] sm:$0xff] %vm946_vm2, %v1225_v59 }
 0x27e   : > { %1290 = vst.msk [vmem:[%s2495_s19 + $0xb0] sm:$0xff] %vm946_vm2, %v1220_v30  ;;  %v1648_v11 = vpop.f32.mrb[24].mxu1 }
 0x27f   : > { %v1235_v39 = vadd.f32 %v1648_v11, %v2488_v27  ;;  %v1229_v20 = vpop.f32.mrb[25].mxu1 }
 0x280   : > { %v1230_v31 = vadd.f32 %v2488_v27, %v1229_v20 }
 0x281   : > { %1293 = vst.msk [vmem:[%s2495_s19 + $0xc8] sm:$0xff] %vm946_vm2, %v1235_v39 }
 0x282   : > { %1292 = vst.msk [vmem:[%s2495_s19 + $0xc0] sm:$0xff] %vm946_vm2, %v1230_v31  ;;  %v1651_v42 = vpop.f32.mrb[26].mxu1 }
 0x283   : > { %v1245_v12 = vadd.f32 %v1651_v42, %v2488_v27  ;;  %v1239_v63 = vpop.f32.mrb[27].mxu1 }
 0x284   : > { %v1240_v16 = vadd.f32 %v2488_v27, %v1239_v63 }
 0x285   : > { %1295 = vst.msk [vmem:[%s2495_s19 + $0xd8] sm:$0xff] %vm946_vm2, %v1245_v12 }
 0x286   : > { %1294 = vst.msk [vmem:[%s2495_s19 + $0xd0] sm:$0xff] %vm946_vm2, %v1240_v16  ;;  %v1654_v17 = vpop.f32.mrb[28].mxu1 }
 0x287   : > { %v1255_v19 = vadd.f32 %v1654_v17, %v2488_v27  ;;  %v1249_v52 = vpop.f32.mrb[29].mxu1 }
 0x288   : > { %v1250_v29 = vadd.f32 %v2488_v27, %v1249_v52 }
 0x289   : > { %1297 = vst.msk [vmem:[%s2495_s19 + $0xe8] sm:$0xff] %vm946_vm2, %v1255_v19 }
 0x28a   : > { %1296 = vst.msk [vmem:[%s2495_s19 + $0xe0] sm:$0xff] %vm946_vm2, %v1250_v29  ;;  %v1657_v22 = vpop.f32.mrb[30].mxu1 }
 0x28b   : > { %v1265_v21 = vadd.f32 %v1657_v22, %v2488_v27  ;;  %v1259_v33 = vpop.f32.mrb[31].mxu1 }
 0x28c   : > { %v1260_v26 = vadd.f32 %v2488_v27, %v1259_v33 }
 0x28d   : > { %1299 = vst.msk [vmem:[%s2495_s19 + $0xf8] sm:$0xff] %vm946_vm2, %v1265_v21 }
 0x28e   : > { %1298 = vst.msk [vmem:[%s2495_s19 + $0xf0] sm:$0xff] %vm946_vm2, %v1260_v26 }
 0x28f PF: > { %s18_s18 = sadd.s32 1, %s1911_s18  }
 0x290   : > { %p15_p3 = scmp.ge.s32.totalorder %s18_s18, 4  }
 0x292   :  { %17 = sbr.rel (!%p15_p3) target bundleno = 3 (0x3), region = 87 }
 0x299   :  { %1322 = vsyncpa [#allocation3], 1 }
 0x29a   :  { %1324 = vsyncpa [#allocation3 + $0x1], 1 }
 0x29b   :  { %1325 = vsyncpa [#allocation5], 1 }
 0x29c   :  { %1326 = vsyncpa [#allocation8], 1 }

// kernel: fno_forward.7
= control target key start
LH: loop header
LB: loop body
LE: loop exit
PB: predicated region body
PF: predicated region fallthrough
CT: control target
= control target key end

     0   :  { %s2106_s9 = smov 0   ;;  %s2457_s0 = inlined_call_operand.vmem [shape: f32[80,4,32], index: 0, kind: input, shape index: {}]   ;;  %s2458_s1 = inlined_call_operand.vmem [shape: f32[80,32,64], index: 1, kind: input, shape index: {}]   ;;  %s2459_s2 = inlined_call_operand.vmem [shape: f32[80,2,64], index: 2, kind: output, shape index: {}]  }
   0x1 LB: > { %s1682_s10 = sadd.s32 4294967295, %s2084_s9   ;;  %p1686_p0 = scmp.ge.s32.totalorder %s2084_s9, 1  ;;  %s2084_s9 = sphi %s2106_s9, %s12_s9  }
   0x2   : > { %p125_p1 = scmp.lt.s32.totalorder %s2084_s9, 6 }
   0x4   : > { %p126_p2 = pnand %p1686_p0, %p125_p1 }
   0x5   : > { %s1687_s11 = sshll.u32 (!%p126_p2), %s1682_s10, 4  ;;  %v2086_v0 = vmov (!%p126_p2), 0.0|0.0   ;;  %vm2087_vm0 = vmmov (!%p126_p2), 0   ;;  %v2088_v1 = vmov (!%p126_p2), 0.0   ;;  %vm252_vm1 = vcmask (!%p126_p2), 261120   ;;  %s2089_s20 = smov (!%p126_p2), 96  }
   0x6   : > { %129 = sbr.rel (%p126_p2) target bundleno = 423 (0x1a7), region = 28  ;;  %1969 = vmatprep.subr.bf16.mxu0 (!%p126_p2), %v2086_v0  ;;  %1975 = vmatprep.subr.bf16.mxu1 (!%p126_p2), %v2086_v0  ;;  %p154_p3 = scmp.lt.s32.totalorder (!%p126_p2), %s1687_s11, 79  ;;  %vm1597_vm2 = vcmask (!%p126_p2), 517120  }
   0x7   : > { %1801 = vmatprep.mubr.msk.f32.mxu0 (!%p126_p2), %vm2087_vm0, %v2088_v1  ;;  %1812 = vmatprep.mubr.msk.f32.mxu1 (!%p126_p2), %vm2087_vm0, %v2088_v1  ;;  %s2090_s21 = smov (!%p126_p2), 32  }
   0xd   : > { %s2461_s11 = smov (!%p154_p3, %s1687_s11), 79 }
   0xe   : > { %s1712_s12 = sshll.u32 %s2461_s11, 5  ;;  %s1688_s16 = sshll.u32 %s2461_s11, 2 }
   0xf   : > { %s2126_s15 = scalar_lea.vmem %s2458_s1, %s1712_s12  ;;  %s2141_s19 = scalar_lea.vmem %s2457_s0, %s1688_s16 }
  0x10   : > { %v188_v2 = vld [vmem:[%s2126_s15] sm:$0xff]  ;;  %v189_v3 = vld [vmem:[%s2126_s15 + $0x8] sm:$0xff]  ;;  %v190_v7 = vld [vmem:[%s2126_s15 + $0x10] sm:$0xff]  ;;  %s1693_s22 = sshll.u32 %s2461_s11, 1 }
  0x11   : > { %v192_v4 = vld [vmem:[%s2126_s15 + $0x20] sm:$0xff]  ;;  %v1970_v5 = vpack.c.bf16 %v189_v3, %v188_v2  ;;  %v193_v6 = vld [vmem:[%s2126_s15 + $0x28] sm:$0xff]  ;;  %v191_v8 = vld [vmem:[%s2126_s15 + $0x18] sm:$0xff]  ;;  %s2373_s25 = scalar_lea.vmem %s2459_s2, %s1693_s22 }
  0x12   : > { %v1976_v9 = vpack.c.bf16 %v193_v6, %v192_v4  ;;  %v194_v10 = vld [vmem:[%s2126_s15 + $0x30] sm:$0xff]  ;;  %v195_v11 = vld [vmem:[%s2126_s15 + $0x38] sm:$0xff]  ;;  %v1973_v12 = vpack.c.bf16 %v191_v8, %v190_v7  ;;  %v196_v14 = vld [vmem:[%s2126_s15 + $0x40] sm:$0xff] }
  0x13   : > { %1971 = vmatpush3.bf16.msra.mxu0 %v1970_v5  ;;  %v1979_v13 = vpack.c.bf16 %v195_v11, %v194_v10  ;;  %v197_v15 = vld [vmem:[%s2126_s15 + $0x48] sm:$0xff]  ;;  %v200_v16 = vld [vmem:[%s2126_s15 + $0x60] sm:$0xff]  ;;  %v198_v22 = vld [vmem:[%s2126_s15 + $0x50] sm:$0xff] }
  0x14   : > { %1977 = vmatpush3.bf16.msra.mxu1 %v1976_v9  ;;  %1972 = vmatprep.subr.bf16.mxu0 %v2086_v0  ;;  %v201_v17 = vld [vmem:[%s2126_s15 + $0x68] sm:$0xff]  ;;  %v172_v18 = vld [vmem:[%s2141_s19] sm:$0xf]  ;;  %v1982_v19 = vpack.c.bf16 %v197_v15, %v196_v14  ;;  %v173_v20 = vld [vmem:[%s2141_s19 + $0x4] sm:$0xf] }
  0x15   : > { %1978 = vmatprep.subr.bf16.mxu1 %v2086_v0  ;;  %v1988_v21 = vpack.c.bf16 %v201_v17, %v200_v16  ;;  %v199_v23 = vld [vmem:[%s2126_s15 + $0x58] sm:$0xff]  ;;  %v202_v24 = vld [vmem:[%s2126_s15 + $0x70] sm:$0xff]  ;;  %v204_v28 = vld [vmem:[%s2126_s15 + $0x80] sm:$0xff] }
  0x16   : > { %v203_v25 = vld [vmem:[%s2126_s15 + $0x78] sm:$0xff]  ;;  %v1985_v26 = vpack.c.bf16 %v199_v23, %v198_v22  ;;  %v205_v29 = vld [vmem:[%s2126_s15 + $0x88] sm:$0xff]  ;;  %v208_v30 = vld [vmem:[%s2126_s15 + $0xa0] sm:$0xff] }
  0x17   : > { %1974 = vmatpush3.bf16.msra.mxu0 %v1973_v12  ;;  %v1991_v27 = vpack.c.bf16 %v203_v25, %v202_v24  ;;  %v209_v31 = vld [vmem:[%s2126_s15 + $0xa8] sm:$0xff]  ;;  %v1994_v33 = vpack.c.bf16 %v205_v29, %v204_v28  ;;  %v206_v36 = vld [vmem:[%s2126_s15 + $0x90] sm:$0xff]  ;;  %v207_v37 = vld [vmem:[%s2126_s15 + $0x98] sm:$0xff] }
  0x18   : > { %1980 = vmatpush3.bf16.msra.mxu1 %v1979_v13  ;;  %1981 = vmatprep.subr.bf16.mxu0 %v2086_v0  ;;  %v174_v32 = vld [vmem:[%s2141_s19 + $0x8] sm:$0xf]  ;;  %v175_v34 = vld [vmem:[%s2141_s19 + $0xc] sm:$0xf]  ;;  %v2000_v35 = vpack.c.bf16 %v209_v31, %v208_v30  ;;  %v210_v38 = vld [vmem:[%s2126_s15 + $0xb0] sm:$0xff]  ;;  %v1997_v40 = vpack.c.bf16 %v207_v37, %v206_v36 }
  0x19   : > { %1987 = vmatprep.subr.bf16.mxu1 %v2086_v0  ;;  %v211_v39 = vld [vmem:[%s2126_s15 + $0xb8] sm:$0xff]  ;;  %v212_v42 = vld [vmem:[%s2126_s15 + $0xc0] sm:$0xff]  ;;  %v213_v43 = vld [vmem:[%s2126_s15 + $0xc8] sm:$0xff] }
  0x1a   : > { %1802 = vmatmul.mubr.msk.f32.vlgmr.msra.gmra.mrb[0].mxu0 %vm252_vm1, %v172_v18  ;;  %v2003_v41 = vpack.c.bf16 %v211_v39, %v210_v38  ;;  %v216_v44 = vld [vmem:[%s2126_s15 + $0xe0] sm:$0xff]  ;;  %v217_v45 = vld [vmem:[%s2126_s15 + $0xe8] sm:$0xff]  ;;  %v176_v46 = vld [vmem:[%s2141_s19 + $0x10] sm:$0xf]  ;;  %v2006_v47 = vpack.c.bf16 %v213_v43, %v212_v42 }
  0x1b   : > { %1813 = vmatmul.mubr.msk.f32.vlgmr.msra.gmra.mrb[0].mxu1 %vm252_vm1, %v173_v20  ;;  %1983 = vmatpush3.bf16.msra.mxu0 %v1982_v19  ;;  %v177_v48 = vld [vmem:[%s2141_s19 + $0x14] sm:$0xf]  ;;  %v2012_v49 = vpack.c.bf16 %v217_v45, %v216_v44  ;;  %v215_v51 = vld [vmem:[%s2126_s15 + $0xd8] sm:$0xff]  ;;  %v220_v56 = vld [vmem:[%s2126_s15 + $0x100] sm:$0xff] }
  0x1c   : > { %1984 = vmatprep.subr.bf16.mxu0 %v2086_v0  ;;  %1989 = vmatpush3.bf16.msra.mxu1 %v1988_v21  ;;  %v214_v50 = vld [vmem:[%s2126_s15 + $0xd0] sm:$0xff]  ;;  %v219_v53 = vld [vmem:[%s2126_s15 + $0xf8] sm:$0xff]  ;;  %v221_v57 = vld [vmem:[%s2126_s15 + $0x108] sm:$0xff] }
  0x1d   : > { %1823 = vmatprep.mubr.msk.f32.mxu0 %vm2087_vm0, %v2088_v1  ;;  %1990 = vmatprep.subr.bf16.mxu1 %v2086_v0  ;;  %v218_v52 = vld [vmem:[%s2126_s15 + $0xf0] sm:$0xff]  ;;  %v2009_v54 = vpack.c.bf16 %v215_v51, %v214_v50  ;;  %v224_v58 = vld [vmem:[%s2126_s15 + $0x120] sm:$0xff]  ;;  %v225_v59 = vld [vmem:[%s2126_s15 + $0x128] sm:$0xff]  ;;  %v2018_v61 = vpack.c.bf16 %v221_v57, %v220_v56 }
  0x1e   : > { %1834 = vmatprep.mubr.msk.f32.mxu1 %vm2087_vm0, %v2088_v1  ;;  %v2015_v55 = vpack.c.bf16 %v219_v53, %v218_v52  ;;  %v178_v60 = vld [vmem:[%s2141_s19 + $0x18] sm:$0xf]  ;;  %v179_v62 = vld [vmem:[%s2141_s19 + $0x1c] sm:$0xf]  ;;  %v2024_v63 = vpack.c.bf16 %v225_v59, %v224_v58  ;;  %v222_v2 = vld [vmem:[%s2126_s15 + $0x110] sm:$0xff] }
  0x1f   : > { %1986 = vmatpush3.bf16.msra.mxu0 %v1985_v26  ;;  %v223_v3 = vld [vmem:[%s2126_s15 + $0x118] sm:$0xff]  ;;  %v226_v4 = vld [vmem:[%s2126_s15 + $0x130] sm:$0xff]  ;;  %v228_v8 = vld [vmem:[%s2126_s15 + $0x140] sm:$0xff] }
  0x20   : > { %1992 = vmatpush3.bf16.msra.mxu1 %v1991_v27  ;;  %1993 = vmatprep.subr.bf16.mxu0 %v2086_v0  ;;  %v227_v5 = vld [vmem:[%s2126_s15 + $0x138] sm:$0xff]  ;;  %v2021_v6 = vpack.c.bf16 %v223_v3, %v222_v2  ;;  %v229_v9 = vld [vmem:[%s2126_s15 + $0x148] sm:$0xff]  ;;  %v232_v10 = vld [vmem:[%s2126_s15 + $0x160] sm:$0xff] }
  0x21   : > { %1999 = vmatprep.subr.bf16.mxu1 %v2086_v0  ;;  %v2027_v7 = vpack.c.bf16 %v227_v5, %v226_v4  ;;  %v233_v11 = vld [vmem:[%s2126_s15 + $0x168] sm:$0xff]  ;;  %v180_v12 = vld [vmem:[%s2141_s19 + $0x20] sm:$0xf]  ;;  %v2030_v13 = vpack.c.bf16 %v229_v9, %v228_v8  ;;  %v181_v14 = vld [vmem:[%s2141_s19 + $0x24] sm:$0xf] }
  0x22   : > { %1824 = vmatmul.mubr.msk.f32.vlgmr.msra.gmra.mrb[2].mxu0 %vm252_vm1, %v174_v32  ;;  %v2036_v15 = vpack.c.bf16 %v233_v11, %v232_v10  ;;  %v230_v16 = vld [vmem:[%s2126_s15 + $0x150] sm:$0xff]  ;;  %v231_v17 = vld [vmem:[%s2126_s15 + $0x158] sm:$0xff]  ;;  %v236_v22 = vld [vmem:[%s2126_s15 + $0x180] sm:$0xff] }
  0x23   : > { %1995 = vmatpush3.bf16.msra.mxu0 %v1994_v33  ;;  %1835 = vmatmul.mubr.msk.f32.vlgmr.msra.gmra.mrb[2].mxu1 %vm252_vm1, %v175_v34  ;;  %v234_v18 = vld [vmem:[%s2126_s15 + $0x170] sm:$0xff]  ;;  %v235_v19 = vld [vmem:[%s2126_s15 + $0x178] sm:$0xff]  ;;  %v2033_v20 = vpack.c.bf16 %v231_v17, %v230_v16  ;;  %v237_v23 = vld [vmem:[%s2126_s15 + $0x188] sm:$0xff] }
  0x24   : > { %1996 = vmatprep.subr.bf16.mxu0 %v2086_v0  ;;  %2001 = vmatpush3.bf16.msra.mxu1 %v2000_v35  ;;  %v2039_v21 = vpack.c.bf16 %v235_v19, %v234_v18  ;;  %v240_v24 = vld [vmem:[%s2126_s15 + $0x1a0] sm:$0xff]  ;;  %v241_v25 = vld [vmem:[%s2126_s15 + $0x1a8] sm:$0xff]  ;;  %v2042_v27 = vpack.c.bf16 %v237_v23, %v236_v22  ;;  %v238_v30 = vld [vmem:[%s2126_s15 + $0x190] sm:$0xff] }
  0x25   : > { %1845 = vmatprep.mubr.msk.f32.mxu0 %vm2087_vm0, %v2088_v1  ;;  %2002 = vmatprep.subr.bf16.mxu1 %v2086_v0  ;;  %v182_v26 = vld [vmem:[%s2141_s19 + $0x28] sm:$0xf]  ;;  %v183_v28 = vld [vmem:[%s2141_s19 + $0x2c] sm:$0xf]  ;;  %v2048_v29 = vpack.c.bf16 %v241_v25, %v240_v24  ;;  %v239_v31 = vld [vmem:[%s2126_s15 + $0x198] sm:$0xff] }
  0x26   : > { %1856 = vmatprep.mubr.msk.f32.mxu1 %vm2087_vm0, %v2088_v1  ;;  %v242_v32 = vld [vmem:[%s2126_s15 + $0x1b0] sm:$0xff]  ;;  %v243_v33 = vld [vmem:[%s2126_s15 + $0x1b8] sm:$0xff]  ;;  %v2045_v34 = vpack.c.bf16 %v239_v31, %v238_v30  ;;  %v244_v36 = vld [vmem:[%s2126_s15 + $0x1c0] sm:$0xff] }
  0x27   : > { %1998 = vmatpush3.bf16.msra.mxu0 %v1997_v40  ;;  %v2051_v35 = vpack.c.bf16 %v243_v33, %v242_v32  ;;  %v245_v37 = vld [vmem:[%s2126_s15 + $0x1c8] sm:$0xff]  ;;  %v248_v38 = vld [vmem:[%s2126_s15 + $0x1e0] sm:$0xff]  ;;  %v184_v40 = vld [vmem:[%s2141_s19 + $0x30] sm:$0xf] }
  0x28   : > { %2004 = vmatpush3.bf16.msra.mxu1 %v2003_v41  ;;  %2005 = vmatprep.subr.bf16.mxu0 %v2086_v0  ;;  %v249_v39 = vld [vmem:[%s2126_s15 + $0x1e8] sm:$0xff]  ;;  %v2054_v41 = vpack.c.bf16 %v245_v37, %v244_v36  ;;  %v185_v42 = vld [vmem:[%s2141_s19 + $0x34] sm:$0xf]  ;;  %v247_v45 = vld [vmem:[%s2126_s15 + $0x1d8] sm:$0xff] }
  0x29   : > { %2011 = vmatprep.subr.bf16.mxu1 %v2086_v0  ;;  %v2060_v43 = vpack.c.bf16 %v249_v39, %v248_v38  ;;  %v246_v44 = vld [vmem:[%s2126_s15 + $0x1d0] sm:$0xff]  ;;  %v186_v50 = vld [vmem:[%s2141_s19 + $0x38] sm:$0xf]  ;;  %v187_v51 = vld [vmem:[%s2141_s19 + $0x3c] sm:$0xf] }
  0x2a   : > { %1846 = vmatmul.mubr.msk.f32.vlgmr.msra.gmra.mrb[4].mxu0 %vm252_vm1, %v176_v46  ;;  %v250_v46 = vld [vmem:[%s2126_s15 + $0x1f0] sm:$0xff] }
  0x2b   : > { %2007 = vmatpush3.bf16.msra.mxu0 %v2006_v47  ;;  %1857 = vmatmul.mubr.msk.f32.vlgmr.msra.gmra.mrb[4].mxu1 %vm252_vm1, %v177_v48  ;;  %v251_v47 = vld [vmem:[%s2126_s15 + $0x1f8] sm:$0xff]  ;;  %v2057_v48 = vpack.c.bf16 %v247_v45, %v246_v44 }
  0x2c   : > { %2008 = vmatprep.subr.bf16.mxu0 %v2086_v0  ;;  %2013 = vmatpush3.bf16.msra.mxu1 %v2012_v49  ;;  %v2063_v49 = vpack.c.bf16 %v251_v47, %v250_v46 }
  0x2d   : > { %1867 = vmatprep.mubr.msk.f32.mxu0 %vm2087_vm0, %v2088_v1  ;;  %2014 = vmatprep.subr.bf16.mxu1 %v2086_v0 }
  0x2e   : > { %1878 = vmatprep.mubr.msk.f32.mxu1 %vm2087_vm0, %v2088_v1 }
  0x2f   : > { %2010 = vmatpush3.bf16.msra.mxu0 %v2009_v54 }
  0x30   : > { %2016 = vmatpush3.bf16.msra.mxu1 %v2015_v55  ;;  %2017 = vmatprep.subr.bf16.mxu0 %v2086_v0 }
  0x31   : > { %2023 = vmatprep.subr.bf16.mxu1 %v2086_v0 }
  0x32   : > { %1868 = vmatmul.mubr.msk.f32.vlgmr.msra.gmra.mrb[6].mxu0 %vm252_vm1, %v178_v60 }
  0x33   : > { %2019 = vmatpush3.bf16.msra.mxu0 %v2018_v61  ;;  %1879 = vmatmul.mubr.msk.f32.vlgmr.msra.gmra.mrb[6].mxu1 %vm252_vm1, %v179_v62 }
  0x34   : > { %2020 = vmatprep.subr.bf16.mxu0 %v2086_v0  ;;  %2025 = vmatpush3.bf16.msra.mxu1 %v2024_v63 }
  0x35   : > { %1889 = vmatprep.mubr.msk.f32.mxu0 %vm2087_vm0, %v2088_v1  ;;  %2026 = vmatprep.subr.bf16.mxu1 %v2086_v0 }
  0x36   : > { %1900 = vmatprep.mubr.msk.f32.mxu1 %vm2087_vm0, %v2088_v1 }
  0x37   : > { %2022 = vmatpush3.bf16.msra.mxu0 %v2021_v6 }
  0x38   : > { %2028 = vmatpush3.bf16.msra.mxu1 %v2027_v7  ;;  %2029 = vmatprep.subr.bf16.mxu0 %v2086_v0 }
  0x39   : > { %2035 = vmatprep.subr.bf16.mxu1 %v2086_v0 }
  0x3a   : > { %1890 = vmatmul.mubr.msk.f32.vlgmr.msra.gmra.mrb[8].mxu0 %vm252_vm1, %v180_v12 }
  0x3b   : > { %2031 = vmatpush3.bf16.msra.mxu0 %v2030_v13  ;;  %1901 = vmatmul.mubr.msk.f32.vlgmr.msra.gmra.mrb[8].mxu1 %vm252_vm1, %v181_v14 }
  0x3c   : > { %2032 = vmatprep.subr.bf16.mxu0 %v2086_v0  ;;  %2037 = vmatpush3.bf16.msra.mxu1 %v2036_v15 }
  0x3d   : > { %1911 = vmatprep.mubr.msk.f32.mxu0 %vm2087_vm0, %v2088_v1  ;;  %2038 = vmatprep.subr.bf16.mxu1 %v2086_v0 }
  0x3e   : > { %1922 = vmatprep.mubr.msk.f32.mxu1 %vm2087_vm0, %v2088_v1 }
  0x3f   : > { %2034 = vmatpush3.bf16.msra.mxu0 %v2033_v20 }
  0x40   : > { %2040 = vmatpush3.bf16.msra.mxu1 %v2039_v21  ;;  %2041 = vmatprep.subr.bf16.mxu0 %v2086_v0 }
  0x41   : > { %2047 = vmatprep.subr.bf16.mxu1 %v2086_v0 }
  0x42   : > { %1912 = vmatmul.mubr.msk.f32.vlgmr.msra.gmra.mrb[10].mxu0 %vm252_vm1, %v182_v26 }
  0x43   : > { %2043 = vmatpush3.bf16.msra.mxu0 %v2042_v27  ;;  %1923 = vmatmul.mubr.msk.f32.vlgmr.msra.gmra.mrb[10].mxu1 %vm252_vm1, %v183_v28 }
  0x44   : > { %2044 = vmatprep.subr.bf16.mxu0 %v2086_v0  ;;  %2049 = vmatpush3.bf16.msra.mxu1 %v2048_v29 }
  0x45   : > { %1933 = vmatprep.mubr.msk.f32.mxu0 %vm2087_vm0, %v2088_v1  ;;  %2050 = vmatprep.subr.bf16.mxu1 %v2086_v0 }
  0x46   : > { %1944 = vmatprep.mubr.msk.f32.mxu1 %vm2087_vm0, %v2088_v1 }
  0x47   : > { %2046 = vmatpush3.bf16.msra.mxu0 %v2045_v34 }
  0x48   : > { %2052 = vmatpush3.bf16.msra.mxu1 %v2051_v35  ;;  %2053 = vmatprep.subr.bf16.mxu0 %v2086_v0 }
  0x49   : > { %2059 = vmatprep.subr.bf16.mxu1 %v2086_v0 }
  0x4a   : > { %1934 = vmatmul.mubr.msk.f32.vlgmr.msra.gmra.mrb[12].mxu0 %vm252_vm1, %v184_v40 }
  0x4b   : > { %2055 = vmatpush3.bf16.msra.mxu0 %v2054_v41  ;;  %1945 = vmatmul.mubr.msk.f32.vlgmr.msra.gmra.mrb[12].mxu1 %vm252_vm1, %v185_v42 }
  0x4c   : > { %2056 = vmatprep.subr.bf16.mxu0 %v2086_v0  ;;  %2061 = vmatpush3.bf16.msra.mxu1 %v2060_v43 }
  0x4d   : > { %1955 = vmatprep.mubr.msk.f32.mxu0 %vm2087_vm0, %v2088_v1  ;;  %2062 = vmatprep.subr.bf16.mxu1 %v2086_v0 }
  0x4e   : > { %1966 = vmatprep.mubr.msk.f32.mxu1 %vm2087_vm0, %v2088_v1 }
  0x4f   : > { %2058 = vmatpush3.bf16.msra.mxu0 %v2057_v48 }
  0x50   : > { %2064 = vmatpush3.bf16.msra.mxu1 %v2063_v49 }
  0x52   : > { %1956 = vmatmul.mubr.msk.f32.vlgmr.msra.gmra.mrb[14].mxu0 %vm252_vm1, %v186_v50 }
  0x53   : > { %1967 = vmatmul.mubr.msk.f32.vlgmr.msra.gmra.mrb[14].mxu1 %vm252_vm1, %v187_v51 }
  0xed   : > { %v2288_v52 = vpop.f32.mrb[0].mxu0 }
  0xee   : > { %v2290_v53 = vpop.f32.mrb[0].mxu1  ;;  %v1803_v54 = vpop.f32.mrb[1].mxu0  ;;  %v1437_v55 = vrot.slane %v2288_v52, 2 }
  0xef   : > { %v1438_v0 = vrot.slane %v2290_v53, 2  ;;  %v1814_v56 = vpop.f32.mrb[1].mxu1 }
  0xf0   : > { %1453 = vrot.lane.b32.xlu0 %v1437_v55, %s2089_s20 }
  0xf1   : > { %1519 = vrot.lane.b32.xlu1 %v1438_v0, %s2090_s21 }
  0xf4   : > { %1455 = vrot.lane.b32.xlu0 %v1438_v0, %s2089_s20 }
  0xf5   : > { %v2297_v1 = vpop.f32.mrb[2].mxu0 }
  0xf6   : > { %v1439_v57 = vrot.slane %v2297_v1, 2  ;;  %v1825_v58 = vpop.f32.mrb[3].mxu0  ;;  %v2300_v59 = vpop.f32.mrb[2].mxu1 }
  0xf7   : > { %v1836_v60 = vpop.f32.mrb[3].mxu1  ;;  %v1440_v61 = vrot.slane %v2300_v59, 2 }
  0xf8   : > { %1517 = vrot.lane.b32.xlu0 %v1437_v55, %s2090_s21  ;;  %1457 = vrot.lane.b32.xlu1 %v1439_v57, %s2089_s20 }
  0xfc   : > { %1521 = vrot.lane.b32.xlu0 %v1439_v57, %s2090_s21  ;;  %1459 = vrot.lane.b32.xlu1 %v1440_v61, %s2089_s20 }
  0xfd   : > { %v2307_v62 = vpop.f32.mrb[4].mxu0 }
  0xfe   : > { %v1441_v63 = vrot.slane %v2307_v62, 2  ;;  %v2310_v2 = vpop.f32.mrb[4].mxu1  ;;  %v1847_v3 = vpop.f32.mrb[5].mxu0 }
  0xff   : > { %v1858_v4 = vpop.f32.mrb[5].mxu1  ;;  %v1442_v5 = vrot.slane %v2310_v2, 2 }
 0x100   : > { %1523 = vrot.lane.b32.xlu1 %v1440_v61, %s2090_s21  ;;  %1461 = vrot.lane.b32.xlu0 %v1441_v63, %s2089_s20 }
 0x104   : > { %1463 = vrot.lane.b32.xlu1 %v1442_v5, %s2089_s20  ;;  %1525 = vrot.lane.b32.xlu0 %v1441_v63, %s2090_s21 }
 0x105   : > { %v2317_v6 = vpop.f32.mrb[6].mxu0 }
 0x106   : > { %v1443_v7 = vrot.slane %v2317_v6, 2  ;;  %v2320_v8 = vpop.f32.mrb[6].mxu1  ;;  %v1869_v9 = vpop.f32.mrb[7].mxu0 }
 0x107   : > { %v1880_v10 = vpop.f32.mrb[7].mxu1  ;;  %v1444_v11 = vrot.slane %v2320_v8, 2 }
 0x108   : > { %1527 = vrot.lane.b32.xlu1 %v1442_v5, %s2090_s21  ;;  %1465 = vrot.lane.b32.xlu0 %v1443_v7, %s2089_s20 }
 0x10c   : > { %1467 = vrot.lane.b32.xlu1 %v1444_v11, %s2089_s20  ;;  %1529 = vrot.lane.b32.xlu0 %v1443_v7, %s2090_s21 }
 0x10d   : > { %v2327_v12 = vpop.f32.mrb[8].mxu0 }
 0x10e   : > { %v1445_v13 = vrot.slane %v2327_v12, 2  ;;  %v2330_v14 = vpop.f32.mrb[8].mxu1  ;;  %v1891_v15 = vpop.f32.mrb[9].mxu0 }
 0x10f   : > { %v1902_v16 = vpop.f32.mrb[9].mxu1  ;;  %v1446_v17 = vrot.slane %v2330_v14, 2 }
 0x110   : > { %1531 = vrot.lane.b32.xlu1 %v1444_v11, %s2090_s21  ;;  %1469 = vrot.lane.b32.xlu0 %v1445_v13, %s2089_s20 }
 0x114   : > { %1471 = vrot.lane.b32.xlu1 %v1446_v17, %s2089_s20  ;;  %1533 = vrot.lane.b32.xlu0 %v1445_v13, %s2090_s21 }
 0x115   : > { %v2337_v18 = vpop.f32.mrb[10].mxu0 }
 0x116   : > { %v1447_v19 = vrot.slane %v2337_v18, 2  ;;  %v2340_v20 = vpop.f32.mrb[10].mxu1  ;;  %v1913_v21 = vpop.f32.mrb[11].mxu0 }
 0x117   : > { %v1924_v22 = vpop.f32.mrb[11].mxu1  ;;  %v1448_v23 = vrot.slane %v2340_v20, 2 }
 0x118   : > { %1535 = vrot.lane.b32.xlu1 %v1446_v17, %s2090_s21  ;;  %1473 = vrot.lane.b32.xlu0 %v1447_v19, %s2089_s20 }
 0x11c   : > { %1475 = vrot.lane.b32.xlu1 %v1448_v23, %s2089_s20  ;;  %1537 = vrot.lane.b32.xlu0 %v1447_v19, %s2090_s21 }
 0x11d   : > { %v2347_v24 = vpop.f32.mrb[12].mxu0 }
 0x11e   : > { %v1449_v25 = vrot.slane %v2347_v24, 2  ;;  %v2350_v26 = vpop.f32.mrb[12].mxu1  ;;  %v1935_v27 = vpop.f32.mrb[13].mxu0 }
 0x11f   : > { %v1946_v28 = vpop.f32.mrb[13].mxu1  ;;  %v1450_v29 = vrot.slane %v2350_v26, 2 }
 0x120   : > { %1539 = vrot.lane.b32.xlu1 %v1448_v23, %s2090_s21  ;;  %1477 = vrot.lane.b32.xlu0 %v1449_v25, %s2089_s20 }
 0x124   : > { %1479 = vrot.lane.b32.xlu1 %v1450_v29, %s2089_s20  ;;  %1541 = vrot.lane.b32.xlu0 %v1449_v25, %s2090_s21 }
 0x125   : > { %v2357_v30 = vpop.f32.mrb[14].mxu0 }
 0x126   : > { %v1451_v31 = vrot.slane %v2357_v30, 2  ;;  %v2360_v32 = vpop.f32.mrb[14].mxu1  ;;  %v1957_v33 = vpop.f32.mrb[15].mxu0 }
 0x127   : > { %v1968_v34 = vpop.f32.mrb[15].mxu1  ;;  %v1452_v35 = vrot.slane %v2360_v32, 2 }
 0x128   : > { %1543 = vrot.lane.b32.xlu1 %v1450_v29, %s2090_s21  ;;  %1481 = vrot.lane.b32.xlu0 %v1451_v31, %s2089_s20 }
 0x12c   : > { %1483 = vrot.lane.b32.xlu1 %v1452_v35, %s2089_s20  ;;  %1545 = vrot.lane.b32.xlu0 %v1451_v31, %s2090_s21 }
 0x130   : > { %1547 = vrot.lane.b32.xlu1 %v1452_v35, %s2090_s21 }
 0x162   : > { %v1454_v36 = vpop.permute.xlu0 %1453 }
 0x163   : > { %v1520_v37 = vpop.permute.xlu1 %1519  ;;  %v1501_v44 = vsub.f32 %v2288_v52, %v1454_v36 }
 0x164   : > { %v1566_v39 = vadd.f32 %v1520_v37, %v2290_v53 }
 0x166   : > { %v1456_v38 = vpop.permute.xlu0 %1455 }
 0x167   : > { %v1502_v40 = vsub.f32 %v2290_v53, %v1456_v38 }
 0x169   : > { %v1582_v41 = vsel %vm252_vm1, %v1502_v40, %v1566_v39 }
 0x16a   : > { %1599 = vst.msk [vmem:[%s2373_s25 + $0x2] sm:$0x3] %vm1597_vm2, %v1582_v41  ;;  %v1518_v42 = vpop.permute.xlu0 %1517  ;;  %v1458_v43 = vpop.permute.xlu1 %1457 }
 0x16b   : > { %v1565_v45 = vadd.f32 %v1518_v42, %v2288_v52  ;;  %v1503_v49 = vsub.f32 %v2297_v1, %v1458_v43 }
 0x16d   : > { %v1581_v46 = vsel %vm252_vm1, %v1501_v44, %v1565_v45 }
 0x16e   : > { %1598 = vst.msk [vmem:[%s2373_s25] sm:$0x3] %vm1597_vm2, %v1581_v46  ;;  %v1522_v47 = vpop.permute.xlu0 %1521  ;;  %v1460_v48 = vpop.permute.xlu1 %1459 }
 0x16f   : > { %v1567_v50 = vadd.f32 %v1522_v47, %v2297_v1  ;;  %v1504_v52 = vsub.f32 %v2300_v59, %v1460_v48 }
 0x171   : > { %v1583_v51 = vsel %vm252_vm1, %v1503_v49, %v1567_v50 }
 0x172   : > { %1600 = vst.msk [vmem:[%s2373_s25 + $0x4] sm:$0x3] %vm1597_vm2, %v1583_v51  ;;  %v1524_v53 = vpop.permute.xlu1 %1523  ;;  %v1462_v54 = vpop.permute.xlu0 %1461 }
 0x173   : > { %v1568_v55 = vadd.f32 %v1524_v53, %v2300_v59  ;;  %v1505_v1 = vsub.f32 %v2307_v62, %v1462_v54 }
 0x175   : > { %v1584_v0 = vsel %vm252_vm1, %v1504_v52, %v1568_v55 }
 0x176   : > { %1601 = vst.msk [vmem:[%s2373_s25 + $0x6] sm:$0x3] %vm1597_vm2, %v1584_v0  ;;  %v1464_v56 = vpop.permute.xlu1 %1463  ;;  %v1526_v57 = vpop.permute.xlu0 %1525 }
 0x177   : > { %v1569_v58 = vadd.f32 %v1526_v57, %v2307_v62  ;;  %v1506_v59 = vsub.f32 %v2310_v2, %v1464_v56 }
 0x179   : > { %v1585_v60 = vsel %vm252_vm1, %v1505_v1, %v1569_v58 }
 0x17a   : > { %1602 = vst.msk [vmem:[%s2373_s25 + $0x8] sm:$0x3] %vm1597_vm2, %v1585_v60  ;;  %v1528_v61 = vpop.permute.xlu1 %1527  ;;  %v1466_v63 = vpop.permute.xlu0 %1465 }
 0x17b   : > { %v1570_v3 = vadd.f32 %v1528_v61, %v2310_v2  ;;  %v1507_v62 = vsub.f32 %v2317_v6, %v1466_v63 }
 0x17d   : > { %v1586_v4 = vsel %vm252_vm1, %v1506_v59, %v1570_v3 }
 0x17e   : > { %1603 = vst.msk [vmem:[%s2373_s25 + $0xa] sm:$0x3] %vm1597_vm2, %v1586_v4  ;;  %v1468_v5 = vpop.permute.xlu1 %1467  ;;  %v1530_v7 = vpop.permute.xlu0 %1529 }
 0x17f   : > { %v1571_v9 = vadd.f32 %v1530_v7, %v2317_v6  ;;  %v1508_v2 = vsub.f32 %v2320_v8, %v1468_v5 }
 0x181   : > { %v1587_v10 = vsel %vm252_vm1, %v1507_v62, %v1571_v9 }
 0x182   : > { %1604 = vst.msk [vmem:[%s2373_s25 + $0xc] sm:$0x3] %vm1597_vm2, %v1587_v10  ;;  %v1532_v11 = vpop.permute.xlu1 %1531  ;;  %v1470_v13 = vpop.permute.xlu0 %1469 }
 0x183   : > { %v1572_v15 = vadd.f32 %v1532_v11, %v2320_v8  ;;  %v1509_v6 = vsub.f32 %v2327_v12, %v1470_v13 }
 0x185   : > { %v1588_v16 = vsel %vm252_vm1, %v1508_v2, %v1572_v15 }
 0x186   : > { %1605 = vst.msk [vmem:[%s2373_s25 + $0xe] sm:$0x3] %vm1597_vm2, %v1588_v16  ;;  %v1472_v17 = vpop.permute.xlu1 %1471  ;;  %v1534_v19 = vpop.permute.xlu0 %1533 }
 0x187   : > { %v1573_v21 = vadd.f32 %v1534_v19, %v2327_v12  ;;  %v1510_v8 = vsub.f32 %v2330_v14, %v1472_v17 }
 0x189   : > { %v1589_v22 = vsel %vm252_vm1, %v1509_v6, %v1573_v21 }
 0x18a   : > { %1606 = vst.msk [vmem:[%s2373_s25 + $0x10] sm:$0x3] %vm1597_vm2, %v1589_v22  ;;  %v1536_v23 = vpop.permute.xlu1 %1535  ;;  %v1474_v25 = vpop.permute.xlu0 %1473 }
 0x18b   : > { %v1574_v27 = vadd.f32 %v1536_v23, %v2330_v14  ;;  %v1511_v12 = vsub.f32 %v2337_v18, %v1474_v25 }
 0x18d   : > { %v1590_v28 = vsel %vm252_vm1, %v1510_v8, %v1574_v27 }
 0x18e   : > { %1607 = vst.msk [vmem:[%s2373_s25 + $0x12] sm:$0x3] %vm1597_vm2, %v1590_v28  ;;  %v1476_v29 = vpop.permute.xlu1 %1475  ;;  %v1538_v31 = vpop.permute.xlu0 %1537 }
 0x18f   : > { %v1575_v33 = vadd.f32 %v1538_v31, %v2337_v18  ;;  %v1512_v14 = vsub.f32 %v2340_v20, %v1476_v29 }
 0x191   : > { %v1591_v34 = vsel %vm252_vm1, %v1511_v12, %v1575_v33 }
 0x192   : > { %1608 = vst.msk [vmem:[%s2373_s25 + $0x14] sm:$0x3] %vm1597_vm2, %v1591_v34  ;;  %v1540_v35 = vpop.permute.xlu1 %1539  ;;  %v1478_v36 = vpop.permute.xlu0 %1477 }
 0x193   : > { %v1576_v37 = vadd.f32 %v1540_v35, %v2340_v20  ;;  %v1513_v18 = vsub.f32 %v2347_v24, %v1478_v36 }
 0x195   : > { %v1592_v38 = vsel %vm252_vm1, %v1512_v14, %v1576_v37 }
 0x196   : > { %1609 = vst.msk [vmem:[%s2373_s25 + $0x16] sm:$0x3] %vm1597_vm2, %v1592_v38  ;;  %v1480_v39 = vpop.permute.xlu1 %1479  ;;  %v1542_v40 = vpop.permute.xlu0 %1541 }
 0x197   : > { %v1577_v41 = vadd.f32 %v1542_v40, %v2347_v24  ;;  %v1514_v20 = vsub.f32 %v2350_v26, %v1480_v39 }
 0x199   : > { %v1593_v42 = vsel %vm252_vm1, %v1513_v18, %v1577_v41 }
 0x19a   : > { %1610 = vst.msk [vmem:[%s2373_s25 + $0x18] sm:$0x3] %vm1597_vm2, %v1593_v42  ;;  %v1544_v43 = vpop.permute.xlu1 %1543  ;;  %v1482_v44 = vpop.permute.xlu0 %1481 }
 0x19b   : > { %v1578_v45 = vadd.f32 %v1544_v43, %v2350_v26  ;;  %v1515_v49 = vsub.f32 %v2357_v30, %v1482_v44 }
 0x19d   : > { %v1594_v46 = vsel %vm252_vm1, %v1514_v20, %v1578_v45 }
 0x19e   : > { %1611 = vst.msk [vmem:[%s2373_s25 + $0x1a] sm:$0x3] %vm1597_vm2, %v1594_v46  ;;  %v1484_v47 = vpop.permute.xlu1 %1483  ;;  %v1546_v48 = vpop.permute.xlu0 %1545 }
 0x19f   : > { %v1579_v24 = vadd.f32 %v1546_v48, %v2357_v30  ;;  %v1516_v53 = vsub.f32 %v2360_v32, %v1484_v47 }
 0x1a1   : > { %v1595_v50 = vsel %vm252_vm1, %v1515_v49, %v1579_v24 }
 0x1a2   : > { %1612 = vst.msk [vmem:[%s2373_s25 + $0x1c] sm:$0x3] %vm1597_vm2, %v1595_v50  ;;  %v1548_v51 = vpop.permute.xlu1 %1547 }
 0x1a3   : > { %v1580_v54 = vadd.f32 %v1548_v51, %v2360_v32 }
 0x1a5   : > { %v1596_v26 = vsel %vm252_vm1, %v1516_v53, %v1580_v54 }
 0x1a6   : > { %1613 = vst.msk [vmem:[%s2373_s25 + $0x1e] sm:$0x3] %vm1597_vm2, %v1596_v26 }
 0x1a7 PF: > { %s12_s9 = sadd.s32 1, %s2084_s9  }
 0x1a8   : > { %p9_p4 = scmp.ge.s32.totalorder %s12_s9, 7  }
 0x1aa   :  { %11 = sbr.rel (!%p9_p4) target bundleno = 1 (0x1), region = 61 }

// kernel: reverse.4
= control target key start
LH: loop header
LB: loop body
LE: loop exit
PB: predicated region body
PF: predicated region fallthrough
CT: control target
= control target key end

     0   :  { %s344_s0 = inlined_call_operand.vmem [shape: f32[2,32,16,7], index: 0, kind: input, shape index: {}]   ;;  %s345_s1 = inlined_call_operand.vmem [shape: f32[2,32,16,7], index: 1, kind: output, shape index: {}]  }
   0x1   :  { %v112_v0 = vld [vmem:[%s344_s0 + $0x60] sm:$0xff]  ;;  %v113_v1 = vld [vmem:[%s344_s0 + $0xd0] sm:$0xff]  ;;  %v138_v14 = vld [vmem:[%s344_s0 + $0x68] sm:$0xff] }
   0x2   :  { %v115_v2 = vld [vmem:[%s344_s0 + $0x50] sm:$0xff]  ;;  %4 = vst [vmem:[%s345_s1] sm:$0xff] %v112_v0  ;;  %114 = vst [vmem:[%s345_s1 + $0x70] sm:$0xff] %v113_v1  ;;  %v117_v3 = vld [vmem:[%s344_s0 + $0xc0] sm:$0xff] }
   0x3   :  { %116 = vst [vmem:[%s345_s1 + $0x10] sm:$0xff] %v115_v2  ;;  %v119_v4 = vld [vmem:[%s344_s0 + $0x40] sm:$0xff]  ;;  %v121_v5 = vld [vmem:[%s344_s0 + $0xb0] sm:$0xff]  ;;  %118 = vst [vmem:[%s345_s1 + $0x80] sm:$0xff] %v117_v3 }
   0x4   :  { %120 = vst [vmem:[%s345_s1 + $0x20] sm:$0xff] %v119_v4  ;;  %122 = vst [vmem:[%s345_s1 + $0x90] sm:$0xff] %v121_v5  ;;  %v123_v6 = vld [vmem:[%s344_s0 + $0x30] sm:$0xff]  ;;  %v125_v7 = vld [vmem:[%s344_s0 + $0xa0] sm:$0xff] }
   0x5   :  { %v127_v8 = vld [vmem:[%s344_s0 + $0x20] sm:$0xff]  ;;  %124 = vst [vmem:[%s345_s1 + $0x30] sm:$0xff] %v123_v6  ;;  %126 = vst [vmem:[%s345_s1 + $0xa0] sm:$0xff] %v125_v7  ;;  %v129_v9 = vld [vmem:[%s344_s0 + $0x90] sm:$0xff] }
   0x6   :  { %128 = vst [vmem:[%s345_s1 + $0x40] sm:$0xff] %v127_v8  ;;  %v131_v10 = vld [vmem:[%s344_s0 + $0x10] sm:$0xff]  ;;  %v133_v11 = vld [vmem:[%s344_s0 + $0x80] sm:$0xff]  ;;  %130 = vst [vmem:[%s345_s1 + $0xb0] sm:$0xff] %v129_v9 }
   0x7   :  { %132 = vst [vmem:[%s345_s1 + $0x50] sm:$0xff] %v131_v10  ;;  %134 = vst [vmem:[%s345_s1 + $0xc0] sm:$0xff] %v133_v11  ;;  %v49_v12 = vld [vmem:[%s344_s0] sm:$0xff]  ;;  %v136_v13 = vld [vmem:[%s344_s0 + $0x70] sm:$0xff] }
   0x8   :  { %135 = vst [vmem:[%s345_s1 + $0x60] sm:$0xff] %v49_v12  ;;  %137 = vst [vmem:[%s345_s1 + $0xd0] sm:$0xff] %v136_v13  ;;  %v140_v15 = vld [vmem:[%s344_s0 + $0xd8] sm:$0xff]  ;;  %v144_v17 = vld [vmem:[%s344_s0 + $0xc8] sm:$0xff] }
   0x9   :  { %139 = vst [vmem:[%s345_s1 + $0x8] sm:$0xff] %v138_v14  ;;  %v142_v16 = vld [vmem:[%s344_s0 + $0x58] sm:$0xff]  ;;  %141 = vst [vmem:[%s345_s1 + $0x78] sm:$0xff] %v140_v15  ;;  %v146_v18 = vld [vmem:[%s344_s0 + $0x48] sm:$0xff] }
   0xa   :  { %143 = vst [vmem:[%s345_s1 + $0x18] sm:$0xff] %v142_v16  ;;  %145 = vst [vmem:[%s345_s1 + $0x88] sm:$0xff] %v144_v17  ;;  %v148_v19 = vld [vmem:[%s344_s0 + $0xb8] sm:$0xff]  ;;  %v152_v21 = vld [vmem:[%s344_s0 + $0xa8] sm:$0xff] }
   0xb   :  { %v150_v20 = vld [vmem:[%s344_s0 + $0x38] sm:$0xff]  ;;  %147 = vst [vmem:[%s345_s1 + $0x28] sm:$0xff] %v146_v18  ;;  %149 = vst [vmem:[%s345_s1 + $0x98] sm:$0xff] %v148_v19  ;;  %v154_v22 = vld [vmem:[%s344_s0 + $0x28] sm:$0xff] }
   0xc   :  { %151 = vst [vmem:[%s345_s1 + $0x38] sm:$0xff] %v150_v20  ;;  %v156_v23 = vld [vmem:[%s344_s0 + $0x98] sm:$0xff]  ;;  %153 = vst [vmem:[%s345_s1 + $0xa8] sm:$0xff] %v152_v21  ;;  %v160_v25 = vld [vmem:[%s344_s0 + $0x88] sm:$0xff] }
   0xd   :  { %155 = vst [vmem:[%s345_s1 + $0x48] sm:$0xff] %v154_v22  ;;  %157 = vst [vmem:[%s345_s1 + $0xb8] sm:$0xff] %v156_v23  ;;  %v158_v24 = vld [vmem:[%s344_s0 + $0x18] sm:$0xff]  ;;  %v162_v26 = vld [vmem:[%s344_s0 + $0x8] sm:$0xff] }
   0xe   :  { %159 = vst [vmem:[%s345_s1 + $0x58] sm:$0xff] %v158_v24  ;;  %161 = vst [vmem:[%s345_s1 + $0xc8] sm:$0xff] %v160_v25  ;;  %v164_v27 = vld [vmem:[%s344_s0 + $0x78] sm:$0xff] }
   0xf   :  { %163 = vst [vmem:[%s345_s1 + $0x68] sm:$0xff] %v162_v26  ;;  %165 = vst [vmem:[%s345_s1 + $0xd8] sm:$0xff] %v164_v27 }

// kernel: fno_forward.8
= control target key start
LH: loop header
LB: loop body
LE: loop exit
PB: predicated region body
PF: predicated region fallthrough
CT: control target
= control target key end

     0   :  { %s1295_s15 = smov 0   ;;  %s1810_s0 = inlined_call_operand.vmem [shape: f32[512,32], index: 0, kind: input, shape index: {}]   ;;  %s1811_s1 = inlined_call_operand.vmem [shape: f32[32,32], index: 1, kind: input, shape index: {}]   ;;  %s1812_s2 = inlined_call_operand.vmem [shape: f32[1,32], index: 2, kind: input, shape index: {}]   ;;  %s1813_s3 = inlined_call_operand.vmem [shape: f32[512,32], index: 3, kind: input, shape index: {}]   ;;  %s1814_s4 = inlined_call_operand.vmem [shape: f32[512,32], index: 4, kind: output, shape index: {}]  }
   0x1 LB: > { %s1040_s16 = sadd.s32 4294967295, %s1268_s15   ;;  %p1044_p0 = scmp.ge.s32.totalorder %s1268_s15, 1  ;;  %s1268_s15 = sphi %s1295_s15, %s14_s15  }
   0x2   : > { %p174_p1 = scmp.lt.s32.totalorder %s1268_s15, 3 }
   0x4   : > { %p175_p2 = pnand %p1044_p0, %p174_p1 }
   0x5   : > { %v255_v0 = vld [vmem:[%s1811_s1] sm:$0xff] (!%p175_p2)  ;;  %v256_v1 = vld [vmem:[%s1811_s1 + $0x8] sm:$0xff] (!%p175_p2)  ;;  %v257_v2 = vld [vmem:[%s1811_s1 + $0x10] sm:$0xff] (!%p175_p2)  ;;  %s1045_s23 = sshll.u32 (!%p175_p2), %s1040_s16, 5  ;;  %vm266_vm0 = vcmask (!%p175_p2), 261120  }
   0x6   : > { %178 = sbr.rel (%p175_p2) target bundleno = 339 (0x153), region = 36  ;;  %v1178_v3 = vpack.c.bf16 (!%p175_p2), %v256_v1, %v255_v0  ;;  %v258_v4 = vld [vmem:[%s1811_s1 + $0x18] sm:$0xff] (!%p175_p2)  ;;  %p206_p3 = scmp.lt.s32.totalorder (!%p175_p2), %s1045_s23, 63  ;;  %v1396_v38 = vld [vmem:[%s1812_s2] ss:$0 sm:$0xff] (!%p175_p2) }
   0x7   : > { %v1182_v5 = vpack.c.bf16 (!%p175_p2), %v258_v4, %v257_v2 }
   0x8   : > { %1179 = vmatprep.subr.bf16.mxu0 (!%p175_p2), %v1178_v3  ;;  %1186 = vmatprep.subr.bf16.mxu1 (!%p175_p2), %v1178_v3 }
   0x9   : > { %1181 = vmatpush3.bf16.msra.mxu0 (!%p175_p2), %v1178_v3  ;;  %1188 = vmatpush3.bf16.msra.mxu1 (!%p175_p2), %v1178_v3 }
   0xa   : > { %1183 = vmatprep.subr.bf16.mxu0 (!%p175_p2), %v1182_v5  ;;  %1187 = vmatprep.subr.bf16.mxu1 (!%p175_p2), %v1182_v5 }
   0xd   : > { %s1816_s23 = smov (!%p206_p3, %s1045_s23), 63  ;;  %1185 = vmatpush3.bf16.msra.mxu0 %v1182_v5  ;;  %1189 = vmatpush3.bf16.msra.mxu1 %v1182_v5 }
   0xe   : > { %s1315_s26 = sshll.u32 %s1816_s23, 3 }
   0xf   : > { %s1321_s29 = scalar_lea.vmem %s1810_s0, %s1315_s26  ;;  %s1391_s6 = scalar_lea.vmem %s1813_s3, %s1315_s26 }
  0x10   : > { %v223_v6 = vld [vmem:[%s1321_s29] sm:$0xff]  ;;  %v224_v8 = vld [vmem:[%s1321_s29 + $0x8] sm:$0xff]  ;;  %v225_v10 = vld [vmem:[%s1321_s29 + $0x10] sm:$0xff]  ;;  %s1545_s11 = scalar_lea.vmem %s1814_s4, %s1315_s26 }
  0x11   : > { %v239_v7 = vld [vmem:[%s1321_s29 + $0x80] sm:$0xff]  ;;  %v240_v9 = vld [vmem:[%s1321_s29 + $0x88] sm:$0xff]  ;;  %1130 = vmatprep.mubr.msk.f32.mxu0 %vm266_vm0, %v223_v6  ;;  %v241_v11 = vld [vmem:[%s1321_s29 + $0x90] sm:$0xff] }
  0x12   : > { %1154 = vmatprep.mubr.msk.f32.mxu1 %vm266_vm0, %v239_v7  ;;  %1131 = vmatmul.mubr.msk.f32.vlgmr.msra.gmra.mrb[0].mxu0 %vm266_vm0, %v224_v8  ;;  %v226_v12 = vld [vmem:[%s1321_s29 + $0x18] sm:$0xff]  ;;  %v227_v14 = vld [vmem:[%s1321_s29 + $0x20] sm:$0xff]  ;;  %v228_v16 = vld [vmem:[%s1321_s29 + $0x28] sm:$0xff] }
  0x13   : > { %1155 = vmatmul.mubr.msk.f32.vlgmr.msra.gmra.mrb[0].mxu1 %vm266_vm0, %v240_v9  ;;  %1133 = vmatprep.mubr.msk.f32.mxu0 %vm266_vm0, %v225_v10  ;;  %v242_v13 = vld [vmem:[%s1321_s29 + $0x98] sm:$0xff]  ;;  %v243_v15 = vld [vmem:[%s1321_s29 + $0xa0] sm:$0xff]  ;;  %v244_v17 = vld [vmem:[%s1321_s29 + $0xa8] sm:$0xff] }
  0x14   : > { %1157 = vmatprep.mubr.msk.f32.mxu1 %vm266_vm0, %v241_v11  ;;  %v229_v18 = vld [vmem:[%s1321_s29 + $0x30] sm:$0xff]  ;;  %v230_v20 = vld [vmem:[%s1321_s29 + $0x38] sm:$0xff]  ;;  %v231_v22 = vld [vmem:[%s1321_s29 + $0x40] sm:$0xff] }
  0x15   : > { %v245_v19 = vld [vmem:[%s1321_s29 + $0xb0] sm:$0xff]  ;;  %v246_v21 = vld [vmem:[%s1321_s29 + $0xb8] sm:$0xff]  ;;  %v247_v23 = vld [vmem:[%s1321_s29 + $0xc0] sm:$0xff] }
  0x16   : > { %1134 = vmatmul.mubr.msk.f32.gmra.mrb[2].mxu0 %vm266_vm0, %v226_v12  ;;  %v232_v24 = vld [vmem:[%s1321_s29 + $0x48] sm:$0xff]  ;;  %v233_v26 = vld [vmem:[%s1321_s29 + $0x50] sm:$0xff]  ;;  %v234_v28 = vld [vmem:[%s1321_s29 + $0x58] sm:$0xff] }
  0x17   : > { %1158 = vmatmul.mubr.msk.f32.gmra.mrb[2].mxu1 %vm266_vm0, %v242_v13  ;;  %1136 = vmatprep.mubr.msk.f32.mxu0 %vm266_vm0, %v227_v14  ;;  %v248_v25 = vld [vmem:[%s1321_s29 + $0xc8] sm:$0xff]  ;;  %v249_v27 = vld [vmem:[%s1321_s29 + $0xd0] sm:$0xff]  ;;  %v250_v29 = vld [vmem:[%s1321_s29 + $0xd8] sm:$0xff] }
  0x18   : > { %1160 = vmatprep.mubr.msk.f32.mxu1 %vm266_vm0, %v243_v15  ;;  %v235_v30 = vld [vmem:[%s1321_s29 + $0x60] sm:$0xff]  ;;  %v236_v32 = vld [vmem:[%s1321_s29 + $0x68] sm:$0xff]  ;;  %v237_v34 = vld [vmem:[%s1321_s29 + $0x70] sm:$0xff] }
  0x19   : > { %v251_v31 = vld [vmem:[%s1321_s29 + $0xe0] sm:$0xff]  ;;  %v252_v33 = vld [vmem:[%s1321_s29 + $0xe8] sm:$0xff]  ;;  %v253_v35 = vld [vmem:[%s1321_s29 + $0xf0] sm:$0xff] }
  0x1a   : > { %1137 = vmatmul.mubr.msk.f32.gmra.mrb[4].mxu0 %vm266_vm0, %v228_v16  ;;  %v238_v36 = vld [vmem:[%s1321_s29 + $0x78] sm:$0xff]  ;;  %v589_v40 = vld [vmem:[%s1391_s6 + $0x8] sm:$0xff]  ;;  %v588_v46 = vld [vmem:[%s1391_s6] sm:$0xff] }
  0x1b   : > { %1161 = vmatmul.mubr.msk.f32.gmra.mrb[4].mxu1 %vm266_vm0, %v244_v17  ;;  %1139 = vmatprep.mubr.msk.f32.mxu0 %vm266_vm0, %v229_v18  ;;  %v254_v37 = vld [vmem:[%s1321_s29 + $0xf8] sm:$0xff]  ;;  %v605_v42 = vld [vmem:[%s1391_s6 + $0x88] sm:$0xff]  ;;  %v604_v48 = vld [vmem:[%s1391_s6 + $0x80] sm:$0xff] }
  0x1c   : > { %1163 = vmatprep.mubr.msk.f32.mxu1 %vm266_vm0, %v245_v19  ;;  %v591_v56 = vld [vmem:[%s1391_s6 + $0x18] sm:$0xff]  ;;  %v590_v0 = vld [vmem:[%s1391_s6 + $0x10] sm:$0xff] }
  0x1d   : > { %v607_v58 = vld [vmem:[%s1391_s6 + $0x98] sm:$0xff]  ;;  %v606_v2 = vld [vmem:[%s1391_s6 + $0x90] sm:$0xff] }
  0x1e   : > { %1140 = vmatmul.mubr.msk.f32.gmra.mrb[6].mxu0 %vm266_vm0, %v230_v20 }
  0x1f   : > { %1164 = vmatmul.mubr.msk.f32.gmra.mrb[6].mxu1 %vm266_vm0, %v246_v21  ;;  %1142 = vmatprep.mubr.msk.f32.mxu0 %vm266_vm0, %v231_v22 }
  0x20   : > { %1166 = vmatprep.mubr.msk.f32.mxu1 %vm266_vm0, %v247_v23 }
  0x22   : > { %1143 = vmatmul.mubr.msk.f32.gmra.mrb[8].mxu0 %vm266_vm0, %v232_v24 }
  0x23   : > { %1167 = vmatmul.mubr.msk.f32.gmra.mrb[8].mxu1 %vm266_vm0, %v248_v25  ;;  %1145 = vmatprep.mubr.msk.f32.mxu0 %vm266_vm0, %v233_v26 }
  0x24   : > { %1169 = vmatprep.mubr.msk.f32.mxu1 %vm266_vm0, %v249_v27 }
  0x26   : > { %1146 = vmatmul.mubr.msk.f32.gmra.mrb[10].mxu0 %vm266_vm0, %v234_v28 }
  0x27   : > { %1170 = vmatmul.mubr.msk.f32.gmra.mrb[10].mxu1 %vm266_vm0, %v250_v29  ;;  %1148 = vmatprep.mubr.msk.f32.mxu0 %vm266_vm0, %v235_v30 }
  0x28   : > { %1172 = vmatprep.mubr.msk.f32.mxu1 %vm266_vm0, %v251_v31 }
  0x2a   : > { %1149 = vmatmul.mubr.msk.f32.gmra.mrb[12].mxu0 %vm266_vm0, %v236_v32 }
  0x2b   : > { %1173 = vmatmul.mubr.msk.f32.gmra.mrb[12].mxu1 %vm266_vm0, %v252_v33  ;;  %1151 = vmatprep.mubr.msk.f32.mxu0 %vm266_vm0, %v237_v34 }
  0x2c   : > { %1175 = vmatprep.mubr.msk.f32.mxu1 %vm266_vm0, %v253_v35  ;;  %v593_v35 = vld [vmem:[%s1391_s6 + $0x28] sm:$0xff] }
  0x2e   : > { %1152 = vmatmul.mubr.msk.f32.gmra.mrb[14].mxu0 %vm266_vm0, %v238_v36  ;;  %v609_v36 = vld [vmem:[%s1391_s6 + $0xa8] sm:$0xff] }
  0x2f   : > { %1176 = vmatmul.mubr.msk.f32.gmra.mrb[14].mxu1 %vm266_vm0, %v254_v37 }
  0xe5   : > { %v1132_v39 = vpop.f32.mrb[0].mxu0 }
  0xe6   : > { %v1156_v41 = vpop.f32.mrb[0].mxu1  ;;  %v435_v43 = vadd.f32 %v1132_v39, %v1396_v38  ;;  %v429_v45 = vpop.f32.mrb[1].mxu0 }
  0xe7   : > { %v515_v44 = vadd.f32 %v1156_v41, %v1396_v38  ;;  %v509_v47 = vpop.f32.mrb[1].mxu1  ;;  %v430_v49 = vadd.f32 %v1396_v38, %v429_v45 }
  0xe8   : > { %v510_v50 = vadd.f32 %v1396_v38, %v509_v47  ;;  %v1406_v51 = vadd.f32 %v589_v40, %v435_v43 }
  0xe9   : > { %v1408_v52 = vadd.f32 %v605_v42, %v515_v44  ;;  %v1410_v53 = vadd.f32 %v588_v46, %v430_v49  ;;  %v1135_v55 = vpop.f32.mrb[2].mxu0 }
  0xea   : > { %v1412_v54 = vadd.f32 %v604_v48, %v510_v50  ;;  %v1159_v57 = vpop.f32.mrb[2].mxu1  ;;  %v653_v59 = vmul.f32 %v1406_v51, %v1406_v51  ;;  %v445_v61 = vadd.f32 %v1135_v55, %v1396_v38  ;;  %v439_v63 = vpop.f32.mrb[3].mxu0 }
  0xeb   : > { %v669_v60 = vmul.f32 %v1408_v52, %v1408_v52  ;;  %v525_v62 = vadd.f32 %v1159_v57, %v1396_v38  ;;  %v519_v1 = vpop.f32.mrb[3].mxu1  ;;  %v652_v3 = vmul.f32 %v1410_v53, %v1410_v53  ;;  %v440_v5 = vadd.f32 %v1396_v38, %v439_v63 }
  0xec   : > { %v668_v4 = vmul.f32 %v1412_v54, %v1412_v54  ;;  %v520_v6 = vadd.f32 %v1396_v38, %v519_v1  ;;  %v685_v7 = vmul.f32 %v653_v59, %v1406_v51  ;;  %v1432_v9 = vadd.f32 %v591_v56, %v445_v61 }
  0xed   : > { %v701_v8 = vmul.f32 %v669_v60, %v1408_v52  ;;  %v1434_v10 = vadd.f32 %v607_v58, %v525_v62  ;;  %v684_v11 = vmul.f32 %v652_v3, %v1410_v53  ;;  %v1438_v13 = vadd.f32 %v590_v0, %v440_v5  ;;  %v1138_v15 = vpop.f32.mrb[4].mxu0 }
  0xee   : > { %v700_v12 = vmul.f32 %v668_v4, %v1412_v54  ;;  %v1440_v14 = vadd.f32 %v606_v2, %v520_v6  ;;  %v1162_v16 = vpop.f32.mrb[4].mxu1  ;;  %v717_v17 = vmul.f32 0.044715, %v685_v7  ;;  %v655_v19 = vmul.f32 %v1432_v9, %v1432_v9  ;;  %v449_v21 = vpop.f32.mrb[5].mxu0  ;;  %v592_v6 = vld [vmem:[%s1391_s6 + $0x20] sm:$0xff] }
  0xef   : > { %v733_v18 = vmul.f32 0.044715, %v701_v8  ;;  %v671_v20 = vmul.f32 %v1434_v10, %v1434_v10  ;;  %v529_v22 = vpop.f32.mrb[5].mxu1  ;;  %v716_v23 = vmul.f32 0.044715, %v684_v11  ;;  %v654_v25 = vmul.f32 %v1438_v13, %v1438_v13 }
  0xf0   : > { %v732_v24 = vmul.f32 0.044715, %v700_v12  ;;  %v670_v26 = vmul.f32 %v1440_v14, %v1440_v14  ;;  %v749_v27 = vadd.f32 %v717_v17, %v1406_v51  ;;  %v687_v29 = vmul.f32 %v655_v19, %v1432_v9  ;;  %v608_v12 = vld [vmem:[%s1391_s6 + $0xa0] sm:$0xff]  ;;  %v611_v19 = vld [vmem:[%s1391_s6 + $0xb8] sm:$0xff] }
  0xf1   : > { %v765_v28 = vadd.f32 %v733_v18, %v1408_v52  ;;  %v703_v30 = vmul.f32 %v671_v20, %v1434_v10  ;;  %v748_v31 = vadd.f32 %v716_v23, %v1410_v53  ;;  %v686_v33 = vmul.f32 %v654_v25, %v1438_v13  ;;  %v1141_v37 = vpop.f32.mrb[6].mxu0  ;;  %v595_v18 = vld [vmem:[%s1391_s6 + $0x38] sm:$0xff] }
  0xf2   : > { %v764_v32 = vadd.f32 %v732_v24, %v1412_v54  ;;  %v702_v34 = vmul.f32 %v670_v26, %v1440_v14  ;;  %v1165_v39 = vpop.f32.mrb[6].mxu1  ;;  %v781_v40 = vmul.f32 0.7978846, %v749_v27  ;;  %v719_v42 = vmul.f32 0.044715, %v687_v29  ;;  %v459_v55 = vpop.f32.mrb[7].mxu0 }
  0xf3   : > { %v797_v41 = vmul.f32 0.7978846, %v765_v28  ;;  %v455_v43 = vadd.f32 %v1138_v15, %v1396_v38  ;;  %v780_v44 = vmul.f32 0.7978846, %v748_v31  ;;  %v735_v46 = vmul.f32 0.044715, %v703_v30 }
  0xf4   : > { %v796_v45 = vmul.f32 0.7978846, %v764_v32  ;;  %v535_v47 = vadd.f32 %v1162_v16, %v1396_v38  ;;  %1198 = vtanh.f32 %v781_v40  ;;  %v751_v48 = vadd.f32 %v719_v42, %v1432_v9  ;;  %v539_v56 = vpop.f32.mrb[7].mxu1  ;;  %v594_v30 = vld [vmem:[%s1391_s6 + $0x30] sm:$0xff] }
  0xf5   : > { %v718_v49 = vmul.f32 0.044715, %v686_v33  ;;  %v734_v50 = vmul.f32 0.044715, %v702_v34  ;;  %1200 = vtanh.f32 %v797_v41  ;;  %v767_v57 = vadd.f32 %v735_v46, %v1434_v10  ;;  %v1468_v60 = vpop.f32.mrb[8].mxu0 }
  0xf6   : > { %v1464_v58 = vadd.f32 %v593_v35, %v455_v43  ;;  %v1466_v59 = vadd.f32 %v609_v36, %v535_v47  ;;  %v1470_v61 = vpop.f32.mrb[8].mxu1  ;;  %1202 = vtanh.f32 %v780_v44  ;;  %v783_v62 = vmul.f32 0.7978846, %v751_v48  ;;  %v1474_v1 = vpop.f32.mrb[9].mxu0 }
  0xf7   : > { %v750_v63 = vadd.f32 %v718_v49, %v1438_v13  ;;  %v766_v0 = vadd.f32 %v734_v50, %v1440_v14  ;;  %v1476_v2 = vpop.f32.mrb[9].mxu1  ;;  %1204 = vtanh.f32 %v796_v45  ;;  %v799_v3 = vmul.f32 0.7978846, %v767_v57 }
  0xf8   : > { %v657_v4 = vmul.f32 %v1464_v58, %v1464_v58  ;;  %v673_v5 = vmul.f32 %v1466_v59, %v1466_v59  ;;  %1206 = vtanh.f32 %v783_v62  ;;  %v450_v11 = vadd.f32 %v1396_v38, %v449_v21 }
  0xf9   : > { %v782_v7 = vmul.f32 0.7978846, %v750_v63  ;;  %v798_v8 = vmul.f32 0.7978846, %v766_v0  ;;  %1208 = vtanh.f32 %v799_v3  ;;  %v530_v17 = vadd.f32 %v1396_v38, %v529_v22  ;;  %v1490_v20 = vpop.f32.mrb[10].mxu0 }
  0xfa   : > { %v689_v15 = vmul.f32 %v657_v4, %v1464_v58  ;;  %v705_v16 = vmul.f32 %v673_v5, %v1466_v59  ;;  %v1492_v23 = vpop.f32.mrb[10].mxu1  ;;  %v1494_v24 = vadd.f32 %v592_v6, %v450_v11  ;;  %v465_v21 = vadd.f32 %v1141_v37, %v1396_v38  ;;  %v1498_v26 = vpop.f32.mrb[11].mxu0 }
  0xfb   : > { %1210 = vtanh.f32 %v782_v7  ;;  %v545_v25 = vadd.f32 %v1165_v39, %v1396_v38  ;;  %v1500_v27 = vpop.f32.mrb[11].mxu1  ;;  %v1502_v29 = vadd.f32 %v608_v12, %v530_v17  ;;  %v460_v34 = vadd.f32 %v1396_v38, %v459_v55 }
  0xfc   : > { %1212 = vtanh.f32 %v798_v8  ;;  %v721_v28 = vmul.f32 0.044715, %v689_v15  ;;  %v737_v22 = vmul.f32 0.044715, %v705_v16  ;;  %v656_v31 = vmul.f32 %v1494_v24, %v1494_v24 }
  0xfd   : > { %v1507_v32 = vadd.f32 %v595_v18, %v465_v21  ;;  %v1509_v33 = vadd.f32 %v611_v19, %v545_v25  ;;  %v672_v37 = vmul.f32 %v1502_v29, %v1502_v29  ;;  %v1517_v39 = vadd.f32 %v1396_v38, %v539_v56  ;;  %v1519_v40 = vpop.f32.mrb[12].mxu0 }
  0xfe   : > { %v753_v35 = vadd.f32 %v721_v28, %v1464_v58  ;;  %v769_v36 = vadd.f32 %v737_v22, %v1466_v59  ;;  %v1521_v41 = vpop.f32.mrb[12].mxu1  ;;  %v1199_v42 = vpop.eup %1198  ;;  %v688_v43 = vmul.f32 %v656_v31, %v1494_v24  ;;  %v1528_v46 = vadd.f32 %v594_v30, %v460_v34 }
  0xff   : > { %v659_v44 = vmul.f32 %v1507_v32, %v1507_v32  ;;  %v675_v45 = vmul.f32 %v1509_v33, %v1509_v33  ;;  %v1530_v47 = vpop.f32.mrb[13].mxu0  ;;  %v1532_v48 = vpop.f32.mrb[13].mxu1  ;;  %v845_v50 = vadd.f32 1.0, %v1199_v42  ;;  %v704_v57 = vmul.f32 %v672_v37, %v1502_v29 }
 0x100   : > { %v1201_v49 = vpop.eup %1200  ;;  %v785_v55 = vmul.f32 0.7978846, %v753_v35  ;;  %v801_v56 = vmul.f32 0.7978846, %v769_v36  ;;  %v720_v0 = vmul.f32 0.044715, %v688_v43 }
 0x101   : > { %v1203_v62 = vpop.eup %1202  ;;  %v861_v63 = vadd.f32 1.0, %v1201_v49  ;;  %v691_v3 = vmul.f32 %v659_v44, %v1507_v32  ;;  %v707_v4 = vmul.f32 %v675_v45, %v1509_v33  ;;  %v877_v6 = vmul.f32 0.5, %v845_v50  ;;  %v1537_v11 = vpop.f32.mrb[14].mxu0 }
 0x102   : > { %v1205_v5 = vpop.eup %1204  ;;  %v844_v7 = vadd.f32 1.0, %v1203_v62  ;;  %1214 = vtanh.f32 %v785_v55  ;;  %v736_v8 = vmul.f32 0.044715, %v704_v57  ;;  %v1539_v12 = vpop.f32.mrb[14].mxu1  ;;  %v752_v18 = vadd.f32 %v720_v0, %v1494_v24 }
 0x103   : > { %v1207_v15 = vpop.eup %1206  ;;  %v893_v16 = vmul.f32 0.5, %v861_v63  ;;  %v860_v17 = vadd.f32 1.0, %v1205_v5  ;;  %1216 = vtanh.f32 %v801_v56  ;;  %v1548_v19 = vpop.f32.mrb[15].mxu0  ;;  %v909_v28 = vmul.f32 %v877_v6, %v1406_v51  ;;  %v610_v56 = vld [vmem:[%s1391_s6 + $0xb0] sm:$0xff]  ;;  %v597_v6 = vld [vmem:[%s1391_s6 + $0x48] sm:$0xff] }
 0x104   : > { %v1550_v21 = vpop.f32.mrb[15].mxu1  ;;  %v1209_v25 = vpop.eup %1208  ;;  %v876_v22 = vmul.f32 0.5, %v844_v7  ;;  %v847_v30 = vadd.f32 1.0, %v1207_v15  ;;  %v768_v31 = vadd.f32 %v736_v8, %v1502_v29  ;;  %v784_v42 = vmul.f32 0.7978846, %v752_v18  ;;  %v613_v8 = vld [vmem:[%s1391_s6 + $0xc8] sm:$0xff] }
 0x105   : > { %v1211_v34 = vpop.eup %1210  ;;  %v925_v35 = vmul.f32 %v893_v16, %v1408_v52  ;;  %v892_v36 = vmul.f32 0.5, %v860_v17  ;;  %v863_v37 = vadd.f32 1.0, %v1209_v25  ;;  %941 = vst.msk [vmem:[%s1545_s11 + $0x8] sm:$0xff] %vm266_vm0, %v909_v28  ;;  %v723_v62 = vmul.f32 0.044715, %v691_v3 }
 0x106   : > { %v1213_v43 = vpop.eup %1212  ;;  %v908_v44 = vmul.f32 %v876_v22, %v1410_v53  ;;  %v879_v45 = vmul.f32 0.5, %v847_v30  ;;  %v846_v51 = vadd.f32 1.0, %v1211_v34  ;;  %v800_v49 = vmul.f32 0.7978846, %v768_v31 }
 0x107   : > { %957 = vst.msk [vmem:[%s1545_s11 + $0x88] sm:$0xff] %vm266_vm0, %v925_v35  ;;  %v924_v50 = vmul.f32 %v892_v36, %v1412_v54  ;;  %v895_v52 = vmul.f32 0.5, %v863_v37  ;;  %v862_v55 = vadd.f32 1.0, %v1213_v43  ;;  %1218 = vtanh.f32 %v784_v42 }
 0x108   : > { %940 = vst.msk [vmem:[%s1545_s11] sm:$0xff] %vm266_vm0, %v908_v44  ;;  %v911_v57 = vmul.f32 %v879_v45, %v1432_v9  ;;  %v878_v53 = vmul.f32 0.5, %v846_v51  ;;  %1220 = vtanh.f32 %v800_v49  ;;  %v739_v54 = vmul.f32 0.044715, %v707_v4 }
 0x109   : > { %956 = vst.msk [vmem:[%s1545_s11 + $0x80] sm:$0xff] %vm266_vm0, %v924_v50  ;;  %v927_v63 = vmul.f32 %v895_v52, %v1434_v10  ;;  %v894_v0 = vmul.f32 0.5, %v862_v55  ;;  %v658_v5 = vmul.f32 %v1528_v46, %v1528_v46  ;;  %v755_v9 = vadd.f32 %v723_v62, %v1507_v32 }
 0x10a   : > { %943 = vst.msk [vmem:[%s1545_s11 + $0x18] sm:$0xff] %vm266_vm0, %v911_v57  ;;  %v910_v7 = vmul.f32 %v878_v53, %v1438_v13  ;;  %v1576_v3 = vadd.f32 %v610_v56, %v1517_v39  ;;  %v475_v10 = vadd.f32 %v1468_v60, %v1396_v38  ;;  %v771_v15 = vadd.f32 %v739_v54, %v1509_v33  ;;  %v612_v57 = vld [vmem:[%s1391_s6 + $0xc0] sm:$0xff] }
 0x10b   : > { %959 = vst.msk [vmem:[%s1545_s11 + $0x98] sm:$0xff] %vm266_vm0, %v927_v63  ;;  %v926_v4 = vmul.f32 %v894_v0, %v1440_v14  ;;  %v690_v16 = vmul.f32 %v658_v5, %v1528_v46  ;;  %v555_v13 = vadd.f32 %v1470_v61, %v1396_v38  ;;  %v787_v39 = vmul.f32 0.7978846, %v755_v9  ;;  %v596_v61 = vld [vmem:[%s1391_s6 + $0x40] sm:$0xff] }
 0x10c   : > { %v1215_v17 = vpop.eup %1214  ;;  %942 = vst.msk [vmem:[%s1545_s11 + $0x10] sm:$0xff] %vm266_vm0, %v910_v7  ;;  %v674_v60 = vmul.f32 %v1576_v3, %v1576_v3  ;;  %v1592_v18 = vadd.f32 %v597_v6, %v475_v10  ;;  %v470_v14 = vadd.f32 %v1396_v38, %v1474_v1  ;;  %v803_v22 = vmul.f32 0.7978846, %v771_v15  ;;  %v599_v10 = vld [vmem:[%s1391_s6 + $0x58] sm:$0xff] }
 0x10d   : > { %v1217_v25 = vpop.eup %1216  ;;  %958 = vst.msk [vmem:[%s1545_s11 + $0x90] sm:$0xff] %vm266_vm0, %v926_v4  ;;  %v849_v28 = vadd.f32 1.0, %v1215_v17  ;;  %v722_v30 = vmul.f32 0.044715, %v690_v16  ;;  %v1598_v31 = vadd.f32 %v613_v8, %v555_v13  ;;  %1222 = vtanh.f32 %v787_v39 }
 0x10e   : > { %v865_v34 = vadd.f32 1.0, %v1217_v25  ;;  %v706_v35 = vmul.f32 %v674_v60, %v1576_v3  ;;  %v661_v36 = vmul.f32 %v1592_v18, %v1592_v18  ;;  %1224 = vtanh.f32 %v803_v22  ;;  %v615_v22 = vld [vmem:[%s1391_s6 + $0xd8] sm:$0xff] }
 0x10f   : > { %v881_v37 = vmul.f32 0.5, %v849_v28  ;;  %v754_v1 = vadd.f32 %v722_v30, %v1528_v46  ;;  %v677_v42 = vmul.f32 %v1598_v31, %v1598_v31  ;;  %v1608_v51 = vadd.f32 %v596_v61, %v470_v14  ;;  %v598_v30 = vld [vmem:[%s1391_s6 + $0x50] sm:$0xff] }
 0x110   : > { %v897_v43 = vmul.f32 0.5, %v865_v34  ;;  %v738_v44 = vmul.f32 0.044715, %v706_v35  ;;  %v693_v45 = vmul.f32 %v661_v36, %v1592_v18  ;;  %v550_v56 = vadd.f32 %v1396_v38, %v1476_v2 }
 0x111   : > { %v1219_v49 = vpop.eup %1218  ;;  %v913_v50 = vmul.f32 %v881_v37, %v1464_v58  ;;  %v786_v52 = vmul.f32 0.7978846, %v754_v1  ;;  %v709_v55 = vmul.f32 %v677_v42, %v1598_v31  ;;  %v660_v6 = vmul.f32 %v1608_v51, %v1608_v51 }
 0x112   : > { %v1221_v53 = vpop.eup %1220  ;;  %v929_v62 = vmul.f32 %v897_v43, %v1466_v59  ;;  %v848_v63 = vadd.f32 1.0, %v1219_v49  ;;  %v770_v0 = vadd.f32 %v738_v44, %v1576_v3  ;;  %v725_v54 = vmul.f32 0.044715, %v693_v45 }
 0x113   : > { %945 = vst.msk [vmem:[%s1545_s11 + $0x28] sm:$0xff] %vm266_vm0, %v913_v50  ;;  %v864_v5 = vadd.f32 1.0, %v1221_v53  ;;  %1226 = vtanh.f32 %v786_v52  ;;  %v741_v58 = vmul.f32 0.044715, %v709_v55  ;;  %v1624_v59 = vadd.f32 %v612_v57, %v550_v56 }
 0x114   : > { %961 = vst.msk [vmem:[%s1545_s11 + $0xa8] sm:$0xff] %vm266_vm0, %v929_v62  ;;  %v880_v2 = vmul.f32 0.5, %v848_v63  ;;  %v802_v7 = vmul.f32 0.7978846, %v770_v0  ;;  %v757_v9 = vadd.f32 %v725_v54, %v1592_v18  ;;  %v692_v15 = vmul.f32 %v660_v6, %v1608_v51 }
 0x115   : > { %v896_v8 = vmul.f32 0.5, %v864_v5  ;;  %v773_v4 = vadd.f32 %v741_v58, %v1598_v31  ;;  %v485_v16 = vadd.f32 %v1490_v20, %v1396_v38  ;;  %v676_v39 = vmul.f32 %v1624_v59, %v1624_v59 }
 0x116   : > { %v912_v13 = vmul.f32 %v880_v2, %v1494_v24  ;;  %1228 = vtanh.f32 %v802_v7  ;;  %v789_v17 = vmul.f32 0.7978846, %v757_v9  ;;  %v724_v25 = vmul.f32 0.044715, %v692_v15  ;;  %v601_v9 = vld [vmem:[%s1391_s6 + $0x68] sm:$0xff] }
 0x117   : > { %v928_v60 = vmul.f32 %v896_v8, %v1502_v29  ;;  %v805_v14 = vmul.f32 0.7978846, %v773_v4  ;;  %v1635_v28 = vadd.f32 %v599_v10, %v485_v16  ;;  %v1223_v61 = vpop.eup %1222  ;;  %v708_v20 = vmul.f32 %v676_v39, %v1624_v59  ;;  %v617_v10 = vld [vmem:[%s1391_s6 + $0xe8] sm:$0xff] }
 0x118   : > { %944 = vst.msk [vmem:[%s1545_s11 + $0x20] sm:$0xff] %vm266_vm0, %v912_v13  ;;  %1230 = vtanh.f32 %v789_v17  ;;  %v565_v24 = vadd.f32 %v1492_v23, %v1396_v38  ;;  %v480_v34 = vadd.f32 %v1396_v38, %v1498_v26  ;;  %v1225_v29 = vpop.eup %1224  ;;  %v851_v35 = vadd.f32 1.0, %v1223_v61  ;;  %v614_v23 = vld [vmem:[%s1391_s6 + $0xd0] sm:$0xff] }
 0x119   : > { %960 = vst.msk [vmem:[%s1545_s11 + $0xa0] sm:$0xff] %vm266_vm0, %v928_v60  ;;  %1232 = vtanh.f32 %v805_v14  ;;  %v756_v36 = vadd.f32 %v724_v25, %v1608_v51  ;;  %v663_v37 = vmul.f32 %v1635_v28, %v1635_v28  ;;  %v867_v1 = vadd.f32 1.0, %v1225_v29 }
 0x11a   : > { %v740_v42 = vmul.f32 0.044715, %v708_v20  ;;  %v1651_v43 = vadd.f32 %v615_v22, %v565_v24  ;;  %v1653_v44 = vadd.f32 %v598_v30, %v480_v34  ;;  %v883_v45 = vmul.f32 0.5, %v851_v35 }
 0x11b   : > { %v788_v49 = vmul.f32 0.7978846, %v756_v36  ;;  %v695_v26 = vmul.f32 %v663_v37, %v1635_v28  ;;  %v560_v50 = vadd.f32 %v1396_v38, %v1500_v27  ;;  %v899_v52 = vmul.f32 0.5, %v867_v1 }
 0x11c   : > { %v772_v55 = vadd.f32 %v740_v42, %v1624_v59  ;;  %v679_v56 = vmul.f32 %v1651_v43, %v1651_v43  ;;  %v662_v57 = vmul.f32 %v1653_v44, %v1653_v44  ;;  %v915_v62 = vmul.f32 %v883_v45, %v1507_v32 }
 0x11d   : > { %v1227_v53 = vpop.eup %1226  ;;  %1234 = vtanh.f32 %v788_v49  ;;  %v727_v63 = vmul.f32 0.044715, %v695_v26  ;;  %v1665_v0 = vadd.f32 %v614_v23, %v560_v50  ;;  %v931_v27 = vmul.f32 %v899_v52, %v1509_v33  ;;  %v600_v49 = vld [vmem:[%s1391_s6 + $0x60] sm:$0xff] }
 0x11e   : > { %v850_v54 = vadd.f32 1.0, %v1227_v53  ;;  %v804_v5 = vmul.f32 0.7978846, %v772_v55  ;;  %v711_v58 = vmul.f32 %v679_v56, %v1651_v43  ;;  %947 = vst.msk [vmem:[%s1545_s11 + $0x38] sm:$0xff] %vm266_vm0, %v915_v62  ;;  %v694_v2 = vmul.f32 %v662_v57, %v1653_v44  ;;  %v616_v62 = vld [vmem:[%s1391_s6 + $0xe0] sm:$0xff] }
 0x11f   : > { %v759_v6 = vadd.f32 %v727_v63, %v1635_v28  ;;  %v678_v32 = vmul.f32 %v1665_v0, %v1665_v0  ;;  %v495_v7 = vadd.f32 %v1519_v40, %v1396_v38  ;;  %963 = vst.msk [vmem:[%s1545_s11 + $0xb8] sm:$0xff] %vm266_vm0, %v931_v27  ;;  %v575_v15 = vadd.f32 %v1521_v41, %v1396_v38 }
 0x120   : > { %v1229_v8 = vpop.eup %1228  ;;  %v882_v33 = vmul.f32 0.5, %v850_v54  ;;  %1236 = vtanh.f32 %v804_v5  ;;  %v743_v4 = vmul.f32 0.044715, %v711_v58  ;;  %v726_v17 = vmul.f32 0.044715, %v694_v2  ;;  %v603_v5 = vld [vmem:[%s1391_s6 + $0x78] sm:$0xff] }
 0x121   : > { %v866_v16 = vadd.f32 1.0, %v1229_v8  ;;  %v791_v13 = vmul.f32 0.7978846, %v759_v6  ;;  %v710_v39 = vmul.f32 %v678_v32, %v1665_v0  ;;  %v1686_v25 = vadd.f32 %v601_v9, %v495_v7  ;;  %v619_v58 = vld [vmem:[%s1391_s6 + $0xf8] sm:$0xff] }
 0x122   : > { %v1231_v60 = vpop.eup %1230  ;;  %v914_v40 = vmul.f32 %v882_v33, %v1528_v46  ;;  %v775_v14 = vadd.f32 %v743_v4, %v1651_v43  ;;  %v1688_v22 = vadd.f32 %v617_v10, %v575_v15  ;;  %v758_v41 = vadd.f32 %v726_v17, %v1653_v44 }
 0x123   : > { %v1233_v30 = vpop.eup %1232  ;;  %v898_v61 = vmul.f32 0.5, %v866_v16  ;;  %v853_v20 = vadd.f32 1.0, %v1231_v60  ;;  %1238 = vtanh.f32 %v791_v13  ;;  %v742_v29 = vmul.f32 0.044715, %v710_v39 }
 0x124   : > { %946 = vst.msk [vmem:[%s1545_s11 + $0x30] sm:$0xff] %vm266_vm0, %v914_v40  ;;  %v869_v24 = vadd.f32 1.0, %v1233_v30  ;;  %v807_v34 = vmul.f32 0.7978846, %v775_v14  ;;  %v665_v46 = vmul.f32 %v1686_v25, %v1686_v25  ;;  %v790_v37 = vmul.f32 0.7978846, %v758_v41 }
 0x125   : > { %v930_v35 = vmul.f32 %v898_v61, %v1576_v3  ;;  %v885_v36 = vmul.f32 0.5, %v853_v20  ;;  %v681_v1 = vmul.f32 %v1688_v22, %v1688_v22  ;;  %v774_v23 = vadd.f32 %v742_v29, %v1665_v0 }
 0x126   : > { %v901_v42 = vmul.f32 0.5, %v869_v24  ;;  %1240 = vtanh.f32 %v807_v34  ;;  %v697_v45 = vmul.f32 %v665_v46, %v1686_v25  ;;  %v490_v52 = vadd.f32 %v1396_v38, %v1530_v47  ;;  %v602_v34 = vld [vmem:[%s1391_s6 + $0x70] sm:$0xff] }
 0x127   : > { %v1235_v26 = vpop.eup %1234  ;;  %962 = vst.msk [vmem:[%s1545_s11 + $0xb0] sm:$0xff] %vm266_vm0, %v930_v35  ;;  %v917_v3 = vmul.f32 %v885_v36, %v1592_v18  ;;  %1242 = vtanh.f32 %v790_v37  ;;  %v713_v50 = vmul.f32 %v681_v1, %v1688_v22  ;;  %v806_v57 = vmul.f32 0.7978846, %v774_v23  ;;  %v618_v37 = vld [vmem:[%s1391_s6 + $0xf0] sm:$0xff] }
 0x128   : > { %v933_v55 = vmul.f32 %v901_v42, %v1598_v31  ;;  %v852_v56 = vadd.f32 1.0, %v1235_v26  ;;  %v729_v53 = vmul.f32 0.044715, %v697_v45  ;;  %v1711_v27 = vadd.f32 %v600_v49, %v490_v52 }
 0x129   : > { %949 = vst.msk [vmem:[%s1545_s11 + $0x48] sm:$0xff] %vm266_vm0, %v917_v3  ;;  %v745_v63 = vmul.f32 0.044715, %v713_v50  ;;  %v570_v18 = vadd.f32 %v1396_v38, %v1532_v48  ;;  %v505_v54 = vadd.f32 %v1537_v11, %v1396_v38  ;;  %1244 = vtanh.f32 %v806_v57 }
 0x12a   : > { %v1237_v47 = vpop.eup %1236  ;;  %965 = vst.msk [vmem:[%s1545_s11 + $0xc8] sm:$0xff] %vm266_vm0, %v933_v55  ;;  %v884_v31 = vmul.f32 0.5, %v852_v56  ;;  %v761_v6 = vadd.f32 %v729_v53, %v1686_v25  ;;  %v585_v2 = vadd.f32 %v1539_v12, %v1396_v38  ;;  %v664_v48 = vmul.f32 %v1711_v27, %v1711_v27 }
 0x12b   : > { %v868_v32 = vadd.f32 1.0, %v1237_v47  ;;  %v777_v7 = vadd.f32 %v745_v63, %v1688_v22  ;;  %v1727_v11 = vadd.f32 %v616_v62, %v570_v18  ;;  %v1730_v8 = vadd.f32 %v603_v5, %v505_v54 }
 0x12c   : > { %v916_v9 = vmul.f32 %v884_v31, %v1608_v51  ;;  %v793_v10 = vmul.f32 0.7978846, %v761_v6  ;;  %v1732_v33 = vadd.f32 %v619_v58, %v585_v2  ;;  %v696_v12 = vmul.f32 %v664_v48, %v1711_v27 }
 0x12d   : > { %v1239_v4 = vpop.eup %1238  ;;  %v900_v15 = vmul.f32 0.5, %v868_v32  ;;  %v809_v16 = vmul.f32 0.7978846, %v777_v7  ;;  %v680_v13 = vmul.f32 %v1727_v11, %v1727_v11  ;;  %v667_v51 = vmul.f32 %v1730_v8, %v1730_v8 }
 0x12e   : > { %948 = vst.msk [vmem:[%s1545_s11 + $0x40] sm:$0xff] %vm266_vm0, %v916_v9  ;;  %v855_v17 = vadd.f32 1.0, %v1239_v4  ;;  %1246 = vtanh.f32 %v793_v10  ;;  %v683_v39 = vmul.f32 %v1732_v33, %v1732_v33  ;;  %v728_v40 = vmul.f32 0.044715, %v696_v12 }
 0x12f   : > { %v932_v60 = vmul.f32 %v900_v15, %v1624_v59  ;;  %1248 = vtanh.f32 %v809_v16  ;;  %v712_v14 = vmul.f32 %v680_v13, %v1727_v11  ;;  %v699_v20 = vmul.f32 %v667_v51, %v1730_v8 }
 0x130   : > { %v1241_v30 = vpop.eup %1240  ;;  %v887_v61 = vmul.f32 0.5, %v855_v17  ;;  %v715_v41 = vmul.f32 %v683_v39, %v1732_v33  ;;  %v500_v24 = vadd.f32 %v1396_v38, %v1548_v19  ;;  %v760_v46 = vadd.f32 %v728_v40, %v1711_v27 }
 0x131   : > { %v1243_v29 = vpop.eup %1242  ;;  %964 = vst.msk [vmem:[%s1545_s11 + $0xc0] sm:$0xff] %vm266_vm0, %v932_v60  ;;  %v871_v59 = vadd.f32 1.0, %v1241_v30  ;;  %v744_v35 = vmul.f32 0.044715, %v712_v14  ;;  %v580_v36 = vadd.f32 %v1396_v38, %v1550_v21  ;;  %v731_v23 = vmul.f32 0.044715, %v699_v20 }
 0x132   : > { %v919_v1 = vmul.f32 %v887_v61, %v1635_v28  ;;  %v854_v42 = vadd.f32 1.0, %v1243_v29  ;;  %v747_v45 = vmul.f32 0.044715, %v715_v41  ;;  %v792_v19 = vmul.f32 0.7978846, %v760_v46 }
 0x133   : > { %v903_v49 = vmul.f32 0.5, %v871_v59  ;;  %v776_v26 = vadd.f32 %v744_v35, %v1727_v11  ;;  %v1758_v3 = vadd.f32 %v602_v34, %v500_v24  ;;  %v1245_v50 = vpop.eup %1244  ;;  %v763_v55 = vadd.f32 %v731_v23, %v1730_v8 }
 0x134   : > { %951 = vst.msk [vmem:[%s1545_s11 + $0x58] sm:$0xff] %vm266_vm0, %v919_v1  ;;  %v886_v52 = vmul.f32 0.5, %v854_v42  ;;  %v779_v38 = vadd.f32 %v747_v45, %v1732_v33  ;;  %v1764_v21 = vadd.f32 %v618_v37, %v580_v36  ;;  %v870_v56 = vadd.f32 1.0, %v1245_v50 }
 0x135   : > { %v935_v28 = vmul.f32 %v903_v49, %v1651_v43  ;;  %1250 = vtanh.f32 %v792_v19  ;;  %v808_v57 = vmul.f32 0.7978846, %v776_v26  ;;  %v795_v62 = vmul.f32 0.7978846, %v763_v55 }
 0x136   : > { %v918_v53 = vmul.f32 %v886_v52, %v1653_v44  ;;  %v811_v63 = vmul.f32 0.7978846, %v779_v38  ;;  %v666_v18 = vmul.f32 %v1758_v3, %v1758_v3  ;;  %v902_v54 = vmul.f32 0.5, %v870_v56 }
 0x137   : > { %967 = vst.msk [vmem:[%s1545_s11 + $0xd8] sm:$0xff] %vm266_vm0, %v935_v28  ;;  %1252 = vtanh.f32 %v808_v57  ;;  %v682_v5 = vmul.f32 %v1764_v21, %v1764_v21 }
 0x138   : > { %v1247_v58 = vpop.eup %1246  ;;  %950 = vst.msk [vmem:[%s1545_s11 + $0x50] sm:$0xff] %vm266_vm0, %v918_v53  ;;  %1254 = vtanh.f32 %v795_v62  ;;  %v698_v43 = vmul.f32 %v666_v18, %v1758_v3  ;;  %v934_v47 = vmul.f32 %v902_v54, %v1665_v0 }
 0x139   : > { %v1249_v44 = vpop.eup %1248  ;;  %v857_v31 = vadd.f32 1.0, %v1247_v58  ;;  %1256 = vtanh.f32 %v811_v63  ;;  %v714_v6 = vmul.f32 %v682_v5, %v1764_v21 }
 0x13a   : > { %v873_v2 = vadd.f32 1.0, %v1249_v44  ;;  %v730_v32 = vmul.f32 0.044715, %v698_v43  ;;  %966 = vst.msk [vmem:[%s1545_s11 + $0xd0] sm:$0xff] %vm266_vm0, %v934_v47 }
 0x13b   : > { %v889_v7 = vmul.f32 0.5, %v857_v31  ;;  %v746_v48 = vmul.f32 0.044715, %v714_v6 }
 0x13c   : > { %v905_v9 = vmul.f32 0.5, %v873_v2  ;;  %v762_v10 = vadd.f32 %v730_v32, %v1758_v3 }
 0x13d   : > { %v921_v4 = vmul.f32 %v889_v7, %v1686_v25  ;;  %v778_v15 = vadd.f32 %v746_v48, %v1764_v21 }
 0x13e   : > { %v937_v0 = vmul.f32 %v905_v9, %v1688_v22  ;;  %v794_v16 = vmul.f32 0.7978846, %v762_v10 }
 0x13f   : > { %v1251_v12 = vpop.eup %1250  ;;  %953 = vst.msk [vmem:[%s1545_s11 + $0x68] sm:$0xff] %vm266_vm0, %v921_v4  ;;  %v810_v13 = vmul.f32 0.7978846, %v778_v15 }
 0x140   : > { %969 = vst.msk [vmem:[%s1545_s11 + $0xe8] sm:$0xff] %vm266_vm0, %v937_v0  ;;  %v856_v17 = vadd.f32 1.0, %v1251_v12  ;;  %1258 = vtanh.f32 %v794_v16 }
 0x141   : > { %v1253_v51 = vpop.eup %1252  ;;  %1260 = vtanh.f32 %v810_v13 }
 0x142   : > { %v1255_v39 = vpop.eup %1254  ;;  %v888_v25 = vmul.f32 0.5, %v856_v17  ;;  %v872_v60 = vadd.f32 1.0, %v1253_v51 }
 0x143   : > { %v1257_v40 = vpop.eup %1256  ;;  %v859_v22 = vadd.f32 1.0, %v1255_v39 }
 0x144   : > { %v920_v14 = vmul.f32 %v888_v25, %v1711_v27  ;;  %v904_v30 = vmul.f32 0.5, %v872_v60  ;;  %v875_v61 = vadd.f32 1.0, %v1257_v40 }
 0x145   : > { %v891_v20 = vmul.f32 0.5, %v859_v22 }
 0x146   : > { %952 = vst.msk [vmem:[%s1545_s11 + $0x60] sm:$0xff] %vm266_vm0, %v920_v14  ;;  %v936_v41 = vmul.f32 %v904_v30, %v1727_v11  ;;  %v907_v24 = vmul.f32 0.5, %v875_v61 }
 0x147   : > { %v923_v34 = vmul.f32 %v891_v20, %v1730_v8 }
 0x148   : > { %968 = vst.msk [vmem:[%s1545_s11 + $0xe0] sm:$0xff] %vm266_vm0, %v936_v41  ;;  %v939_v29 = vmul.f32 %v907_v24, %v1732_v33 }
 0x149   : > { %955 = vst.msk [vmem:[%s1545_s11 + $0x78] sm:$0xff] %vm266_vm0, %v923_v34 }
 0x14a   : > { %v1259_v59 = vpop.eup %1258  ;;  %971 = vst.msk [vmem:[%s1545_s11 + $0xf8] sm:$0xff] %vm266_vm0, %v939_v29 }
 0x14b   : > { %v1261_v27 = vpop.eup %1260  ;;  %v858_v46 = vadd.f32 1.0, %v1259_v59 }
 0x14c   : > { %v874_v35 = vadd.f32 1.0, %v1261_v27 }
 0x14d   : > { %v890_v36 = vmul.f32 0.5, %v858_v46 }
 0x14e   : > { %v906_v37 = vmul.f32 0.5, %v874_v35 }
 0x14f   : > { %v922_v11 = vmul.f32 %v890_v36, %v1758_v3 }
 0x150   : > { %v938_v1 = vmul.f32 %v906_v37, %v1764_v21 }
 0x151   : > { %954 = vst.msk [vmem:[%s1545_s11 + $0x70] sm:$0xff] %vm266_vm0, %v922_v11 }
 0x152   : > { %970 = vst.msk [vmem:[%s1545_s11 + $0xf0] sm:$0xff] %vm266_vm0, %v938_v1 }
 0x153 PF: > { %s14_s15 = sadd.s32 1, %s1268_s15  }
 0x154   : > { %p11_p4 = scmp.ge.s32.totalorder %s14_s15, 4  }
 0x156   :  { %13 = sbr.rel (!%p11_p4) target bundleno = 1 (0x1), region = 69 }

// kernel: fno_forward.11
= control target key start
LH: loop header
LB: loop body
LE: loop exit
PB: predicated region body
PF: predicated region fallthrough
CT: control target
= control target key end

     0   :  { %s1727_s20 = smov 0   ;;  %s2276_s0 = inlined_call_operand.vmem [shape: f32[512,32], index: 0, kind: input, shape index: {}]   ;;  %s2277_s1 = inlined_call_operand.vmem [shape: f32[32,64], index: 1, kind: input, shape index: {}]   ;;  %s2278_s2 = inlined_call_operand.vmem [shape: f32[1,64], index: 2, kind: input, shape index: {}]   ;;  %s2279_s3 = inlined_call_operand.vmem [shape: f32[64,1], index: 3, kind: input, shape index: {}]   ;;  %s2280_s4 = inlined_call_operand.<no memory space> [shape: f32[1,1], index: 4, kind: input, shape index: {}]   ;;  %s2281_s5 = inlined_call_operand.vmem [shape: f32[512,1], index: 5, kind: output, shape index: {}]  }
   0x1   :  { %v10_v0 = vstv %s2280_s4 }
   0x2   :  { %11 = vst [vmem:[#allocation2] sm:$0x1] %v10_v0 }
   0x3 LB: > { %s1309_s21 = sadd.s32 4294967295, %s1692_s20   ;;  %p1313_p0 = scmp.ge.s32.totalorder %s1692_s20, 1  ;;  %s1692_s20 = sphi %s1727_s20, %s17_s20  }
   0x4   : > { %p190_p1 = scmp.lt.s32.totalorder %s1692_s20, 3 }
   0x6   : > { %p191_p2 = pnand %p1313_p0, %p190_p1 }
   0x7   : > { %v262_v1 = vld [vmem:[%s2277_s1] sm:$0xff] (!%p191_p2)  ;;  %v263_v2 = vld [vmem:[%s2277_s1 + $0x8] sm:$0xff] (!%p191_p2)  ;;  %v264_v3 = vld [vmem:[%s2277_s1 + $0x10] sm:$0xff] (!%p191_p2)  ;;  %s1314_s27 = sshll.u32 (!%p191_p2), %s1309_s21, 5  ;;  %vm273_vm0 = vcmask (!%p191_p2), 261120   ;;  %vm898_vm1 = vcmask (!%p191_p2), 523264  }
   0x8   : > { %194 = sbr.rel (%p191_p2) target bundleno = 554 (0x22a), region = 40  ;;  %v1582_v4 = vpack.c.bf16 (!%p191_p2), %v263_v2, %v262_v1  ;;  %v265_v5 = vld [vmem:[%s2277_s1 + $0x18] sm:$0xff] (!%p191_p2)  ;;  %p219_p3 = scmp.lt.s32.totalorder (!%p191_p2), %s1314_s27, 63  ;;  %v883_v39 = vld [vmem:[%s2279_s3] sm:$0xff] (!%p191_p2)  ;;  %v884_v40 = vld [vmem:[%s2279_s3 + $0x8] sm:$0xff] (!%p191_p2)  ;;  %vm1220_vm2 = vcmask (!%p191_p2), 7168  }
   0x9   : > { %v1586_v6 = vpack.c.bf16 (!%p191_p2), %v265_v5, %v264_v3  ;;  %v1590_v41 = vpack.c.bf16 (!%p191_p2), %v884_v40, %v883_v39  ;;  %v885_v42 = vld [vmem:[%s2279_s3 + $0x10] sm:$0xff] (!%p191_p2)  ;;  %v886_v43 = vld [vmem:[%s2279_s3 + $0x18] sm:$0xff] (!%p191_p2)  ;;  %v887_v45 = vld [vmem:[%s2279_s3 + $0x20] sm:$0xff] (!%p191_p2) }
   0xa   : > { %1583 = vmatprep.subr.bf16.mxu0 (!%p191_p2), %v1582_v4  ;;  %v1594_v44 = vpack.c.bf16 (!%p191_p2), %v886_v43, %v885_v42  ;;  %v888_v46 = vld [vmem:[%s2279_s3 + $0x28] sm:$0xff] (!%p191_p2)  ;;  %v889_v48 = vld [vmem:[%s2279_s3 + $0x30] sm:$0xff] (!%p191_p2)  ;;  %v890_v49 = vld [vmem:[%s2279_s3 + $0x38] sm:$0xff] (!%p191_p2) }
   0xb   : > { %1585 = vmatpush3.bf16.msra.mxu0 (!%p191_p2), %v1582_v4  ;;  %1606 = vmatprep.subr.bf16.mxu1 (!%p191_p2), %v1590_v41  ;;  %v1598_v47 = vpack.c.bf16 (!%p191_p2), %v888_v46, %v887_v45  ;;  %v1602_v50 = vpack.c.bf16 (!%p191_p2), %v890_v49, %v889_v48  ;;  %v1848_v51 = vld [vmem:[%s2278_s2] ss:$0 sm:$0xff] (!%p191_p2) }
   0xc   : > { %1587 = vmatprep.subr.bf16.mxu0 (!%p191_p2), %v1586_v6  ;;  %1610 = vmatpush3.bf16.msra.mxu1 (!%p191_p2), %v1590_v41 }
   0xd   : > { %1607 = vmatprep.subr.bf16.mxu1 (!%p191_p2), %v1594_v44 }
   0xf   : > { %s2283_s27 = smov (!%p219_p3, %s1314_s27), 63  ;;  %1589 = vmatpush3.bf16.msra.mxu0 %v1586_v6 }
  0x10   : > { %s1315_s30 = sshll.u32 %s2283_s27, 3  ;;  %1591 = vmatprep.subr.bf16.mxu0 %v1590_v41  ;;  %1611 = vmatpush3.bf16.msra.mxu1 %v1594_v44 }
  0x11   : > { %s1755_s8 = scalar_lea.vmem %s2276_s0, %s1315_s30  ;;  %1608 = vmatprep.subr.bf16.mxu1 %v1598_v47  ;;  %s2175_s6 = scalar_lea.vmem %s2281_s5, %s1315_s30 }
  0x12   : > { %v230_v7 = vld [vmem:[%s1755_s8] sm:$0xff]  ;;  %v231_v8 = vld [vmem:[%s1755_s8 + $0x8] sm:$0xff]  ;;  %v232_v9 = vld [vmem:[%s1755_s8 + $0x10] sm:$0xff] }
  0x13   : > { %1470 = vmatprep.mubr.msk.f32.mxu0 %vm273_vm0, %v230_v7  ;;  %v233_v10 = vld [vmem:[%s1755_s8 + $0x18] sm:$0xff]  ;;  %v234_v11 = vld [vmem:[%s1755_s8 + $0x20] sm:$0xff]  ;;  %v235_v12 = vld [vmem:[%s1755_s8 + $0x28] sm:$0xff] }
  0x14   : > { %1471 = vmatmul.mubr.msk.f32.vlgmr.msra.gmra.mrb[0].mxu0 %vm273_vm0, %v231_v8  ;;  %v236_v13 = vld [vmem:[%s1755_s8 + $0x30] sm:$0xff]  ;;  %v237_v14 = vld [vmem:[%s1755_s8 + $0x38] sm:$0xff]  ;;  %v238_v15 = vld [vmem:[%s1755_s8 + $0x40] sm:$0xff]  ;;  %1612 = vmatpush3.bf16.msra.mxu1 %v1598_v47 }
  0x15   : > { %1473 = vmatprep.mubr.msk.f32.mxu0 %vm273_vm0, %v232_v9  ;;  %v239_v16 = vld [vmem:[%s1755_s8 + $0x48] sm:$0xff]  ;;  %v240_v17 = vld [vmem:[%s1755_s8 + $0x50] sm:$0xff]  ;;  %v241_v18 = vld [vmem:[%s1755_s8 + $0x58] sm:$0xff]  ;;  %1593 = vmatpush3.bf16.msra.mxu0 %v1590_v41 }
  0x16   : > { %v242_v19 = vld [vmem:[%s1755_s8 + $0x60] sm:$0xff]  ;;  %v243_v20 = vld [vmem:[%s1755_s8 + $0x68] sm:$0xff]  ;;  %v244_v21 = vld [vmem:[%s1755_s8 + $0x70] sm:$0xff]  ;;  %1595 = vmatprep.subr.bf16.mxu0 %v1594_v44  ;;  %1609 = vmatprep.subr.bf16.mxu1 %v1602_v50 }
  0x17   : > { %v245_v22 = vld [vmem:[%s1755_s8 + $0x78] sm:$0xff]  ;;  %v246_v23 = vld [vmem:[%s1755_s8 + $0x80] sm:$0xff]  ;;  %v247_v24 = vld [vmem:[%s1755_s8 + $0x88] sm:$0xff] }
  0x18   : > { %1474 = vmatmul.mubr.msk.f32.gmra.mrb[2].mxu0 %vm273_vm0, %v233_v10  ;;  %v248_v25 = vld [vmem:[%s1755_s8 + $0x90] sm:$0xff]  ;;  %v249_v26 = vld [vmem:[%s1755_s8 + $0x98] sm:$0xff]  ;;  %v250_v27 = vld [vmem:[%s1755_s8 + $0xa0] sm:$0xff]  ;;  %1613 = vmatpush3.bf16.msra.mxu1 %v1602_v50 }
  0x19   : > { %1476 = vmatprep.mubr.msk.f32.mxu0 %vm273_vm0, %v234_v11  ;;  %v251_v28 = vld [vmem:[%s1755_s8 + $0xa8] sm:$0xff]  ;;  %v252_v29 = vld [vmem:[%s1755_s8 + $0xb0] sm:$0xff]  ;;  %v253_v30 = vld [vmem:[%s1755_s8 + $0xb8] sm:$0xff]  ;;  %1597 = vmatpush3.bf16.msra.mxu0 %v1594_v44 }
  0x1a   : > { %v254_v31 = vld [vmem:[%s1755_s8 + $0xc0] sm:$0xff]  ;;  %v255_v32 = vld [vmem:[%s1755_s8 + $0xc8] sm:$0xff]  ;;  %v256_v33 = vld [vmem:[%s1755_s8 + $0xd0] sm:$0xff]  ;;  %1599 = vmatprep.subr.bf16.mxu0 %v1598_v47 }
  0x1b   : > { %v257_v34 = vld [vmem:[%s1755_s8 + $0xd8] sm:$0xff]  ;;  %v258_v35 = vld [vmem:[%s1755_s8 + $0xe0] sm:$0xff]  ;;  %v259_v36 = vld [vmem:[%s1755_s8 + $0xe8] sm:$0xff] }
  0x1c   : > { %1477 = vmatmul.mubr.msk.f32.gmra.mrb[4].mxu0 %vm273_vm0, %v235_v12  ;;  %v260_v37 = vld [vmem:[%s1755_s8 + $0xf0] sm:$0xff]  ;;  %v261_v38 = vld [vmem:[%s1755_s8 + $0xf8] sm:$0xff] }
  0x1d   : > { %1479 = vmatprep.mubr.msk.f32.mxu0 %vm273_vm0, %v236_v13  ;;  %1601 = vmatpush3.bf16.msra.mxu0 %v1598_v47 }
  0x1e   : > { %1603 = vmatprep.subr.bf16.mxu0 %v1602_v50 }
  0x20   : > { %1480 = vmatmul.mubr.msk.f32.gmra.mrb[6].mxu0 %vm273_vm0, %v237_v14 }
  0x21   : > { %1482 = vmatprep.mubr.msk.f32.mxu0 %vm273_vm0, %v238_v15  ;;  %1605 = vmatpush3.bf16.msra.mxu0 %v1602_v50 }
  0x24   : > { %1483 = vmatmul.mubr.msk.f32.gmra.mrb[8].mxu0 %vm273_vm0, %v239_v16 }
  0x25   : > { %1485 = vmatprep.mubr.msk.f32.mxu0 %vm273_vm0, %v240_v17 }
  0x28   : > { %1486 = vmatmul.mubr.msk.f32.gmra.mrb[10].mxu0 %vm273_vm0, %v241_v18 }
  0x29   : > { %1488 = vmatprep.mubr.msk.f32.mxu0 %vm273_vm0, %v242_v19 }
  0x2c   : > { %1489 = vmatmul.mubr.msk.f32.gmra.mrb[12].mxu0 %vm273_vm0, %v243_v20 }
  0x2d   : > { %1491 = vmatprep.mubr.msk.f32.mxu0 %vm273_vm0, %v244_v21 }
  0x30   : > { %1492 = vmatmul.mubr.msk.f32.gmra.mrb[14].mxu0 %vm273_vm0, %v245_v22 }
  0x31   : > { %1494 = vmatprep.mubr.msk.f32.mxu0 %vm273_vm0, %v246_v23 }
  0x34   : > { %1495 = vmatmul.mubr.msk.f32.gmra.mrb[16].mxu0 %vm273_vm0, %v247_v24 }
  0x35   : > { %1497 = vmatprep.mubr.msk.f32.mxu0 %vm273_vm0, %v248_v25 }
  0x38   : > { %1498 = vmatmul.mubr.msk.f32.gmra.mrb[18].mxu0 %vm273_vm0, %v249_v26 }
  0x39   : > { %1500 = vmatprep.mubr.msk.f32.mxu0 %vm273_vm0, %v250_v27 }
  0x3c   : > { %1501 = vmatmul.mubr.msk.f32.gmra.mrb[20].mxu0 %vm273_vm0, %v251_v28 }
  0x3d   : > { %1503 = vmatprep.mubr.msk.f32.mxu0 %vm273_vm0, %v252_v29 }
  0x40   : > { %1504 = vmatmul.mubr.msk.f32.gmra.mrb[22].mxu0 %vm273_vm0, %v253_v30 }
  0x41   : > { %1506 = vmatprep.mubr.msk.f32.mxu0 %vm273_vm0, %v254_v31 }
  0x44   : > { %1507 = vmatmul.mubr.msk.f32.gmra.mrb[24].mxu0 %vm273_vm0, %v255_v32 }
  0x45   : > { %1509 = vmatprep.mubr.msk.f32.mxu0 %vm273_vm0, %v256_v33 }
  0x48   : > { %1510 = vmatmul.mubr.msk.f32.gmra.mrb[26].mxu0 %vm273_vm0, %v257_v34 }
  0x49   : > { %1512 = vmatprep.mubr.msk.f32.mxu0 %vm273_vm0, %v258_v35 }
  0x4c   : > { %1513 = vmatmul.mubr.msk.f32.gmra.mrb[28].mxu0 %vm273_vm0, %v259_v36 }
  0x4d   : > { %1515 = vmatprep.mubr.msk.f32.mxu0 %vm273_vm0, %v260_v37 }
  0x50   : > { %1516 = vmatmul.mubr.msk.f32.gmra.mrb[30].mxu0 %vm273_vm0, %v261_v38 }
  0xe7   : > { %v1472_v52 = vpop.f32.mrb[0].mxu0 }
  0xe8   : > { %v1851_v53 = vadd.f32 %v1472_v52, %v1848_v51  ;;  %v436_v54 = vpop.f32.mrb[1].mxu0 }
  0xe9   : > { %v1854_v55 = vadd.f32 %v1848_v51, %v436_v54 }
  0xea   : > { %v596_v56 = vmul.f32 %v1851_v53, %v1851_v53 }
  0xeb   : > { %v595_v57 = vmul.f32 %v1854_v55, %v1854_v55  ;;  %v1475_v58 = vpop.f32.mrb[2].mxu0 }
  0xec   : > { %v628_v59 = vmul.f32 %v596_v56, %v1851_v53  ;;  %v1862_v60 = vadd.f32 %v1475_v58, %v1848_v51  ;;  %v446_v61 = vpop.f32.mrb[3].mxu0 }
  0xed   : > { %v627_v62 = vmul.f32 %v595_v57, %v1854_v55  ;;  %v1866_v63 = vadd.f32 %v1848_v51, %v446_v61 }
  0xee   : > { %v660_v0 = vmul.f32 0.044715, %v628_v59  ;;  %v598_v1 = vmul.f32 %v1862_v60, %v1862_v60 }
  0xef   : > { %v659_v2 = vmul.f32 0.044715, %v627_v62  ;;  %v597_v3 = vmul.f32 %v1866_v63, %v1866_v63  ;;  %v1478_v4 = vpop.f32.mrb[4].mxu0 }
  0xf0   : > { %v692_v5 = vadd.f32 %v660_v0, %v1851_v53  ;;  %v630_v6 = vmul.f32 %v598_v1, %v1862_v60  ;;  %v1875_v7 = vadd.f32 %v1478_v4, %v1848_v51  ;;  %v456_v8 = vpop.f32.mrb[5].mxu0 }
  0xf1   : > { %v691_v9 = vadd.f32 %v659_v2, %v1854_v55  ;;  %v629_v10 = vmul.f32 %v597_v3, %v1866_v63  ;;  %v1880_v11 = vadd.f32 %v1848_v51, %v456_v8 }
  0xf2   : > { %v724_v12 = vmul.f32 0.7978846, %v692_v5  ;;  %v662_v13 = vmul.f32 0.044715, %v630_v6  ;;  %v600_v14 = vmul.f32 %v1875_v7, %v1875_v7 }
  0xf3   : > { %v723_v15 = vmul.f32 0.7978846, %v691_v9  ;;  %v661_v16 = vmul.f32 0.044715, %v629_v10  ;;  %v599_v17 = vmul.f32 %v1880_v11, %v1880_v11  ;;  %v1481_v18 = vpop.f32.mrb[6].mxu0 }
  0xf4   : > { %1622 = vtanh.f32 %v724_v12  ;;  %v632_v19 = vmul.f32 %v600_v14, %v1875_v7  ;;  %v1888_v20 = vadd.f32 %v1481_v18, %v1848_v51  ;;  %v466_v21 = vpop.f32.mrb[7].mxu0  ;;  %v694_v22 = vadd.f32 %v662_v13, %v1862_v60 }
  0xf5   : > { %v631_v23 = vmul.f32 %v599_v17, %v1880_v11  ;;  %v1893_v24 = vadd.f32 %v1848_v51, %v466_v21  ;;  %v693_v25 = vadd.f32 %v661_v16, %v1866_v63  ;;  %1624 = vtanh.f32 %v723_v15 }
  0xf6   : > { %v664_v26 = vmul.f32 0.044715, %v632_v19  ;;  %v602_v27 = vmul.f32 %v1888_v20, %v1888_v20  ;;  %v726_v36 = vmul.f32 0.7978846, %v694_v22 }
  0xf7   : > { %v663_v28 = vmul.f32 0.044715, %v631_v23  ;;  %v601_v29 = vmul.f32 %v1893_v24, %v1893_v24  ;;  %v1484_v30 = vpop.f32.mrb[8].mxu0  ;;  %v725_v31 = vmul.f32 0.7978846, %v693_v25 }
  0xf8   : > { %v696_v32 = vadd.f32 %v664_v26, %v1875_v7  ;;  %v634_v33 = vmul.f32 %v602_v27, %v1888_v20  ;;  %v1903_v34 = vadd.f32 %v1484_v30, %v1848_v51  ;;  %v476_v35 = vpop.f32.mrb[9].mxu0 }
  0xf9   : > { %v695_v37 = vadd.f32 %v663_v28, %v1880_v11  ;;  %v633_v38 = vmul.f32 %v601_v29, %v1893_v24  ;;  %v1908_v39 = vadd.f32 %v1848_v51, %v476_v35  ;;  %1626 = vtanh.f32 %v725_v31 }
  0xfa   : > { %v728_v40 = vmul.f32 0.7978846, %v696_v32  ;;  %v666_v41 = vmul.f32 0.044715, %v634_v33  ;;  %v604_v42 = vmul.f32 %v1903_v34, %v1903_v34  ;;  %1628 = vtanh.f32 %v726_v36 }
  0xfb   : > { %v665_v43 = vmul.f32 0.044715, %v633_v38  ;;  %v603_v44 = vmul.f32 %v1908_v39, %v1908_v39  ;;  %v1487_v45 = vpop.f32.mrb[10].mxu0  ;;  %v727_v46 = vmul.f32 0.7978846, %v695_v37 }
  0xfc   : > { %v698_v47 = vadd.f32 %v666_v41, %v1888_v20  ;;  %v636_v48 = vmul.f32 %v604_v42, %v1903_v34  ;;  %v1917_v49 = vadd.f32 %v1487_v45, %v1848_v51  ;;  %v486_v50 = vpop.f32.mrb[11].mxu0  ;;  %1630 = vtanh.f32 %v728_v40 }
  0xfd   : > { %v697_v52 = vadd.f32 %v665_v43, %v1893_v24  ;;  %v635_v54 = vmul.f32 %v603_v44, %v1908_v39  ;;  %v1922_v56 = vadd.f32 %v1848_v51, %v486_v50  ;;  %1632 = vtanh.f32 %v727_v46 }
  0xfe   : > { %v1623_v57 = vpop.eup %1622  ;;  %v730_v58 = vmul.f32 0.7978846, %v698_v47  ;;  %v668_v59 = vmul.f32 0.044715, %v636_v48  ;;  %v606_v61 = vmul.f32 %v1917_v49, %v1917_v49 }
  0xff   : > { %v788_v62 = vadd.f32 1.0, %v1623_v57  ;;  %v729_v0 = vmul.f32 0.7978846, %v697_v52  ;;  %v667_v1 = vmul.f32 0.044715, %v635_v54  ;;  %v605_v2 = vmul.f32 %v1922_v56, %v1922_v56  ;;  %v1490_v3 = vpop.f32.mrb[12].mxu0  ;;  %v1625_v4 = vpop.eup %1624 }
 0x100   : > { %v700_v5 = vadd.f32 %v668_v59, %v1903_v34  ;;  %v638_v6 = vmul.f32 %v606_v61, %v1917_v49  ;;  %v1931_v8 = vadd.f32 %v1490_v3, %v1848_v51  ;;  %v496_v9 = vpop.f32.mrb[13].mxu0  ;;  %1634 = vtanh.f32 %v730_v58 }
 0x101   : > { %v820_v10 = vmul.f32 0.5, %v788_v62  ;;  %v699_v12 = vadd.f32 %v667_v1, %v1908_v39  ;;  %v637_v13 = vmul.f32 %v605_v2, %v1922_v56  ;;  %v1938_v17 = vadd.f32 %v1848_v51, %v496_v9 }
 0x102   : > { %v732_v14 = vmul.f32 0.7978846, %v700_v5  ;;  %v670_v15 = vmul.f32 0.044715, %v638_v6  ;;  %v608_v16 = vmul.f32 %v1931_v8, %v1931_v8  ;;  %1636 = vtanh.f32 %v729_v0 }
 0x103   : > { %v731_v18 = vmul.f32 0.7978846, %v699_v12  ;;  %v669_v19 = vmul.f32 0.044715, %v637_v13  ;;  %v1493_v21 = vpop.f32.mrb[14].mxu0  ;;  %v787_v22 = vadd.f32 1.0, %v1625_v4  ;;  %v1627_v23 = vpop.eup %1626  ;;  %v852_v25 = vmul.f32 %v820_v10, %v1851_v53 }
 0x104   : > { %v702_v26 = vadd.f32 %v670_v15, %v1917_v49  ;;  %v640_v27 = vmul.f32 %v608_v16, %v1931_v8  ;;  %v607_v28 = vmul.f32 %v1938_v17, %v1938_v17  ;;  %v506_v29 = vpop.f32.mrb[15].mxu0  ;;  %1638 = vtanh.f32 %v732_v14  ;;  %v1629_v37 = vpop.eup %1628 }
 0x105   : > { %v701_v30 = vadd.f32 %v669_v19, %v1922_v56  ;;  %v1947_v31 = vadd.f32 %v1493_v21, %v1848_v51  ;;  %v1950_v32 = vadd.f32 %v1848_v51, %v506_v29  ;;  %v819_v36 = vmul.f32 0.5, %v787_v22 }
 0x106   : > { %v734_v33 = vmul.f32 0.7978846, %v702_v26  ;;  %v672_v35 = vmul.f32 0.044715, %v640_v27  ;;  %v639_v53 = vmul.f32 %v607_v28, %v1938_v17  ;;  %1640 = vtanh.f32 %v731_v18  ;;  %v1957_v43 = vpop.eup %1630 }
 0x107   : > { %v610_v38 = vmul.f32 %v1947_v31, %v1947_v31  ;;  %v609_v40 = vmul.f32 %v1950_v32, %v1950_v32  ;;  %v1496_v41 = vpop.f32.mrb[16].mxu0  ;;  %v789_v42 = vadd.f32 1.0, %v1627_v23  ;;  %v733_v44 = vmul.f32 0.7978846, %v701_v30  ;;  %v1633_v57 = vpop.eup %1632 }
 0x108   : > { %v704_v45 = vadd.f32 %v672_v35, %v1931_v8  ;;  %v671_v46 = vmul.f32 0.044715, %v639_v53  ;;  %v851_v47 = vmul.f32 %v819_v36, %v1854_v55  ;;  %v516_v48 = vpop.f32.mrb[17].mxu0  ;;  %1642 = vtanh.f32 %v734_v33 }
 0x109   : > { %v642_v50 = vmul.f32 %v610_v38, %v1947_v31  ;;  %v641_v52 = vmul.f32 %v609_v40, %v1950_v32  ;;  %v1964_v54 = vadd.f32 %v1496_v41, %v1848_v51  ;;  %v1969_v61 = vadd.f32 %v1848_v51, %v516_v48 }
 0x10a   : > { %v736_v58 = vmul.f32 0.7978846, %v704_v45  ;;  %v703_v59 = vadd.f32 %v671_v46, %v1938_v17  ;;  %1534 = vmatprep.mubr.msk.f32.mxu0 %vm898_vm1, %v851_v47  ;;  %v821_v62 = vmul.f32 0.5, %v789_v42  ;;  %v1971_v55 = vpop.eup %1634  ;;  %v790_v4 = vadd.f32 1.0, %v1629_v37 }
 0x10b   : > { %v674_v0 = vmul.f32 0.044715, %v642_v50  ;;  %v673_v1 = vmul.f32 0.044715, %v641_v52  ;;  %v612_v2 = vmul.f32 %v1964_v54, %v1964_v54  ;;  %1535 = vmatmul.mubr.msk.f32.vlgmr.msra.gmra.mrb[32].mxu0 %vm898_vm1, %v852_v25  ;;  %v1499_v3 = vpop.f32.mrb[18].mxu0  ;;  %1644 = vtanh.f32 %v733_v44 }
 0x10c   : > { %v735_v5 = vmul.f32 0.7978846, %v703_v59  ;;  %v611_v6 = vmul.f32 %v1969_v61, %v1969_v61  ;;  %v853_v9 = vmul.f32 %v821_v62, %v1866_v63  ;;  %v526_v10 = vpop.f32.mrb[19].mxu0  ;;  %v1637_v12 = vpop.eup %1636  ;;  %v1983_v16 = vadd.f32 %v1499_v3, %v1848_v51 }
 0x10d   : > { %v706_v13 = vadd.f32 %v674_v0, %v1947_v31  ;;  %v705_v14 = vadd.f32 %v673_v1, %v1950_v32  ;;  %v644_v15 = vmul.f32 %v612_v2, %v1964_v54  ;;  %1646 = vtanh.f32 %v736_v58 }
 0x10e   : > { %v643_v18 = vmul.f32 %v611_v6, %v1969_v61  ;;  %1537 = vmatprep.mubr.msk.f32.mxu1 %vm898_vm1, %v853_v9  ;;  %v822_v19 = vmul.f32 0.5, %v790_v4  ;;  %v1988_v21 = vadd.f32 %v1848_v51, %v526_v10  ;;  %v1990_v63 = vpop.eup %1638  ;;  %1648 = vtanh.f32 %v735_v5 }
 0x10f   : > { %v738_v22 = vmul.f32 0.7978846, %v706_v13  ;;  %v676_v23 = vmul.f32 0.044715, %v644_v15  ;;  %v614_v25 = vmul.f32 %v1983_v16, %v1983_v16  ;;  %v791_v29 = vadd.f32 1.0, %v1633_v57  ;;  %v1502_v30 = vpop.f32.mrb[20].mxu0 }
 0x110   : > { %v675_v26 = vmul.f32 0.044715, %v643_v18  ;;  %v854_v27 = vmul.f32 %v822_v19, %v1862_v60  ;;  %v613_v28 = vmul.f32 %v1988_v21, %v1988_v21  ;;  %v1641_v33 = vpop.eup %1640  ;;  %v737_v35 = vmul.f32 0.7978846, %v705_v14  ;;  %v536_v38 = vpop.f32.mrb[21].mxu0 }
 0x111   : > { %v708_v53 = vadd.f32 %v676_v23, %v1964_v54  ;;  %v646_v36 = vmul.f32 %v614_v25, %v1983_v16  ;;  %v2000_v37 = vadd.f32 %v1502_v30, %v1848_v51  ;;  %1650 = vtanh.f32 %v738_v22 }
 0x112   : > { %v707_v40 = vadd.f32 %v675_v26, %v1969_v61  ;;  %1538 = vmatmul.mubr.msk.f32.vlgmr.msra.gmra.mrb[0].mxu1 %vm898_vm1, %v854_v27  ;;  %v645_v60 = vmul.f32 %v613_v28, %v1988_v21  ;;  %v823_v41 = vmul.f32 0.5, %v791_v29  ;;  %v2005_v42 = vpop.eup %1642  ;;  %v792_v47 = vadd.f32 1.0, %v1957_v43 }
 0x113   : > { %v740_v44 = vmul.f32 0.7978846, %v708_v53  ;;  %v678_v45 = vmul.f32 0.044715, %v646_v36  ;;  %v616_v46 = vmul.f32 %v2000_v37, %v2000_v37  ;;  %v1505_v48 = vpop.f32.mrb[22].mxu0  ;;  %v2012_v58 = vadd.f32 %v1848_v51, %v536_v38 }
 0x114   : > { %v739_v50 = vmul.f32 0.7978846, %v707_v40  ;;  %v677_v52 = vmul.f32 0.044715, %v645_v60  ;;  %v855_v57 = vmul.f32 %v823_v41, %v1880_v11  ;;  %v546_v59 = vpop.f32.mrb[23].mxu0  ;;  %1652 = vtanh.f32 %v737_v35 }
 0x115   : > { %v710_v62 = vadd.f32 %v678_v45, %v1983_v16  ;;  %v648_v0 = vmul.f32 %v616_v46, %v2000_v37  ;;  %v824_v1 = vmul.f32 0.5, %v792_v47  ;;  %v1645_v2 = vpop.eup %1644  ;;  %1654 = vtanh.f32 %v740_v44 }
 0x116   : > { %v709_v3 = vadd.f32 %v677_v52, %v1988_v21  ;;  %1540 = vmatprep.mubr.msk.f32.mxu1 %vm898_vm1, %v855_v57  ;;  %v615_v43 = vmul.f32 %v2012_v58, %v2012_v58  ;;  %v793_v11 = vadd.f32 1.0, %v1637_v12  ;;  %v2022_v9 = vadd.f32 %v1505_v48, %v1848_v51 }
 0x117   : > { %v742_v4 = vmul.f32 0.7978846, %v710_v62  ;;  %v680_v5 = vmul.f32 0.044715, %v648_v0  ;;  %v856_v6 = vmul.f32 %v824_v1, %v1875_v7  ;;  %v1508_v10 = vpop.f32.mrb[24].mxu0  ;;  %v2024_v13 = vpop.eup %1646  ;;  %1656 = vtanh.f32 %v739_v50 }
 0x118   : > { %v647_v14 = vmul.f32 %v615_v43, %v2012_v58  ;;  %v825_v15 = vmul.f32 0.5, %v793_v11  ;;  %v794_v18 = vadd.f32 1.0, %v1971_v55  ;;  %v556_v19 = vpop.f32.mrb[25].mxu0  ;;  %v2028_v22 = vpop.eup %1648  ;;  %v741_v12 = vmul.f32 0.7978846, %v709_v3 }
 0x119   : > { %v712_v23 = vadd.f32 %v680_v5, %v2000_v37  ;;  %1541 = vmatmul.mubr.msk.f32.gmra.mrb[2].mxu1 %vm898_vm1, %v856_v6  ;;  %v618_v7 = vmul.f32 %v2022_v9, %v2022_v9  ;;  %v2035_v25 = vadd.f32 %v1848_v51, %v546_v59  ;;  %1658 = vtanh.f32 %v742_v4 }
 0x11a   : > { %v679_v26 = vmul.f32 0.044715, %v647_v14  ;;  %v857_v27 = vmul.f32 %v825_v15, %v1893_v24  ;;  %v826_v28 = vmul.f32 0.5, %v794_v18  ;;  %v795_v35 = vadd.f32 1.0, %v1641_v33 }
 0x11b   : > { %v744_v55 = vmul.f32 0.7978846, %v712_v23  ;;  %v650_v29 = vmul.f32 %v618_v7, %v2022_v9  ;;  %v617_v30 = vmul.f32 %v2035_v25, %v2035_v25  ;;  %v1511_v53 = vpop.f32.mrb[26].mxu0  ;;  %v2041_v36 = vpop.eup %1650  ;;  %v2047_v60 = vadd.f32 %v1508_v10, %v1848_v51 }
 0x11c   : > { %v711_v38 = vadd.f32 %v679_v26, %v2012_v58  ;;  %1543 = vmatprep.mubr.msk.f32.mxu1 %vm898_vm1, %v857_v27  ;;  %v858_v40 = vmul.f32 %v826_v28, %v1888_v20  ;;  %v796_v24 = vadd.f32 1.0, %v1990_v63  ;;  %v566_v41 = vpop.f32.mrb[27].mxu0  ;;  %1660 = vtanh.f32 %v741_v12 }
 0x11d   : > { %v682_v44 = vmul.f32 0.044715, %v650_v29  ;;  %v649_v45 = vmul.f32 %v617_v30, %v2035_v25  ;;  %v827_v33 = vmul.f32 0.5, %v795_v35  ;;  %v620_v47 = vmul.f32 %v2047_v60, %v2047_v60 }
 0x11e   : > { %v743_v46 = vmul.f32 0.7978846, %v711_v38  ;;  %1544 = vmatmul.mubr.msk.f32.gmra.mrb[4].mxu1 %vm898_vm1, %v858_v40  ;;  %v828_v48 = vmul.f32 0.5, %v796_v24  ;;  %v2055_v20 = vadd.f32 %v1848_v51, %v556_v19  ;;  %v1653_v50 = vpop.eup %1652  ;;  %v797_v59 = vadd.f32 1.0, %v1645_v2 }
 0x11f   : > { %v714_v52 = vadd.f32 %v682_v44, %v2022_v9  ;;  %v681_v63 = vmul.f32 0.044715, %v649_v45  ;;  %v859_v57 = vmul.f32 %v827_v33, %v1908_v39  ;;  %v1514_v62 = vpop.f32.mrb[28].mxu0  ;;  %v2059_v0 = vpop.eup %1654  ;;  %1662 = vtanh.f32 %v744_v55 }
 0x120   : > { %v652_v1 = vmul.f32 %v620_v47, %v2047_v60  ;;  %v860_v3 = vmul.f32 %v828_v48, %v1903_v34  ;;  %v619_v43 = vmul.f32 %v2055_v20, %v2055_v20  ;;  %v576_v11 = vpop.f32.mrb[29].mxu0  ;;  %v829_v6 = vmul.f32 0.5, %v797_v59 }
 0x121   : > { %v746_v4 = vmul.f32 0.7978846, %v714_v52  ;;  %v713_v5 = vadd.f32 %v681_v63, %v2035_v25  ;;  %1546 = vmatprep.mubr.msk.f32.mxu1 %vm898_vm1, %v859_v57  ;;  %v2068_v39 = vadd.f32 %v1511_v53, %v1848_v51  ;;  %v2070_v2 = vpop.eup %1656  ;;  %v798_v14 = vadd.f32 1.0, %v2005_v42 }
 0x122   : > { %v684_v10 = vmul.f32 0.044715, %v652_v1  ;;  %1547 = vmatmul.mubr.msk.f32.gmra.mrb[6].mxu1 %vm898_vm1, %v860_v3  ;;  %v651_v34 = vmul.f32 %v619_v43, %v2055_v20  ;;  %v2076_v15 = vadd.f32 %v1848_v51, %v566_v41  ;;  %1664 = vtanh.f32 %v743_v46 }
 0x123   : > { %v745_v18 = vmul.f32 0.7978846, %v713_v5  ;;  %v861_v19 = vmul.f32 %v829_v6, %v1922_v56  ;;  %v622_v12 = vmul.f32 %v2068_v39, %v2068_v39  ;;  %v1517_v23 = vpop.f32.mrb[30].mxu0  ;;  %v2081_v7 = vpop.eup %1658  ;;  %v830_v28 = vmul.f32 0.5, %v798_v14 }
 0x124   : > { %v716_v26 = vadd.f32 %v684_v10, %v2047_v60  ;;  %v683_v27 = vmul.f32 0.044715, %v651_v34  ;;  %v621_v42 = vmul.f32 %v2076_v15, %v2076_v15  ;;  %v586_v55 = vpop.f32.mrb[31].mxu0  ;;  %1666 = vtanh.f32 %v746_v4 }
 0x125   : > { %1549 = vmatprep.mubr.msk.f32.mxu1 %vm898_vm1, %v861_v19  ;;  %v654_v29 = vmul.f32 %v622_v12, %v2068_v39  ;;  %v799_v56 = vadd.f32 1.0, %v2028_v22  ;;  %v2090_v30 = vadd.f32 %v1514_v62, %v1848_v51  ;;  %1668 = vtanh.f32 %v745_v18 }
 0x126   : > { %v715_v35 = vadd.f32 %v683_v27, %v2055_v20  ;;  %v862_v53 = vmul.f32 %v830_v28, %v1917_v49  ;;  %v653_v38 = vmul.f32 %v621_v42, %v2076_v15  ;;  %v1661_v40 = vpop.eup %1660  ;;  %v800_v45 = vadd.f32 1.0, %v2024_v13 }
 0x127   : > { %v686_v24 = vmul.f32 0.044715, %v654_v29  ;;  %v831_v41 = vmul.f32 0.5, %v799_v56  ;;  %v624_v44 = vmul.f32 %v2090_v30, %v2090_v30  ;;  %v748_v33 = vmul.f32 0.7978846, %v716_v26 }
 0x128   : > { %v747_v22 = vmul.f32 0.7978846, %v715_v35  ;;  %1550 = vmatmul.mubr.msk.f32.gmra.mrb[8].mxu1 %vm898_vm1, %v862_v53  ;;  %v685_v46 = vmul.f32 0.044715, %v653_v38  ;;  %v2100_v47 = vadd.f32 %v1848_v51, %v576_v11  ;;  %v832_v63 = vmul.f32 0.5, %v800_v45 }
 0x129   : > { %v718_v49 = vadd.f32 %v686_v24, %v2068_v39  ;;  %v863_v48 = vmul.f32 %v831_v41, %v1938_v17  ;;  %v656_v52 = vmul.f32 %v624_v44, %v2090_v30  ;;  %v1663_v57 = vpop.eup %1662  ;;  %v801_v62 = vadd.f32 1.0, %v1653_v50 }
 0x12a   : > { %1670 = vtanh.f32 %v747_v22  ;;  %v717_v59 = vadd.f32 %v685_v46, %v2076_v15  ;;  %v623_v13 = vmul.f32 %v2100_v47, %v2100_v47  ;;  %v864_v43 = vmul.f32 %v832_v63, %v1931_v8 }
 0x12b   : > { %v750_v1 = vmul.f32 0.7978846, %v718_v49  ;;  %1552 = vmatprep.mubr.msk.f32.mxu1 %vm898_vm1, %v863_v48  ;;  %v688_v3 = vmul.f32 0.044715, %v656_v52  ;;  %v2111_v11 = vadd.f32 %v1517_v23, %v1848_v51  ;;  %v833_v5 = vmul.f32 0.5, %v801_v62 }
 0x12c   : > { %v749_v17 = vmul.f32 0.7978846, %v717_v59  ;;  %v655_v4 = vmul.f32 %v623_v13, %v2100_v47  ;;  %v802_v6 = vadd.f32 1.0, %v2041_v36  ;;  %v1665_v10 = vpop.eup %1664  ;;  %1672 = vtanh.f32 %v748_v33  ;;  %1553 = vmatmul.mubr.msk.f32.gmra.mrb[10].mxu1 %vm898_vm1, %v864_v43 }
 0x12d   : > { %v720_v34 = vadd.f32 %v688_v3, %v2090_v30  ;;  %v626_v50 = vmul.f32 %v2111_v11, %v2111_v11  ;;  %v2120_v8 = vadd.f32 %v1848_v51, %v586_v55  ;;  %v865_v18 = vmul.f32 %v833_v5, %v1950_v32 }
 0x12e   : > { %1674 = vtanh.f32 %v749_v17  ;;  %v687_v14 = vmul.f32 0.044715, %v655_v4  ;;  %v834_v19 = vmul.f32 0.5, %v802_v6  ;;  %v1667_v12 = vpop.eup %1666  ;;  %v803_v26 = vadd.f32 1.0, %v2070_v2 }
 0x12f   : > { %1676 = vtanh.f32 %v750_v1  ;;  %v658_v36 = vmul.f32 %v626_v50, %v2111_v11  ;;  %v625_v23 = vmul.f32 %v2120_v8, %v2120_v8  ;;  %v1669_v27 = vpop.eup %1668  ;;  %1555 = vmatprep.mubr.msk.f32.mxu1 %vm898_vm1, %v865_v18  ;;  %v804_v42 = vadd.f32 1.0, %v2059_v0 }
 0x130   : > { %v719_v28 = vadd.f32 %v687_v14, %v2100_v47  ;;  %v866_v51 = vmul.f32 %v834_v19, %v1947_v31  ;;  %v805_v32 = vadd.f32 1.0, %v1661_v40  ;;  %v752_v55 = vmul.f32 0.7978846, %v720_v34 }
 0x131   : > { %v690_v29 = vmul.f32 0.044715, %v658_v36  ;;  %v657_v56 = vmul.f32 %v625_v23, %v2120_v8  ;;  %v835_v35 = vmul.f32 0.5, %v803_v26  ;;  %v836_v38 = vmul.f32 0.5, %v804_v42 }
 0x132   : > { %v751_v53 = vmul.f32 0.7978846, %v719_v28  ;;  %1556 = vmatmul.mubr.msk.f32.gmra.mrb[12].mxu1 %vm898_vm1, %v866_v51  ;;  %v837_v2 = vmul.f32 0.5, %v805_v32  ;;  %v806_v24 = vadd.f32 1.0, %v2081_v7  ;;  %v807_v45 = vadd.f32 1.0, %v1665_v10 }
 0x133   : > { %v722_v41 = vadd.f32 %v690_v29, %v2111_v11  ;;  %v689_v44 = vmul.f32 0.044715, %v657_v56  ;;  %v867_v31 = vmul.f32 %v835_v35, %v1969_v61  ;;  %v868_v40 = vmul.f32 %v836_v38, %v1964_v54 }
 0x134   : > { %v1671_v0 = vpop.eup %1670  ;;  %1678 = vtanh.f32 %v751_v53  ;;  %v869_v33 = vmul.f32 %v837_v2, %v1988_v21  ;;  %v838_v22 = vmul.f32 0.5, %v806_v24  ;;  %v839_v49 = vmul.f32 0.5, %v807_v45 }
 0x135   : > { %v721_v46 = vadd.f32 %v689_v44, %v2120_v8  ;;  %1558 = vmatprep.mubr.msk.f32.mxu1 %vm898_vm1, %v867_v31  ;;  %v808_v48 = vadd.f32 1.0, %v1663_v57  ;;  %1680 = vtanh.f32 %v752_v55  ;;  %v809_v7 = vadd.f32 1.0, %v1669_v27 }
 0x136   : > { %1559 = vmatmul.mubr.msk.f32.gmra.mrb[14].mxu1 %vm898_vm1, %v868_v40  ;;  %v1673_v52 = vpop.eup %1672  ;;  %v754_v61 = vmul.f32 0.7978846, %v722_v41  ;;  %v871_v54 = vmul.f32 %v839_v49, %v2012_v58  ;;  %v811_v59 = vadd.f32 1.0, %v1671_v0  ;;  %v870_v13 = vmul.f32 %v838_v22, %v1983_v16 }
 0x137   : > { %v753_v63 = vmul.f32 0.7978846, %v721_v46  ;;  %1561 = vmatprep.mubr.msk.f32.mxu1 %vm898_vm1, %v869_v33  ;;  %v840_v62 = vmul.f32 0.5, %v808_v48  ;;  %v841_v1 = vmul.f32 0.5, %v809_v7  ;;  %v810_v3 = vadd.f32 1.0, %v1667_v12 }
 0x138   : > { %v1675_v21 = vpop.eup %1674  ;;  %v843_v17 = vmul.f32 0.5, %v811_v59  ;;  %v812_v6 = vadd.f32 1.0, %v1673_v52 }
 0x139   : > { %v1677_v43 = vpop.eup %1676  ;;  %1682 = vtanh.f32 %v753_v63  ;;  %v873_v57 = vmul.f32 %v841_v1, %v2035_v25  ;;  %v813_v4 = vadd.f32 1.0, %v1675_v21  ;;  %v872_v58 = vmul.f32 %v840_v62, %v2000_v37 }
 0x13a   : > { %1562 = vmatmul.mubr.msk.f32.gmra.mrb[16].mxu1 %vm898_vm1, %v870_v13  ;;  %1684 = vtanh.f32 %v754_v61  ;;  %v842_v5 = vmul.f32 0.5, %v810_v3  ;;  %v875_v16 = vmul.f32 %v843_v17, %v2055_v20  ;;  %v844_v19 = vmul.f32 0.5, %v812_v6 }
 0x13b   : > { %1564 = vmatprep.mubr.msk.f32.mxu1 %vm898_vm1, %v871_v54  ;;  %v845_v34 = vmul.f32 0.5, %v813_v4  ;;  %v814_v25 = vadd.f32 1.0, %v1677_v43 }
 0x13c   : > { %v874_v18 = vmul.f32 %v842_v5, %v2022_v9  ;;  %v876_v23 = vmul.f32 %v844_v19, %v2047_v60 }
 0x13d   : > { %v877_v37 = vmul.f32 %v845_v34, %v2076_v15  ;;  %v846_v26 = vmul.f32 0.5, %v814_v25 }
 0x13e   : > { %v1679_v10 = vpop.eup %1678  ;;  %1565 = vmatmul.mubr.msk.f32.gmra.mrb[18].mxu1 %vm898_vm1, %v872_v58 }
 0x13f   : > { %1567 = vmatprep.mubr.msk.f32.mxu1 %vm898_vm1, %v873_v57  ;;  %v815_v50 = vadd.f32 1.0, %v1679_v10  ;;  %v1681_v14 = vpop.eup %1680  ;;  %v878_v42 = vmul.f32 %v846_v26, %v2068_v39  ;;  %v2168_v39 = vld [vmem:[#allocation2] ss:$0 sm:$0xff] }
 0x140   : > { %v816_v27 = vadd.f32 1.0, %v1681_v14 }
 0x141   : > { %v847_v36 = vmul.f32 0.5, %v815_v50 }
 0x142   : > { %1568 = vmatmul.mubr.msk.f32.gmra.mrb[20].mxu1 %vm898_vm1, %v874_v18  ;;  %v848_v32 = vmul.f32 0.5, %v816_v27 }
 0x143   : > { %v1683_v12 = vpop.eup %1682  ;;  %1570 = vmatprep.mubr.msk.f32.mxu1 %vm898_vm1, %v875_v16  ;;  %v879_v9 = vmul.f32 %v847_v36, %v2100_v47 }
 0x144   : > { %v817_v20 = vadd.f32 1.0, %v1683_v12  ;;  %v1685_v28 = vpop.eup %1684  ;;  %v880_v15 = vmul.f32 %v848_v32, %v2090_v30 }
 0x145   : > { %v818_v55 = vadd.f32 1.0, %v1685_v28 }
 0x146   : > { %1571 = vmatmul.mubr.msk.f32.gmra.mrb[22].mxu1 %vm898_vm1, %v876_v23  ;;  %v849_v51 = vmul.f32 0.5, %v817_v20 }
 0x147   : > { %1573 = vmatprep.mubr.msk.f32.mxu1 %vm898_vm1, %v877_v37  ;;  %v850_v29 = vmul.f32 0.5, %v818_v55 }
 0x148   : > { %v881_v60 = vmul.f32 %v849_v51, %v2120_v8 }
 0x149   : > { %v882_v47 = vmul.f32 %v850_v29, %v2111_v11 }
 0x14a   : > { %1574 = vmatmul.mubr.msk.f32.gmra.mrb[24].mxu1 %vm898_vm1, %v878_v42 }
 0x14b   : > { %1576 = vmatprep.mubr.msk.f32.mxu1 %vm898_vm1, %v879_v9 }
 0x14e   : > { %1577 = vmatmul.mubr.msk.f32.gmra.mrb[26].mxu1 %vm898_vm1, %v880_v15 }
 0x14f   : > { %1579 = vmatprep.mubr.msk.f32.mxu1 %vm898_vm1, %v881_v60 }
 0x152   : > { %1580 = vmatmul.mubr.msk.f32.gmra.mrb[28].mxu1 %vm898_vm1, %v882_v47 }
 0x1de   : > { %v1536_v30 = vpop.f32.mrb[32].mxu0 }
 0x1df   : > { %v1067_v8 = vadd.f32 %v1536_v30, %v2168_v39  ;;  %v1061_v11 = vpop.f32.mrb[33].mxu0 }
 0x1e0   : > { %v1062_v56 = vadd.f32 %v2168_v39, %v1061_v11 }
 0x1e1   : > { %1222 = vst.msk [vmem:[%s2175_s6 + $0x8] sm:$0xff] %vm1220_vm2, %v1067_v8 }
 0x1e2   : > { %1221 = vst.msk [vmem:[%s2175_s6] sm:$0xff] %vm1220_vm2, %v1062_v56 }
 0x1e5   : > { %v1539_v35 = vpop.f32.mrb[0].mxu1 }
 0x1e6   : > { %v1077_v53 = vadd.f32 %v1539_v35, %v2168_v39  ;;  %v1071_v38 = vpop.f32.mrb[1].mxu1 }
 0x1e7   : > { %v1072_v2 = vadd.f32 %v2168_v39, %v1071_v38 }
 0x1e8   : > { %1224 = vst.msk [vmem:[%s2175_s6 + $0x18] sm:$0xff] %vm1220_vm2, %v1077_v53 }
 0x1e9   : > { %1223 = vst.msk [vmem:[%s2175_s6 + $0x10] sm:$0xff] %vm1220_vm2, %v1072_v2 }
 0x1ec   : > { %v1542_v24 = vpop.f32.mrb[2].mxu1 }
 0x1ed   : > { %v1087_v41 = vadd.f32 %v1542_v24, %v2168_v39  ;;  %v1081_v44 = vpop.f32.mrb[3].mxu1 }
 0x1ee   : > { %v1082_v31 = vadd.f32 %v2168_v39, %v1081_v44 }
 0x1ef   : > { %1226 = vst.msk [vmem:[%s2175_s6 + $0x28] sm:$0xff] %vm1220_vm2, %v1087_v41 }
 0x1f0   : > { %1225 = vst.msk [vmem:[%s2175_s6 + $0x20] sm:$0xff] %vm1220_vm2, %v1082_v31 }
 0x1f1   : > { %v1545_v45 = vpop.f32.mrb[4].mxu1 }
 0x1f2   : > { %v1097_v0 = vadd.f32 %v1545_v45, %v2168_v39  ;;  %v1091_v40 = vpop.f32.mrb[5].mxu1 }
 0x1f3   : > { %v1092_v33 = vadd.f32 %v2168_v39, %v1091_v40 }
 0x1f4   : > { %1228 = vst.msk [vmem:[%s2175_s6 + $0x38] sm:$0xff] %vm1220_vm2, %v1097_v0 }
 0x1f5   : > { %1227 = vst.msk [vmem:[%s2175_s6 + $0x30] sm:$0xff] %vm1220_vm2, %v1092_v33  ;;  %v1548_v22 = vpop.f32.mrb[6].mxu1 }
 0x1f6   : > { %v1107_v46 = vadd.f32 %v1548_v22, %v2168_v39  ;;  %v1101_v49 = vpop.f32.mrb[7].mxu1 }
 0x1f7   : > { %v1102_v48 = vadd.f32 %v2168_v39, %v1101_v49 }
 0x1f8   : > { %1230 = vst.msk [vmem:[%s2175_s6 + $0x48] sm:$0xff] %vm1220_vm2, %v1107_v46 }
 0x1f9   : > { %1229 = vst.msk [vmem:[%s2175_s6 + $0x40] sm:$0xff] %vm1220_vm2, %v1102_v48 }
 0x1fb   : > { %v1551_v7 = vpop.f32.mrb[8].mxu1 }
 0x1fc   : > { %v1117_v52 = vadd.f32 %v1551_v7, %v2168_v39  ;;  %v1111_v61 = vpop.f32.mrb[9].mxu1 }
 0x1fd   : > { %v1112_v63 = vadd.f32 %v2168_v39, %v1111_v61 }
 0x1fe   : > { %1232 = vst.msk [vmem:[%s2175_s6 + $0x58] sm:$0xff] %vm1220_vm2, %v1117_v52 }
 0x1ff   : > { %1231 = vst.msk [vmem:[%s2175_s6 + $0x50] sm:$0xff] %vm1220_vm2, %v1112_v63  ;;  %v1554_v54 = vpop.f32.mrb[10].mxu1 }
 0x200   : > { %v1127_v59 = vadd.f32 %v1554_v54, %v2168_v39  ;;  %v1121_v21 = vpop.f32.mrb[11].mxu1 }
 0x201   : > { %v1122_v13 = vadd.f32 %v2168_v39, %v1121_v21 }
 0x202   : > { %1234 = vst.msk [vmem:[%s2175_s6 + $0x68] sm:$0xff] %vm1220_vm2, %v1127_v59 }
 0x203   : > { %1233 = vst.msk [vmem:[%s2175_s6 + $0x60] sm:$0xff] %vm1220_vm2, %v1122_v13 }
 0x205   : > { %v1557_v62 = vpop.f32.mrb[12].mxu1 }
 0x206   : > { %v1137_v1 = vadd.f32 %v1557_v62, %v2168_v39  ;;  %v1131_v3 = vpop.f32.mrb[13].mxu1 }
 0x207   : > { %v1132_v43 = vadd.f32 %v2168_v39, %v1131_v3 }
 0x208   : > { %1236 = vst.msk [vmem:[%s2175_s6 + $0x78] sm:$0xff] %vm1220_vm2, %v1137_v1 }
 0x209   : > { %1235 = vst.msk [vmem:[%s2175_s6 + $0x70] sm:$0xff] %vm1220_vm2, %v1132_v43  ;;  %v1560_v57 = vpop.f32.mrb[14].mxu1 }
 0x20a   : > { %v1147_v17 = vadd.f32 %v1560_v57, %v2168_v39  ;;  %v1141_v4 = vpop.f32.mrb[15].mxu1 }
 0x20b   : > { %v1142_v58 = vadd.f32 %v2168_v39, %v1141_v4 }
 0x20c   : > { %1238 = vst.msk [vmem:[%s2175_s6 + $0x88] sm:$0xff] %vm1220_vm2, %v1147_v17 }
 0x20d   : > { %1237 = vst.msk [vmem:[%s2175_s6 + $0x80] sm:$0xff] %vm1220_vm2, %v1142_v58  ;;  %v1563_v5 = vpop.f32.mrb[16].mxu1 }
 0x20e   : > { %v1157_v6 = vadd.f32 %v1563_v5, %v2168_v39  ;;  %v1151_v10 = vpop.f32.mrb[17].mxu1 }
 0x20f   : > { %v1152_v16 = vadd.f32 %v2168_v39, %v1151_v10 }
 0x210   : > { %1240 = vst.msk [vmem:[%s2175_s6 + $0x98] sm:$0xff] %vm1220_vm2, %v1157_v6 }
 0x211   : > { %1239 = vst.msk [vmem:[%s2175_s6 + $0x90] sm:$0xff] %vm1220_vm2, %v1152_v16  ;;  %v1566_v34 = vpop.f32.mrb[18].mxu1 }
 0x212   : > { %v1167_v50 = vadd.f32 %v1566_v34, %v2168_v39  ;;  %v1161_v14 = vpop.f32.mrb[19].mxu1 }
 0x213   : > { %v1162_v18 = vadd.f32 %v2168_v39, %v1161_v14 }
 0x214   : > { %1242 = vst.msk [vmem:[%s2175_s6 + $0xa8] sm:$0xff] %vm1220_vm2, %v1167_v50 }
 0x215   : > { %1241 = vst.msk [vmem:[%s2175_s6 + $0xa0] sm:$0xff] %vm1220_vm2, %v1162_v18  ;;  %v1569_v19 = vpop.f32.mrb[20].mxu1 }
 0x216   : > { %v1177_v25 = vadd.f32 %v1569_v19, %v2168_v39  ;;  %v1171_v12 = vpop.f32.mrb[21].mxu1 }
 0x217   : > { %v1172_v37 = vadd.f32 %v2168_v39, %v1171_v12 }
 0x218   : > { %1244 = vst.msk [vmem:[%s2175_s6 + $0xb8] sm:$0xff] %vm1220_vm2, %v1177_v25 }
 0x219   : > { %1243 = vst.msk [vmem:[%s2175_s6 + $0xb0] sm:$0xff] %vm1220_vm2, %v1172_v37  ;;  %v1572_v36 = vpop.f32.mrb[22].mxu1 }
 0x21a   : > { %v1187_v23 = vadd.f32 %v1572_v36, %v2168_v39  ;;  %v1181_v26 = vpop.f32.mrb[23].mxu1 }
 0x21b   : > { %v1182_v27 = vadd.f32 %v2168_v39, %v1181_v26 }
 0x21c   : > { %1246 = vst.msk [vmem:[%s2175_s6 + $0xc8] sm:$0xff] %vm1220_vm2, %v1187_v23 }
 0x21d   : > { %1245 = vst.msk [vmem:[%s2175_s6 + $0xc0] sm:$0xff] %vm1220_vm2, %v1182_v27  ;;  %v1575_v20 = vpop.f32.mrb[24].mxu1 }
 0x21e   : > { %v1197_v28 = vadd.f32 %v1575_v20, %v2168_v39  ;;  %v1191_v9 = vpop.f32.mrb[25].mxu1 }
 0x21f   : > { %v1192_v51 = vadd.f32 %v2168_v39, %v1191_v9 }
 0x220   : > { %1248 = vst.msk [vmem:[%s2175_s6 + $0xd8] sm:$0xff] %vm1220_vm2, %v1197_v28 }
 0x221   : > { %1247 = vst.msk [vmem:[%s2175_s6 + $0xd0] sm:$0xff] %vm1220_vm2, %v1192_v51  ;;  %v1578_v42 = vpop.f32.mrb[26].mxu1 }
 0x222   : > { %v1207_v32 = vadd.f32 %v1578_v42, %v2168_v39  ;;  %v1201_v55 = vpop.f32.mrb[27].mxu1 }
 0x223   : > { %v1202_v60 = vadd.f32 %v2168_v39, %v1201_v55 }
 0x224   : > { %1250 = vst.msk [vmem:[%s2175_s6 + $0xe8] sm:$0xff] %vm1220_vm2, %v1207_v32 }
 0x225   : > { %1249 = vst.msk [vmem:[%s2175_s6 + $0xe0] sm:$0xff] %vm1220_vm2, %v1202_v60  ;;  %v1581_v15 = vpop.f32.mrb[28].mxu1 }
 0x226   : > { %v1217_v29 = vadd.f32 %v1581_v15, %v2168_v39  ;;  %v1211_v47 = vpop.f32.mrb[29].mxu1 }
 0x227   : > { %v1212_v30 = vadd.f32 %v2168_v39, %v1211_v47 }
 0x228   : > { %1252 = vst.msk [vmem:[%s2175_s6 + $0xf8] sm:$0xff] %vm1220_vm2, %v1217_v29 }
 0x229   : > { %1251 = vst.msk [vmem:[%s2175_s6 + $0xf0] sm:$0xff] %vm1220_vm2, %v1212_v30 }
 0x22a PF: > { %s17_s20 = sadd.s32 1, %s1692_s20  }
 0x22b   : > { %p14_p4 = scmp.ge.s32.totalorder %s17_s20, 4  }
 0x22d   :  { %16 = sbr.rel (!%p14_p4) target bundleno = 3 (0x3), region = 70 }

</bundles_post_ra>
